<compile_context>
chip_gen: v7x
topology: tpu7x:2x2x1
jax: 0.10.0
libtpu: 0.0.40
codegen_flags: <defaults>
</compile_context>

<pallas_src>
import functools

import numpy as np
import jax
import jax.numpy as jnp
from jax.experimental import pallas as pl
from jax.experimental.pallas import tpu as pltpu

ACT_DTYPE = jnp.bfloat16      # inter-kernel activation storage dtype


# ----------------------------------------------------------------------------
# In-kernel conv helpers (operate on f32 values held in vregs / VMEM)
# ----------------------------------------------------------------------------
def _taps_matmul(w_folded, taps, c_in):
    """y = sum_j w_folded[:, j*c_in:(j+1)*c_in] @ taps[j].

    Single folded MXU matmul (contraction = len(taps)*c_in) when the sublane
    concatenation is 8-aligned, else an unrolled per-tap loop."""
    if c_in % 8 == 0 and len(taps) > 1:
        xcat = jnp.concatenate(taps, axis=0)                 # (ntap*C_in, T)
        return jnp.dot(w_folded, xcat, preferred_element_type=jnp.float32)
    acc = None
    for j, t in enumerate(taps):
        part = jnp.dot(w_folded[:, j * c_in:(j + 1) * c_in], t,
                       preferred_element_type=jnp.float32)
        acc = part if acc is None else acc + part
    return acc


def _conv_same(x, w_folded, b, K, dil):
    """'same' dilated conv1d on a (C_in, T) tile; padding built in VMEM."""
    c_in, T = x.shape
    pad = dil * (K - 1) // 2
    if pad > 0:
        z = jnp.zeros((c_in, pad), x.dtype)
        xp = jnp.concatenate([z, x, z], axis=-1)             # (C_in, T + 2*pad)
    else:
        xp = x
    taps = [xp[:, k * dil:k * dil + T] for k in range(K)]
    return _taps_matmul(w_folded, taps, c_in) + b


def _prelu(x, a):
    return jnp.where(x >= 0, x, a * x)


def _full_spec(a):
    n = a.ndim
    return pl.BlockSpec(a.shape, lambda bb: (0,) * n)


# ----------------------------------------------------------------------------
# Kernel 1: (optional PReLU ->) conv1d (-> optional tanh)
# ----------------------------------------------------------------------------
def _conv_kernel(*refs, K, dil, apply_prelu, apply_tanh):
    if apply_prelu:
        x_ref, w_ref, b_ref, a_ref, o_ref = refs
    else:
        x_ref, w_ref, b_ref, o_ref = refs
    x = x_ref[0].astype(jnp.float32)                         # (C_in, T)
    if apply_prelu:
        x = _prelu(x, a_ref[...].astype(jnp.float32))
    y = _conv_same(x, w_ref[...], b_ref[...], K, dil)
    if apply_tanh:
        y = jnp.tanh(y)
    o_ref[0] = y.astype(o_ref.dtype)


def conv1d_fused(x, w_folded, b, *, K, dilation=1, alpha=None,
                 apply_prelu=False, apply_tanh=False, out_dtype=None):
    B, C_in, T = x.shape
    C_out = w_folded.shape[0]
    args = [x, w_folded, b]
    in_specs = [pl.BlockSpec((1, C_in, T), lambda bb: (bb, 0, 0)),
                _full_spec(w_folded), _full_spec(b)]
    if apply_prelu:                      # alpha only DMA'd when it is used
        args.append(alpha)
        in_specs.append(_full_spec(alpha))
    kernel = functools.partial(_conv_kernel, K=K, dil=dilation,
                               apply_prelu=apply_prelu, apply_tanh=apply_tanh)
    return pl.pallas_call(
        kernel,
        out_shape=jax.ShapeDtypeStruct((B, C_out, T), out_dtype or ACT_DTYPE),
        grid=(B,),
        in_specs=in_specs,
        out_specs=pl.BlockSpec((1, C_out, T), lambda bb: (bb, 0, 0)),
        compiler_params=pltpu.CompilerParams(
            dimension_semantics=("parallel",)),
    )(*args)


# ----------------------------------------------------------------------------
# Kernel 2: fused PReLU -> ConvTranspose1d (polyphase, phase-major output)
# ----------------------------------------------------------------------------
def _convtranspose_kernel(x_ref, wf_ref, b_ref, a_ref, o_ref, *,
                          shifts, M, lpad, rpad):
    x = x_ref[0].astype(jnp.float32)                         # (C_in, T)
    c_in = x.shape[0]
    x = _prelu(x, a_ref[...].astype(jnp.float32))            # fused pre-act
    parts = []
    if lpad:
        parts.append(jnp.zeros((c_in, lpad), jnp.float32))
    parts.append(x)
    if rpad:
        parts.append(jnp.zeros((c_in, rpad), jnp.float32))
    xe = jnp.concatenate(parts, axis=-1) if len(parts) > 1 else x
    b = b_ref[...].astype(jnp.float32)
    for r, sh in enumerate(shifts):                          # static unroll
        taps = [xe[:, lpad + s:lpad + s + M] for s in sh]
        y = _taps_matmul(wf_ref[r], taps, c_in) + b
        o_ref[0, r] = y.astype(o_ref.dtype)


def _phase_shifts(ksize, stride, padding):
    """Static per-output-phase input-frame offsets of the polyphase decomp:
       y[m*stride + r] = sum_kk w[:, :, kk]^T @ x[:, m + (r+p-kk)//stride]
       over kk with (kk - (r+p)) % stride == 0."""
    shifts = []
    for r in range(stride):
        kks = [kk for kk in range(ksize) if (kk - (r + padding)) % stride == 0]
        shifts.append(tuple((r + padding - kk) // stride for kk in kks))
    assert len({len(s) for s in shifts}) == 1, "ragged polyphase unsupported"
    return tuple(shifts)


def conv_transpose1d_prelu(x, w_phased, b, alpha, *, stride, ksize, padding,
                           output_padding, out_dtype=None):
    """PReLU -> ConvTranspose1d; no zero-stuffed / padded tensor ever hits HBM."""
    B, C_in, T = x.shape
    u = stride
    C_out = w_phased.shape[1]
    T_out = (T - 1) * u - 2 * padding + ksize + output_padding
    assert T_out % u == 0, "output length must be a multiple of the stride"
    M = T_out // u
    shifts = _phase_shifts(ksize, u, padding)
    min_s = min(min(s) for s in shifts)
    max_s = max(max(s) for s in shifts)
    lpad = max(0, -min_s)
    rpad = max(0, max_s + M - T)
    kernel = functools.partial(_convtranspose_kernel, shifts=shifts, M=M,
                               lpad=lpad, rpad=rpad)
    y = pl.pallas_call(
        kernel,
        out_shape=jax.ShapeDtypeStruct((B, u, C_out, M), out_dtype or ACT_DTYPE),
        grid=(B,),
        in_specs=[pl.BlockSpec((1, C_in, T), lambda bb: (bb, 0, 0)),
                  _full_spec(w_phased), _full_spec(b), _full_spec(alpha)],
        out_specs=pl.BlockSpec((1, u, C_out, M), lambda bb: (bb, 0, 0, 0)),
        compiler_params=pltpu.CompilerParams(
            dimension_semantics=("parallel",)),
    )(x, w_phased, b, alpha)
    # Interleave the phase-major result [B, u, C, M] -> [B, C, M*u].
    return jnp.transpose(y, (0, 2, 3, 1)).reshape(B, C_out, M * u)


# ----------------------------------------------------------------------------
# Kernel 3: fused (optional mrf_pre_conv +) full MRF stage
# ----------------------------------------------------------------------------
def _mrf_stage_kernel(*refs, has_pre, k_pre, kmax, block_dils):
    it = iter(refs)
    x_ref = next(it)
    if has_pre:
        wp_ref, bp_ref = next(it), next(it)
    w1_ref, b1_ref, a1_ref = next(it), next(it), next(it)
    w2_ref, b2_ref, a2_ref = next(it), next(it), next(it)
    o_ref = next(it)

    x = x_ref[0].astype(jnp.float32)                         # (C_in, T)
    if has_pre:
        x = _conv_same(x, wp_ref[...], bp_ref[...], k_pre, 1)
    ch, T = x.shape
    # TODO(synk): PReLUMRFBlock source not provided; HiFi-GAN ResBlock-style
    # (PReLU -> dilated conv -> PReLU -> conv, residual add) assumed.
    xs = jnp.zeros((ch, T), jnp.float32)
    li = 0
    for dils in block_dils:                                  # static unroll
        xb = x
        for d in dils:
            t = _prelu(xb, a1_ref[li])
            t = _conv_same(t, w1_ref[li], b1_ref[li], kmax, d)
            t = _prelu(t, a2_ref[li])
            t = _conv_same(t, w2_ref[li], b2_ref[li], kmax, 1)
            xb = xb + t
            li += 1
        xs = xs + xb
    o_ref[0] = (xs * (1.0 / len(block_dils))).astype(o_ref.dtype)


def mrf_stage(x, st, *, has_pre, block_dils, kmax, out_dtype=None):
    B, C_in, T = x.shape
    ch = st["mrf_w1"].shape[1]
    args = [x]
    in_specs = [pl.BlockSpec((1, C_in, T), lambda bb: (bb, 0, 0))]
    if has_pre:
        args += [st["pre_w"], st["pre_b"]]
        in_specs += [_full_spec(st["pre_w"]), _full_spec(st["pre_b"])]
    for name in ("mrf_w1", "mrf_b1", "mrf_a1", "mrf_w2", "mrf_b2", "mrf_a2"):
        args.append(st[name])
        in_specs.append(_full_spec(st[name]))
    kernel = functools.partial(_mrf_stage_kernel, has_pre=has_pre, k_pre=3,
                               kmax=kmax, block_dils=block_dils)
    return pl.pallas_call(
        kernel,
        out_shape=jax.ShapeDtypeStruct((B, ch, T), out_dtype or ACT_DTYPE),
        grid=(B,),
        in_specs=in_specs,
        out_specs=pl.BlockSpec((1, ch, T), lambda bb: (bb, 0, 0)),
        compiler_params=pltpu.CompilerParams(
            dimension_semantics=("parallel",)),
    )(*args)


# ----------------------------------------------------------------------------
# Host-side weight preparation (im2col / polyphase folding)
# ----------------------------------------------------------------------------
def fold_conv(w, kmax=None):
    """(K, C_out, C_in) conv weight -> folded (C_out, kmax*C_in) matmul weight.

    When kmax > K the real taps are centered and the rest are zero, so a K-tap
    conv with padding d*(K-1)//2 equals a kmax-tap conv with d*(kmax-1)//2."""
    K, C_out, C_in = w.shape
    kmax = kmax or K
    assert (kmax - K) % 2 == 0
    off = (kmax - K) // 2
    wf = jnp.zeros((kmax, C_out, C_in), w.dtype).at[off:off + K].set(w)
    return jnp.transpose(wf, (1, 0, 2)).reshape(C_out, kmax * C_in)


def fold_conv_transpose(w, stride, padding):
    """PyTorch ConvTranspose1d weight (C_in, C_out, K) -> per-output-phase
    folded weights (stride, C_out, ntap*C_in), matching _phase_shifts order."""
    phases = []
    K = w.shape[2]
    for r in range(stride):
        kks = [kk for kk in range(K) if (kk - (r + padding)) % stride == 0]
        wr = jnp.concatenate([jnp.transpose(w[:, :, kk]) for kk in kks], axis=1)
        phases.append(wr)
    return jnp.stack(phases, axis=0)


# ----------------------------------------------------------------------------
# XLA glue (tiny 1-3 channel tensors only)
# ----------------------------------------------------------------------------
def avg_pool1d(x, k):
    B, C, T = x.shape
    T2 = (T // k) * k
    return x[:, :, :T2].reshape(B, C, T // k, k).mean(axis=-1)


def adjust_cat(x, sine, vuv, noise):
    t_x, t_s = x.shape[-1], sine.shape[-1]
    dt = x.dtype
    if t_x < t_s:
        return jnp.concatenate([x, sine[..., :t_x].astype(dt),
                                vuv[..., :t_x].astype(dt),
                                noise[..., :t_x].astype(dt)], axis=1)
    return jnp.concatenate([x[..., :t_s], sine.astype(dt), vuv.astype(dt),
                            noise.astype(dt)], axis=1)


def signal_generator(cf0_up, vuv_up, sample_rate, key):
    # TODO(synk): SignalGenerator source not provided; NSF-style sine
    # excitation (cumulative phase) + gaussian noise assumed.
    phase = 2.0 * jnp.pi * jnp.cumsum(cf0_up / sample_rate, axis=-1)
    noise = 0.003 * jax.random.normal(key, vuv_up.shape, jnp.float32)
    sine = jnp.where(vuv_up > 0.0, 0.1 * jnp.sin(phase), 0.0) + noise
    return sine, vuv_up, noise


# ----------------------------------------------------------------------------
# Model config / params / forward
# ----------------------------------------------------------------------------
CFG = dict(
    in_channel=4,
    upsample_initial_channel=32,
    upsample_rates=(2, 2, 2, 2),
    upsample_kernel_sizes=(4, 4, 4, 4),
    resblock_kernel_sizes=(3, 5),
    resblock_dilations=((1,), (1,)),
    sample_rate=16000,
    hop_length=16,
)
assert CFG["hop_length"] == int(np.prod(CFG["upsample_rates"]))


def init_params(key, cfg):
    C0 = cfg["upsample_initial_channel"]
    rates, ksz = cfg["upsample_rates"], cfg["upsample_kernel_sizes"]
    rks, rds = cfg["resblock_kernel_sizes"], cfg["resblock_dilations"]
    kmax = max(rks)
    keys = iter(jax.random.split(key, 1024))

    def rnd(shape):
        return 0.1 * jax.random.normal(next(keys), shape, jnp.float32)

    def bias(c):
        return 0.02 * jax.random.normal(next(keys), (c, 1), jnp.float32)

    def prelu(c):
        return jnp.full((c, 1), 0.25, jnp.float32)            # nn.PReLU init

    p = {}
    p["conv_pre_w"] = fold_conv(rnd((7, C0, cfg["in_channel"])))
    p["conv_pre_b"] = bias(C0)
    p["stages"] = []
    for i, (u, k) in enumerate(zip(rates, ksz)):
        cin, cout = C0 // 2 ** i, C0 // 2 ** (i + 1)
        st = dict(
            up_w=fold_conv_transpose(rnd((cin, cout, k)), u, u // 2 + u % 2),
            up_b=bias(cout),
            up_alpha=prelu(cin),
        )
        if i in (1, 2):                                        # mrf_pre_convs
            st["pre_w"] = fold_conv(rnd((3, cout, cout + 3)))
            st["pre_b"] = bias(cout)
        w1, b1, a1, w2, b2, a2 = [], [], [], [], [], []
        for rk, dils in zip(rks, rds):
            for _ in dils:
                w1.append(fold_conv(rnd((rk, cout, cout)), kmax))
                b1.append(bias(cout)); a1.append(prelu(cout))
                w2.append(fold_conv(rnd((rk, cout, cout)), kmax))
                b2.append(bias(cout)); a2.append(prelu(cout))
        st.update(mrf_w1=jnp.stack(w1), mrf_b1=jnp.stack(b1),
                  mrf_a1=jnp.stack(a1), mrf_w2=jnp.stack(w2),
                  mrf_b2=jnp.stack(b2), mrf_a2=jnp.stack(a2))
        p["stages"].append(st)
    c_last = C0 // 2 ** len(rates)
    p["act_post"] = prelu(c_last)
    p["conv_post_w"] = fold_conv(rnd((7, 1, c_last)))
    p["conv_post_b"] = bias(1)
    return p


def forward(params, x, cf0, vuv, key, cfg):
    rates, ksz = cfg["upsample_rates"], cfg["upsample_kernel_sizes"]
    hop = cfg["hop_length"]
    kmax = max(cfg["resblock_kernel_sizes"])
    block_dils = cfg["resblock_dilations"]

    # nn.Upsample(scale_factor=hop) on [B,1,T] == nearest repeat along time.
    cf0_up = jnp.repeat(cf0[:, None, :], hop, axis=-1)
    vuv_up = jnp.repeat(vuv[:, None, :], hop, axis=-1)
    key, sub = jax.random.split(key)
    sine, vuv_s, _ = signal_generator(cf0_up, vuv_up, cfg["sample_rate"], sub)

    # Multi-resolution sources (most downsampled first, as in the module).
    sources = []
    s, v = sine, vuv_s
    for f in (None, rates[-1], rates[-2], None):  # Identity/AvgPool/AvgPool/Identity
        if f is not None:
            s, v = avg_pool1d(s, f), avg_pool1d(v, f)
        key, sub = jax.random.split(key)          # torch.randn_like
        noise = jax.random.normal(sub, v.shape, jnp.float32)
        sources.insert(0, (s, v, noise))

    x = conv1d_fused(x, params["conv_pre_w"], params["conv_pre_b"], K=7)
    for i, st in enumerate(params["stages"]):
        u, k = rates[i], ksz[i]
        # x = PReLU(x); x = ConvTranspose1d(x)   (fused, polyphase)
        x = conv_transpose1d_prelu(
            x, st["up_w"], st["up_b"], st["up_alpha"], stride=u, ksize=k,
            padding=u // 2 + u % 2, output_padding=u % 2)
        has_pre = "pre_w" in st
        if has_pre:
            s_i, v_i, n_i = sources[i]
            x = adjust_cat(x, s_i, v_i, n_i)
        # (optional pre conv) + full MRF stage in one fused kernel
        x = mrf_stage(x, st, has_pre=has_pre, block_dils=block_dils, kmax=kmax)
    # PReLU -> conv_post -> tanh, all fused in one kernel
    x = conv1d_fused(x, params["conv_post_w"], params["conv_post_b"], K=7,
                     alpha=params["act_post"], apply_prelu=True,
                     apply_tanh=True, out_dtype=jnp.float32)
    return x


if __name__ == "__main__":
    key = jax.random.PRNGKey(0)
    kp, kx, kf, kv, kn = jax.random.split(key, 5)
    B, T = 2, 8
    params = init_params(kp, CFG)
    x = jax.random.normal(kx, (B, CFG["in_channel"], T), jnp.float32)
    cf0 = 100.0 + 100.0 * jax.random.uniform(kf, (B, T), jnp.float32)
    vuv = (jax.random.uniform(kv, (B, T)) > 0.3).astype(jnp.float32)

    fwd = jax.jit(functools.partial(forward, cfg=CFG))
    out = jax.block_until_ready(fwd(params, x, cf0, vuv, kn))
    assert out.shape == (B, 1, T * CFG["hop_length"]), out.shape
    assert bool(jnp.all(jnp.isfinite(out)))
    assert bool(jnp.all(jnp.abs(out) <= 1.0))   # tanh output range
    print("KERNEL_OK")
</pallas_src>

<mosaic_0001>
module attributes {stable_mosaic.version = 11 : i64} {
  func.func @_mrf_stage_kernel(%arg0: i32, %arg1: memref<1x16x16xbf16, #tpu.memory_space<vmem>>, %arg2: memref<2x16x80xf32, #tpu.memory_space<vmem>>, %arg3: memref<2x16x1xf32, #tpu.memory_space<vmem>>, %arg4: memref<2x16x1xf32, #tpu.memory_space<vmem>>, %arg5: memref<2x16x80xf32, #tpu.memory_space<vmem>>, %arg6: memref<2x16x1xf32, #tpu.memory_space<vmem>>, %arg7: memref<2x16x1xf32, #tpu.memory_space<vmem>>, %arg8: memref<1x16x16xbf16, #tpu.memory_space<vmem>>) attributes {dimension_semantics = [#tpu.dimension_semantics<parallel>], iteration_bounds = array<i64: 2>, scalar_prefetch = 0 : i64, scratch_operands = 0 : i64, tpu.core_type = #tpu.core_type<tc>, window_params = [{transform_indices = @transform_0, window_bounds = array<i64: 1, 16, 16>}, {pipeline_mode = #tpu.pipeline_mode<synchronous>, transform_indices = @transform_1, window_bounds = array<i64: 2, 16, 80>}, {pipeline_mode = #tpu.pipeline_mode<synchronous>, transform_indices = @transform_2, window_bounds = array<i64: 2, 16, 1>}, {pipeline_mode = #tpu.pipeline_mode<synchronous>, transform_indices = @transform_3, window_bounds = array<i64: 2, 16, 1>}, {pipeline_mode = #tpu.pipeline_mode<synchronous>, transform_indices = @transform_4, window_bounds = array<i64: 2, 16, 80>}, {pipeline_mode = #tpu.pipeline_mode<synchronous>, transform_indices = @transform_5, window_bounds = array<i64: 2, 16, 1>}, {pipeline_mode = #tpu.pipeline_mode<synchronous>, transform_indices = @transform_6, window_bounds = array<i64: 2, 16, 1>}, {transform_indices = @transform_7, window_bounds = array<i64: 1, 16, 16>}]} {
    %c0 = arith.constant 0 : index
    %c0_0 = arith.constant 0 : index
    %c0_1 = arith.constant 0 : index
    %0 = vector.load %arg1[%c0, %c0_0, %c0_1] : memref<1x16x16xbf16, #tpu.memory_space<vmem>>, vector<1x16x16xbf16>
    %1 = vector.shape_cast %0 : vector<1x16x16xbf16> to vector<16x16xbf16>
    %2 = arith.extf %1 : vector<16x16xbf16> to vector<16x16xf32>
    %cst = arith.constant 0.000000e+00 : f32
    %3 = vector.broadcast %cst : f32 to vector<16x16xf32>
    %c0_2 = arith.constant 0 : index
    %c0_3 = arith.constant 0 : index
    %c0_4 = arith.constant 0 : index
    %4 = vector.load %arg4[%c0_2, %c0_3, %c0_4] : memref<2x16x1xf32, #tpu.memory_space<vmem>>, vector<1x16x1xf32>
    %5 = vector.shape_cast %4 : vector<1x16x1xf32> to vector<16x1xf32>
    %cst_5 = arith.constant 0.000000e+00 : f32
    %6 = vector.broadcast %cst_5 : f32 to vector<16x16xf32>
    %7 = arith.cmpf oge, %2, %6 : vector<16x16xf32>
    %8 = vector.broadcast %5 : vector<16x1xf32> to vector<16x16xf32>
    %9 = arith.mulf %8, %2 : vector<16x16xf32>
    %10 = arith.select %7, %2, %9 : vector<16x16xi1>, vector<16x16xf32>
    %c0_6 = arith.constant 0 : index
    %c0_7 = arith.constant 0 : index
    %c0_8 = arith.constant 0 : index
    %11 = vector.load %arg2[%c0_6, %c0_7, %c0_8] : memref<2x16x80xf32, #tpu.memory_space<vmem>>, vector<1x16x80xf32>
    %12 = vector.shape_cast %11 : vector<1x16x80xf32> to vector<16x80xf32>
    %c0_9 = arith.constant 0 : index
    %c0_10 = arith.constant 0 : index
    %c0_11 = arith.constant 0 : index
    %13 = vector.load %arg3[%c0_9, %c0_10, %c0_11] : memref<2x16x1xf32, #tpu.memory_space<vmem>>, vector<1x16x1xf32>
    %14 = vector.shape_cast %13 : vector<1x16x1xf32> to vector<16x1xf32>
    %cst_12 = arith.constant 0.000000e+00 : f32
    %15 = vector.broadcast %cst_12 : f32 to vector<16x2xf32>
    %16 = tpu.concatenate %15, %10, %15 in 1 : vector<16x2xf32>, vector<16x16xf32>, vector<16x2xf32> -> vector<16x20xf32>
    %17 = vector.extract_strided_slice %16 {offsets = [0, 0], sizes = [16, 16], strides = [1, 1]} : vector<16x20xf32> to vector<16x16xf32>
    %18 = vector.extract_strided_slice %16 {offsets = [0, 1], sizes = [16, 16], strides = [1, 1]} : vector<16x20xf32> to vector<16x16xf32>
    %19 = vector.extract_strided_slice %16 {offsets = [0, 2], sizes = [16, 16], strides = [1, 1]} : vector<16x20xf32> to vector<16x16xf32>
    %20 = vector.extract_strided_slice %16 {offsets = [0, 3], sizes = [16, 16], strides = [1, 1]} : vector<16x20xf32> to vector<16x16xf32>
    %21 = vector.extract_strided_slice %16 {offsets = [0, 4], sizes = [16, 16], strides = [1, 1]} : vector<16x20xf32> to vector<16x16xf32>
    %22 = tpu.concatenate %17, %18, %19, %20, %21 in 0 : vector<16x16xf32>, vector<16x16xf32>, vector<16x16xf32>, vector<16x16xf32>, vector<16x16xf32> -> vector<80x16xf32>
    %cst_13 = arith.constant dense<0.000000e+00> : vector<16x16xf32>
    %23 = tpu.matmul %12, %22, %cst_13 {dimension_numbers = #tpu.dot_dimension_numbers<[1], [0], [0], [1], [0, 0, 1, 1], [], []>} : vector<16x80xf32>, vector<80x16xf32>, vector<16x16xf32> -> vector<16x16xf32>
    %24 = vector.broadcast %14 : vector<16x1xf32> to vector<16x16xf32>
    %25 = arith.addf %23, %24 : vector<16x16xf32>
    %c0_14 = arith.constant 0 : index
    %c0_15 = arith.constant 0 : index
    %c0_16 = arith.constant 0 : index
    %26 = vector.load %arg7[%c0_14, %c0_15, %c0_16] : memref<2x16x1xf32, #tpu.memory_space<vmem>>, vector<1x16x1xf32>
    %27 = vector.shape_cast %26 : vector<1x16x1xf32> to vector<16x1xf32>
    %cst_17 = arith.constant 0.000000e+00 : f32
    %28 = vector.broadcast %cst_17 : f32 to vector<16x16xf32>
    %29 = arith.cmpf oge, %25, %28 : vector<16x16xf32>
    %30 = vector.broadcast %27 : vector<16x1xf32> to vector<16x16xf32>
    %31 = arith.mulf %30, %25 : vector<16x16xf32>
    %32 = arith.select %29, %25, %31 : vector<16x16xi1>, vector<16x16xf32>
    %c0_18 = arith.constant 0 : index
    %c0_19 = arith.constant 0 : index
    %c0_20 = arith.constant 0 : index
    %33 = vector.load %arg5[%c0_18, %c0_19, %c0_20] : memref<2x16x80xf32, #tpu.memory_space<vmem>>, vector<1x16x80xf32>
    %34 = vector.shape_cast %33 : vector<1x16x80xf32> to vector<16x80xf32>
    %c0_21 = arith.constant 0 : index
    %c0_22 = arith.constant 0 : index
    %c0_23 = arith.constant 0 : index
    %35 = vector.load %arg6[%c0_21, %c0_22, %c0_23] : memref<2x16x1xf32, #tpu.memory_space<vmem>>, vector<1x16x1xf32>
    %36 = vector.shape_cast %35 : vector<1x16x1xf32> to vector<16x1xf32>
    %cst_24 = arith.constant 0.000000e+00 : f32
    %37 = vector.broadcast %cst_24 : f32 to vector<16x2xf32>
    %38 = tpu.concatenate %37, %32, %37 in 1 : vector<16x2xf32>, vector<16x16xf32>, vector<16x2xf32> -> vector<16x20xf32>
    %39 = vector.extract_strided_slice %38 {offsets = [0, 0], sizes = [16, 16], strides = [1, 1]} : vector<16x20xf32> to vector<16x16xf32>
    %40 = vector.extract_strided_slice %38 {offsets = [0, 1], sizes = [16, 16], strides = [1, 1]} : vector<16x20xf32> to vector<16x16xf32>
    %41 = vector.extract_strided_slice %38 {offsets = [0, 2], sizes = [16, 16], strides = [1, 1]} : vector<16x20xf32> to vector<16x16xf32>
    %42 = vector.extract_strided_slice %38 {offsets = [0, 3], sizes = [16, 16], strides = [1, 1]} : vector<16x20xf32> to vector<16x16xf32>
    %43 = vector.extract_strided_slice %38 {offsets = [0, 4], sizes = [16, 16], strides = [1, 1]} : vector<16x20xf32> to vector<16x16xf32>
    %44 = tpu.concatenate %39, %40, %41, %42, %43 in 0 : vector<16x16xf32>, vector<16x16xf32>, vector<16x16xf32>, vector<16x16xf32>, vector<16x16xf32> -> vector<80x16xf32>
    %cst_25 = arith.constant dense<0.000000e+00> : vector<16x16xf32>
    %45 = tpu.matmul %34, %44, %cst_25 {dimension_numbers = #tpu.dot_dimension_numbers<[1], [0], [0], [1], [0, 0, 1, 1], [], []>} : vector<16x80xf32>, vector<80x16xf32>, vector<16x16xf32> -> vector<16x16xf32>
    %46 = vector.broadcast %36 : vector<16x1xf32> to vector<16x16xf32>
    %47 = arith.addf %45, %46 : vector<16x16xf32>
    %48 = arith.addf %2, %47 : vector<16x16xf32>
    %49 = arith.addf %3, %48 : vector<16x16xf32>
    %c1 = arith.constant 1 : index
    %c0_26 = arith.constant 0 : index
    %c0_27 = arith.constant 0 : index
    %50 = vector.load %arg4[%c1, %c0_26, %c0_27] : memref<2x16x1xf32, #tpu.memory_space<vmem>>, vector<1x16x1xf32>
    %51 = vector.shape_cast %50 : vector<1x16x1xf32> to vector<16x1xf32>
    %cst_28 = arith.constant 0.000000e+00 : f32
    %52 = vector.broadcast %cst_28 : f32 to vector<16x16xf32>
    %53 = arith.cmpf oge, %2, %52 : vector<16x16xf32>
    %54 = vector.broadcast %51 : vector<16x1xf32> to vector<16x16xf32>
    %55 = arith.mulf %54, %2 : vector<16x16xf32>
    %56 = arith.select %53, %2, %55 : vector<16x16xi1>, vector<16x16xf32>
    %c1_29 = arith.constant 1 : index
    %c0_30 = arith.constant 0 : index
    %c0_31 = arith.constant 0 : index
    %57 = vector.load %arg2[%c1_29, %c0_30, %c0_31] : memref<2x16x80xf32, #tpu.memory_space<vmem>>, vector<1x16x80xf32>
    %58 = vector.shape_cast %57 : vector<1x16x80xf32> to vector<16x80xf32>
    %c1_32 = arith.constant 1 : index
    %c0_33 = arith.constant 0 : index
    %c0_34 = arith.constant 0 : index
    %59 = vector.load %arg3[%c1_32, %c0_33, %c0_34] : memref<2x16x1xf32, #tpu.memory_space<vmem>>, vector<1x16x1xf32>
    %60 = vector.shape_cast %59 : vector<1x16x1xf32> to vector<16x1xf32>
    %cst_35 = arith.constant 0.000000e+00 : f32
    %61 = vector.broadcast %cst_35 : f32 to vector<16x2xf32>
    %62 = tpu.concatenate %61, %56, %61 in 1 : vector<16x2xf32>, vector<16x16xf32>, vector<16x2xf32> -> vector<16x20xf32>
    %63 = vector.extract_strided_slice %62 {offsets = [0, 0], sizes = [16, 16], strides = [1, 1]} : vector<16x20xf32> to vector<16x16xf32>
    %64 = vector.extract_strided_slice %62 {offsets = [0, 1], sizes = [16, 16], strides = [1, 1]} : vector<16x20xf32> to vector<16x16xf32>
    %65 = vector.extract_strided_slice %62 {offsets = [0, 2], sizes = [16, 16], strides = [1, 1]} : vector<16x20xf32> to vector<16x16xf32>
    %66 = vector.extract_strided_slice %62 {offsets = [0, 3], sizes = [16, 16], strides = [1, 1]} : vector<16x20xf32> to vector<16x16xf32>
    %67 = vector.extract_strided_slice %62 {offsets = [0, 4], sizes = [16, 16], strides = [1, 1]} : vector<16x20xf32> to vector<16x16xf32>
    %68 = tpu.concatenate %63, %64, %65, %66, %67 in 0 : vector<16x16xf32>, vector<16x16xf32>, vector<16x16xf32>, vector<16x16xf32>, vector<16x16xf32> -> vector<80x16xf32>
    %cst_36 = arith.constant dense<0.000000e+00> : vector<16x16xf32>
    %69 = tpu.matmul %58, %68, %cst_36 {dimension_numbers = #tpu.dot_dimension_numbers<[1], [0], [0], [1], [0, 0, 1, 1], [], []>} : vector<16x80xf32>, vector<80x16xf32>, vector<16x16xf32> -> vector<16x16xf32>
    %70 = vector.broadcast %60 : vector<16x1xf32> to vector<16x16xf32>
    %71 = arith.addf %69, %70 : vector<16x16xf32>
    %c1_37 = arith.constant 1 : index
    %c0_38 = arith.constant 0 : index
    %c0_39 = arith.constant 0 : index
    %72 = vector.load %arg7[%c1_37, %c0_38, %c0_39] : memref<2x16x1xf32, #tpu.memory_space<vmem>>, vector<1x16x1xf32>
    %73 = vector.shape_cast %72 : vector<1x16x1xf32> to vector<16x1xf32>
    %cst_40 = arith.constant 0.000000e+00 : f32
    %74 = vector.broadcast %cst_40 : f32 to vector<16x16xf32>
    %75 = arith.cmpf oge, %71, %74 : vector<16x16xf32>
    %76 = vector.broadcast %73 : vector<16x1xf32> to vector<16x16xf32>
    %77 = arith.mulf %76, %71 : vector<16x16xf32>
    %78 = arith.select %75, %71, %77 : vector<16x16xi1>, vector<16x16xf32>
    %c1_41 = arith.constant 1 : index
    %c0_42 = arith.constant 0 : index
    %c0_43 = arith.constant 0 : index
    %79 = vector.load %arg5[%c1_41, %c0_42, %c0_43] : memref<2x16x80xf32, #tpu.memory_space<vmem>>, vector<1x16x80xf32>
    %80 = vector.shape_cast %79 : vector<1x16x80xf32> to vector<16x80xf32>
    %c1_44 = arith.constant 1 : index
    %c0_45 = arith.constant 0 : index
    %c0_46 = arith.constant 0 : index
    %81 = vector.load %arg6[%c1_44, %c0_45, %c0_46] : memref<2x16x1xf32, #tpu.memory_space<vmem>>, vector<1x16x1xf32>
    %82 = vector.shape_cast %81 : vector<1x16x1xf32> to vector<16x1xf32>
    %cst_47 = arith.constant 0.000000e+00 : f32
    %83 = vector.broadcast %cst_47 : f32 to vector<16x2xf32>
    %84 = tpu.concatenate %83, %78, %83 in 1 : vector<16x2xf32>, vector<16x16xf32>, vector<16x2xf32> -> vector<16x20xf32>
    %85 = vector.extract_strided_slice %84 {offsets = [0, 0], sizes = [16, 16], strides = [1, 1]} : vector<16x20xf32> to vector<16x16xf32>
    %86 = vector.extract_strided_slice %84 {offsets = [0, 1], sizes = [16, 16], strides = [1, 1]} : vector<16x20xf32> to vector<16x16xf32>
    %87 = vector.extract_strided_slice %84 {offsets = [0, 2], sizes = [16, 16], strides = [1, 1]} : vector<16x20xf32> to vector<16x16xf32>
    %88 = vector.extract_strided_slice %84 {offsets = [0, 3], sizes = [16, 16], strides = [1, 1]} : vector<16x20xf32> to vector<16x16xf32>
    %89 = vector.extract_strided_slice %84 {offsets = [0, 4], sizes = [16, 16], strides = [1, 1]} : vector<16x20xf32> to vector<16x16xf32>
    %90 = tpu.concatenate %85, %86, %87, %88, %89 in 0 : vector<16x16xf32>, vector<16x16xf32>, vector<16x16xf32>, vector<16x16xf32>, vector<16x16xf32> -> vector<80x16xf32>
    %cst_48 = arith.constant dense<0.000000e+00> : vector<16x16xf32>
    %91 = tpu.matmul %80, %90, %cst_48 {dimension_numbers = #tpu.dot_dimension_numbers<[1], [0], [0], [1], [0, 0, 1, 1], [], []>} : vector<16x80xf32>, vector<80x16xf32>, vector<16x16xf32> -> vector<16x16xf32>
    %92 = vector.broadcast %82 : vector<16x1xf32> to vector<16x16xf32>
    %93 = arith.addf %91, %92 : vector<16x16xf32>
    %94 = arith.addf %2, %93 : vector<16x16xf32>
    %95 = arith.addf %49, %94 : vector<16x16xf32>
    %cst_49 = arith.constant 5.000000e-01 : f32
    %96 = vector.broadcast %cst_49 : f32 to vector<16x16xf32>
    %97 = arith.mulf %95, %96 : vector<16x16xf32>
    %98 = arith.truncf %97 : vector<16x16xf32> to vector<16x16xbf16>
    %c0_50 = arith.constant 0 : index
    %c0_51 = arith.constant 0 : index
    %c0_52 = arith.constant 0 : index
    %99 = vector.load %arg8[%c0_50, %c0_51, %c0_52] : memref<1x16x16xbf16, #tpu.memory_space<vmem>>, vector<1x16x16xbf16>
    %100 = vector.shape_cast %99 : vector<1x16x16xbf16> to vector<16x16xbf16>
    %101 = vector.shape_cast %98 : vector<16x16xbf16> to vector<1x16x16xbf16>
    tpu.vector_store %arg8[%c0_50, %c0_51, %c0_52], %101 {strides = array<i32>} : memref<1x16x16xbf16, #tpu.memory_space<vmem>>, vector<1x16x16xbf16>,
    return
  }
  func.func @transform_0(%arg0: i32) -> (i32, i32, i32) {
    %c0_i32 = arith.constant 0 : i32
    %c0_i32_0 = arith.constant 0 : i32
    %c0_i32_1 = arith.constant 0 : i32
    return %arg0, %c0_i32, %c0_i32_0 : i32, i32, i32
  }
  func.func @transform_1(%arg0: i32) -> (i32, i32, i32) {
    %c0_i32 = arith.constant 0 : i32
    %c0_i32_0 = arith.constant 0 : i32
    %c0_i32_1 = arith.constant 0 : i32
    %c0_i32_2 = arith.constant 0 : i32
    return %c0_i32, %c0_i32_0, %c0_i32_1 : i32, i32, i32
  }
  func.func @transform_2(%arg0: i32) -> (i32, i32, i32) {
    %c0_i32 = arith.constant 0 : i32
    %c0_i32_0 = arith.constant 0 : i32
    %c0_i32_1 = arith.constant 0 : i32
    %c0_i32_2 = arith.constant 0 : i32
    return %c0_i32, %c0_i32_0, %c0_i32_1 : i32, i32, i32
  }
  func.func @transform_3(%arg0: i32) -> (i32, i32, i32) {
    %c0_i32 = arith.constant 0 : i32
    %c0_i32_0 = arith.constant 0 : i32
    %c0_i32_1 = arith.constant 0 : i32
    %c0_i32_2 = arith.constant 0 : i32
    return %c0_i32, %c0_i32_0, %c0_i32_1 : i32, i32, i32
  }
  func.func @transform_4(%arg0: i32) -> (i32, i32, i32) {
    %c0_i32 = arith.constant 0 : i32
    %c0_i32_0 = arith.constant 0 : i32
    %c0_i32_1 = arith.constant 0 : i32
    %c0_i32_2 = arith.constant 0 : i32
    return %c0_i32, %c0_i32_0, %c0_i32_1 : i32, i32, i32
  }
  func.func @transform_5(%arg0: i32) -> (i32, i32, i32) {
    %c0_i32 = arith.constant 0 : i32
    %c0_i32_0 = arith.constant 0 : i32
    %c0_i32_1 = arith.constant 0 : i32
    %c0_i32_2 = arith.constant 0 : i32
    return %c0_i32, %c0_i32_0, %c0_i32_1 : i32, i32, i32
  }
  func.func @transform_6(%arg0: i32) -> (i32, i32, i32) {
    %c0_i32 = arith.constant 0 : i32
    %c0_i32_0 = arith.constant 0 : i32
    %c0_i32_1 = arith.constant 0 : i32
    %c0_i32_2 = arith.constant 0 : i32
    return %c0_i32, %c0_i32_0, %c0_i32_1 : i32, i32, i32
  }
  func.func @transform_7(%arg0: i32) -> (i32, i32, i32) {
    %c0_i32 = arith.constant 0 : i32
    %c0_i32_0 = arith.constant 0 : i32
    %c0_i32_1 = arith.constant 0 : i32
    return %arg0, %c0_i32, %c0_i32_0 : i32, i32, i32
  }
}

module attributes {stable_mosaic.version = 11 : i64} {
  func.func @_conv_kernel(%arg0: i32, %arg1: memref<1x4x8xf32, #tpu.memory_space<vmem>>, %arg2: memref<32x28xf32, #tpu.memory_space<vmem>>, %arg3: memref<32x1xf32, #tpu.memory_space<vmem>>, %arg4: memref<1x32x8xbf16, #tpu.memory_space<vmem>>) attributes {dimension_semantics = [#tpu.dimension_semantics<parallel>], iteration_bounds = array<i64: 2>, scalar_prefetch = 0 : i64, scratch_operands = 0 : i64, tpu.core_type = #tpu.core_type<tc>, window_params = [{transform_indices = @transform_0, window_bounds = array<i64: 1, 4, 8>}, {pipeline_mode = #tpu.pipeline_mode<synchronous>, transform_indices = @transform_1, window_bounds = array<i64: 32, 28>}, {pipeline_mode = #tpu.pipeline_mode<synchronous>, transform_indices = @transform_2, window_bounds = array<i64: 32, 1>}, {transform_indices = @transform_3, window_bounds = array<i64: 1, 32, 8>}]} {
    %c0 = arith.constant 0 : index
    %c0_0 = arith.constant 0 : index
    %c0_1 = arith.constant 0 : index
    %0 = vector.load %arg1[%c0, %c0_0, %c0_1] : memref<1x4x8xf32, #tpu.memory_space<vmem>>, vector<1x4x8xf32>
    %1 = vector.shape_cast %0 : vector<1x4x8xf32> to vector<4x8xf32>
    %c0_2 = arith.constant 0 : index
    %c0_3 = arith.constant 0 : index
    %2 = vector.load %arg2[%c0_2, %c0_3] : memref<32x28xf32, #tpu.memory_space<vmem>>, vector<32x28xf32>
    %c0_4 = arith.constant 0 : index
    %c0_5 = arith.constant 0 : index
    %3 = vector.load %arg3[%c0_4, %c0_5] : memref<32x1xf32, #tpu.memory_space<vmem>>, vector<32x1xf32>
    %cst = arith.constant 0.000000e+00 : f32
    %4 = vector.broadcast %cst : f32 to vector<4x3xf32>
    %5 = tpu.concatenate %4, %1, %4 in 1 : vector<4x3xf32>, vector<4x8xf32>, vector<4x3xf32> -> vector<4x14xf32>
    %6 = vector.extract_strided_slice %5 {offsets = [0, 0], sizes = [4, 8], strides = [1, 1]} : vector<4x14xf32> to vector<4x8xf32>
    %7 = vector.extract_strided_slice %5 {offsets = [0, 1], sizes = [4, 8], strides = [1, 1]} : vector<4x14xf32> to vector<4x8xf32>
    %8 = vector.extract_strided_slice %5 {offsets = [0, 2], sizes = [4, 8], strides = [1, 1]} : vector<4x14xf32> to vector<4x8xf32>
    %9 = vector.extract_strided_slice %5 {offsets = [0, 3], sizes = [4, 8], strides = [1, 1]} : vector<4x14xf32> to vector<4x8xf32>
    %10 = vector.extract_strided_slice %5 {offsets = [0, 4], sizes = [4, 8], strides = [1, 1]} : vector<4x14xf32> to vector<4x8xf32>
    %11 = vector.extract_strided_slice %5 {offsets = [0, 5], sizes = [4, 8], strides = [1, 1]} : vector<4x14xf32> to vector<4x8xf32>
    %12 = vector.extract_strided_slice %5 {offsets = [0, 6], sizes = [4, 8], strides = [1, 1]} : vector<4x14xf32> to vector<4x8xf32>
    %13 = vector.extract_strided_slice %2 {offsets = [0, 0], sizes = [32, 4], strides = [1, 1]} : vector<32x28xf32> to vector<32x4xf32>
    %cst_6 = arith.constant dense<0.000000e+00> : vector<32x8xf32>
    %14 = tpu.matmul %13, %6, %cst_6 {dimension_numbers = #tpu.dot_dimension_numbers<[1], [0], [0], [1], [0, 0, 1, 1], [], []>} : vector<32x4xf32>, vector<4x8xf32>, vector<32x8xf32> -> vector<32x8xf32>
    %15 = vector.extract_strided_slice %2 {offsets = [0, 4], sizes = [32, 4], strides = [1, 1]} : vector<32x28xf32> to vector<32x4xf32>
    %cst_7 = arith.constant dense<0.000000e+00> : vector<32x8xf32>
    %16 = tpu.matmul %15, %7, %cst_7 {dimension_numbers = #tpu.dot_dimension_numbers<[1], [0], [0], [1], [0, 0, 1, 1], [], []>} : vector<32x4xf32>, vector<4x8xf32>, vector<32x8xf32> -> vector<32x8xf32>
    %17 = arith.addf %14, %16 : vector<32x8xf32>
    %18 = vector.extract_strided_slice %2 {offsets = [0, 8], sizes = [32, 4], strides = [1, 1]} : vector<32x28xf32> to vector<32x4xf32>
    %cst_8 = arith.constant dense<0.000000e+00> : vector<32x8xf32>
    %19 = tpu.matmul %18, %8, %cst_8 {dimension_numbers = #tpu.dot_dimension_numbers<[1], [0], [0], [1], [0, 0, 1, 1], [], []>} : vector<32x4xf32>, vector<4x8xf32>, vector<32x8xf32> -> vector<32x8xf32>
    %20 = arith.addf %17, %19 : vector<32x8xf32>
    %21 = vector.extract_strided_slice %2 {offsets = [0, 12], sizes = [32, 4], strides = [1, 1]} : vector<32x28xf32> to vector<32x4xf32>
    %cst_9 = arith.constant dense<0.000000e+00> : vector<32x8xf32>
    %22 = tpu.matmul %21, %9, %cst_9 {dimension_numbers = #tpu.dot_dimension_numbers<[1], [0], [0], [1], [0, 0, 1, 1], [], []>} : vector<32x4xf32>, vector<4x8xf32>, vector<32x8xf32> -> vector<32x8xf32>
    %23 = arith.addf %20, %22 : vector<32x8xf32>
    %24 = vector.extract_strided_slice %2 {offsets = [0, 16], sizes = [32, 4], strides = [1, 1]} : vector<32x28xf32> to vector<32x4xf32>
    %cst_10 = arith.constant dense<0.000000e+00> : vector<32x8xf32>
    %25 = tpu.matmul %24, %10, %cst_10 {dimension_numbers = #tpu.dot_dimension_numbers<[1], [0], [0], [1], [0, 0, 1, 1], [], []>} : vector<32x4xf32>, vector<4x8xf32>, vector<32x8xf32> -> vector<32x8xf32>
    %26 = arith.addf %23, %25 : vector<32x8xf32>
    %27 = vector.extract_strided_slice %2 {offsets = [0, 20], sizes = [32, 4], strides = [1, 1]} : vector<32x28xf32> to vector<32x4xf32>
    %cst_11 = arith.constant dense<0.000000e+00> : vector<32x8xf32>
    %28 = tpu.matmul %27, %11, %cst_11 {dimension_numbers = #tpu.dot_dimension_numbers<[1], [0], [0], [1], [0, 0, 1, 1], [], []>} : vector<32x4xf32>, vector<4x8xf32>, vector<32x8xf32> -> vector<32x8xf32>
    %29 = arith.addf %26, %28 : vector<32x8xf32>
    %30 = vector.extract_strided_slice %2 {offsets = [0, 24], sizes = [32, 4], strides = [1, 1]} : vector<32x28xf32> to vector<32x4xf32>
    %cst_12 = arith.constant dense<0.000000e+00> : vector<32x8xf32>
    %31 = tpu.matmul %30, %12, %cst_12 {dimension_numbers = #tpu.dot_dimension_numbers<[1], [0], [0], [1], [0, 0, 1, 1], [], []>} : vector<32x4xf32>, vector<4x8xf32>, vector<32x8xf32> -> vector<32x8xf32>
    %32 = arith.addf %29, %31 : vector<32x8xf32>
    %33 = vector.broadcast %3 : vector<32x1xf32> to vector<32x8xf32>
    %34 = arith.addf %32, %33 : vector<32x8xf32>
    %35 = arith.truncf %34 : vector<32x8xf32> to vector<32x8xbf16>
    %c0_13 = arith.constant 0 : index
    %c0_14 = arith.constant 0 : index
    %c0_15 = arith.constant 0 : index
    %36 = vector.load %arg4[%c0_13, %c0_14, %c0_15] : memref<1x32x8xbf16, #tpu.memory_space<vmem>>, vector<1x32x8xbf16>
    %37 = vector.shape_cast %36 : vector<1x32x8xbf16> to vector<32x8xbf16>
    %38 = vector.shape_cast %35 : vector<32x8xbf16> to vector<1x32x8xbf16>
    tpu.vector_store %arg4[%c0_13, %c0_14, %c0_15], %38 {strides = array<i32>} : memref<1x32x8xbf16, #tpu.memory_space<vmem>>, vector<1x32x8xbf16>,
    return
  }
  func.func @transform_0(%arg0: i32) -> (i32, i32, i32) {
    %c0_i32 = arith.constant 0 : i32
    %c0_i32_0 = arith.constant 0 : i32
    %c0_i32_1 = arith.constant 0 : i32
    return %arg0, %c0_i32, %c0_i32_0 : i32, i32, i32
  }
  func.func @transform_1(%arg0: i32) -> (i32, i32) {
    %c0_i32 = arith.constant 0 : i32
    %c0_i32_0 = arith.constant 0 : i32
    %c0_i32_1 = arith.constant 0 : i32
    return %c0_i32, %c0_i32_0 : i32, i32
  }
  func.func @transform_2(%arg0: i32) -> (i32, i32) {
    %c0_i32 = arith.constant 0 : i32
    %c0_i32_0 = arith.constant 0 : i32
    %c0_i32_1 = arith.constant 0 : i32
    return %c0_i32, %c0_i32_0 : i32, i32
  }
  func.func @transform_3(%arg0: i32) -> (i32, i32, i32) {
    %c0_i32 = arith.constant 0 : i32
    %c0_i32_0 = arith.constant 0 : i32
    %c0_i32_1 = arith.constant 0 : i32
    return %arg0, %c0_i32, %c0_i32_0 : i32, i32, i32
  }
}

module attributes {stable_mosaic.version = 11 : i64} {
  func.func @_convtranspose_kernel(%arg0: i32, %arg1: memref<1x32x8xbf16, #tpu.memory_space<vmem>>, %arg2: memref<2x16x64xf32, #tpu.memory_space<vmem>>, %arg3: memref<16x1xf32, #tpu.memory_space<vmem>>, %arg4: memref<32x1xf32, #tpu.memory_space<vmem>>, %arg5: memref<1x2x16x8xbf16, #tpu.memory_space<vmem>>) attributes {dimension_semantics = [#tpu.dimension_semantics<parallel>], iteration_bounds = array<i64: 2>, scalar_prefetch = 0 : i64, scratch_operands = 0 : i64, tpu.core_type = #tpu.core_type<tc>, window_params = [{transform_indices = @transform_0, window_bounds = array<i64: 1, 32, 8>}, {pipeline_mode = #tpu.pipeline_mode<synchronous>, transform_indices = @transform_1, window_bounds = array<i64: 2, 16, 64>}, {pipeline_mode = #tpu.pipeline_mode<synchronous>, transform_indices = @transform_2, window_bounds = array<i64: 16, 1>}, {pipeline_mode = #tpu.pipeline_mode<synchronous>, transform_indices = @transform_3, window_bounds = array<i64: 32, 1>}, {transform_indices = @transform_4, window_bounds = array<i64: 1, 2, 16, 8>}]} {
    %c0 = arith.constant 0 : index
    %c0_0 = arith.constant 0 : index
    %c0_1 = arith.constant 0 : index
    %0 = vector.load %arg1[%c0, %c0_0, %c0_1] : memref<1x32x8xbf16, #tpu.memory_space<vmem>>, vector<1x32x8xbf16>
    %1 = vector.shape_cast %0 : vector<1x32x8xbf16> to vector<32x8xbf16>
    %2 = arith.extf %1 : vector<32x8xbf16> to vector<32x8xf32>
    %c0_2 = arith.constant 0 : index
    %c0_3 = arith.constant 0 : index
    %3 = vector.load %arg4[%c0_2, %c0_3] : memref<32x1xf32, #tpu.memory_space<vmem>>, vector<32x1xf32>
    %cst = arith.constant 0.000000e+00 : f32
    %4 = vector.broadcast %cst : f32 to vector<32x8xf32>
    %5 = arith.cmpf oge, %2, %4 : vector<32x8xf32>
    %6 = vector.broadcast %3 : vector<32x1xf32> to vector<32x8xf32>
    %7 = arith.mulf %6, %2 : vector<32x8xf32>
    %8 = arith.select %5, %2, %7 : vector<32x8xi1>, vector<32x8xf32>
    %cst_4 = arith.constant 0.000000e+00 : f32
    %9 = vector.broadcast %cst_4 : f32 to vector<32x1xf32>
    %cst_5 = arith.constant 0.000000e+00 : f32
    %10 = vector.broadcast %cst_5 : f32 to vector<32x1xf32>
    %11 = tpu.concatenate %9, %8, %10 in 1 : vector<32x1xf32>, vector<32x8xf32>, vector<32x1xf32> -> vector<32x10xf32>
    %c0_6 = arith.constant 0 : index
    %c0_7 = arith.constant 0 : index
    %12 = vector.load %arg3[%c0_6, %c0_7] : memref<16x1xf32, #tpu.memory_space<vmem>>, vector<16x1xf32>
    %13 = vector.extract_strided_slice %11 {offsets = [0, 1], sizes = [32, 8], strides = [1, 1]} : vector<32x10xf32> to vector<32x8xf32>
    %14 = vector.extract_strided_slice %11 {offsets = [0, 0], sizes = [32, 8], strides = [1, 1]} : vector<32x10xf32> to vector<32x8xf32>
    %c0_8 = arith.constant 0 : index
    %c0_9 = arith.constant 0 : index
    %c0_10 = arith.constant 0 : index
    %15 = vector.load %arg2[%c0_8, %c0_9, %c0_10] : memref<2x16x64xf32, #tpu.memory_space<vmem>>, vector<1x16x64xf32>
    %16 = vector.shape_cast %15 : vector<1x16x64xf32> to vector<16x64xf32>
    %17 = tpu.concatenate %13, %14 in 0 : vector<32x8xf32>, vector<32x8xf32> -> vector<64x8xf32>
    %cst_11 = arith.constant dense<0.000000e+00> : vector<16x8xf32>
    %18 = tpu.matmul %16, %17, %cst_11 {dimension_numbers = #tpu.dot_dimension_numbers<[1], [0], [0], [1], [0, 0, 1, 1], [], []>} : vector<16x64xf32>, vector<64x8xf32>, vector<16x8xf32> -> vector<16x8xf32>
    %19 = vector.broadcast %12 : vector<16x1xf32> to vector<16x8xf32>
    %20 = arith.addf %18, %19 : vector<16x8xf32>
    %21 = arith.truncf %20 : vector<16x8xf32> to vector<16x8xbf16>
    %c0_12 = arith.constant 0 : index
    %c0_13 = arith.constant 0 : index
    %c0_14 = arith.constant 0 : index
    %c0_15 = arith.constant 0 : index
    %22 = vector.load %arg5[%c0_12, %c0_13, %c0_14, %c0_15] : memref<1x2x16x8xbf16, #tpu.memory_space<vmem>>, vector<1x1x16x8xbf16>
    %23 = vector.shape_cast %22 : vector<1x1x16x8xbf16> to vector<16x8xbf16>
    %24 = vector.shape_cast %21 : vector<16x8xbf16> to vector<1x1x16x8xbf16>
    tpu.vector_store %arg5[%c0_12, %c0_13, %c0_14, %c0_15], %24 {strides = array<i32>} : memref<1x2x16x8xbf16, #tpu.memory_space<vmem>>, vector<1x1x16x8xbf16>,
    %25 = vector.extract_strided_slice %11 {offsets = [0, 2], sizes = [32, 8], strides = [1, 1]} : vector<32x10xf32> to vector<32x8xf32>
    %26 = vector.extract_strided_slice %11 {offsets = [0, 1], sizes = [32, 8], strides = [1, 1]} : vector<32x10xf32> to vector<32x8xf32>
    %c1 = arith.constant 1 : index
    %c0_16 = arith.constant 0 : index
    %c0_17 = arith.constant 0 : index
    %27 = vector.load %arg2[%c1, %c0_16, %c0_17] : memref<2x16x64xf32, #tpu.memory_space<vmem>>, vector<1x16x64xf32>
    %28 = vector.shape_cast %27 : vector<1x16x64xf32> to vector<16x64xf32>
    %29 = tpu.concatenate %25, %26 in 0 : vector<32x8xf32>, vector<32x8xf32> -> vector<64x8xf32>
    %cst_18 = arith.constant dense<0.000000e+00> : vector<16x8xf32>
    %30 = tpu.matmul %28, %29, %cst_18 {dimension_numbers = #tpu.dot_dimension_numbers<[1], [0], [0], [1], [0, 0, 1, 1], [], []>} : vector<16x64xf32>, vector<64x8xf32>, vector<16x8xf32> -> vector<16x8xf32>
    %31 = vector.broadcast %12 : vector<16x1xf32> to vector<16x8xf32>
    %32 = arith.addf %30, %31 : vector<16x8xf32>
    %33 = arith.truncf %32 : vector<16x8xf32> to vector<16x8xbf16>
    %c0_19 = arith.constant 0 : index
    %c1_20 = arith.constant 1 : index
    %c0_21 = arith.constant 0 : index
    %c0_22 = arith.constant 0 : index
    %34 = vector.load %arg5[%c0_19, %c1_20, %c0_21, %c0_22] : memref<1x2x16x8xbf16, #tpu.memory_space<vmem>>, vector<1x1x16x8xbf16>
    %35 = vector.shape_cast %34 : vector<1x1x16x8xbf16> to vector<16x8xbf16>
    %36 = vector.shape_cast %33 : vector<16x8xbf16> to vector<1x1x16x8xbf16>
    tpu.vector_store %arg5[%c0_19, %c1_20, %c0_21, %c0_22], %36 {strides = array<i32>} : memref<1x2x16x8xbf16, #tpu.memory_space<vmem>>, vector<1x1x16x8xbf16>,
    return
  }
  func.func @transform_0(%arg0: i32) -> (i32, i32, i32) {
    %c0_i32 = arith.constant 0 : i32
    %c0_i32_0 = arith.constant 0 : i32
    %c0_i32_1 = arith.constant 0 : i32
    return %arg0, %c0_i32, %c0_i32_0 : i32, i32, i32
  }
  func.func @transform_1(%arg0: i32) -> (i32, i32, i32) {
    %c0_i32 = arith.constant 0 : i32
    %c0_i32_0 = arith.constant 0 : i32
    %c0_i32_1 = arith.constant 0 : i32
    %c0_i32_2 = arith.constant 0 : i32
    return %c0_i32, %c0_i32_0, %c0_i32_1 : i32, i32, i32
  }
  func.func @transform_2(%arg0: i32) -> (i32, i32) {
    %c0_i32 = arith.constant 0 : i32
    %c0_i32_0 = arith.constant 0 : i32
    %c0_i32_1 = arith.constant 0 : i32
    return %c0_i32, %c0_i32_0 : i32, i32
  }
  func.func @transform_3(%arg0: i32) -> (i32, i32) {
    %c0_i32 = arith.constant 0 : i32
    %c0_i32_0 = arith.constant 0 : i32
    %c0_i32_1 = arith.constant 0 : i32
    return %c0_i32, %c0_i32_0 : i32, i32
  }
  func.func @transform_4(%arg0: i32) -> (i32, i32, i32, i32) {
    %c0_i32 = arith.constant 0 : i32
    %c0_i32_0 = arith.constant 0 : i32
    %c0_i32_1 = arith.constant 0 : i32
    %c0_i32_2 = arith.constant 0 : i32
    return %arg0, %c0_i32, %c0_i32_0, %c0_i32_1 : i32, i32, i32, i32
  }
}

module attributes {stable_mosaic.version = 11 : i64} {
  func.func @_convtranspose_kernel(%arg0: i32, %arg1: memref<1x8x32xbf16, #tpu.memory_space<vmem>>, %arg2: memref<2x4x16xf32, #tpu.memory_space<vmem>>, %arg3: memref<4x1xf32, #tpu.memory_space<vmem>>, %arg4: memref<8x1xf32, #tpu.memory_space<vmem>>, %arg5: memref<1x2x4x32xbf16, #tpu.memory_space<vmem>>) attributes {dimension_semantics = [#tpu.dimension_semantics<parallel>], iteration_bounds = array<i64: 2>, scalar_prefetch = 0 : i64, scratch_operands = 0 : i64, tpu.core_type = #tpu.core_type<tc>, window_params = [{transform_indices = @transform_0, window_bounds = array<i64: 1, 8, 32>}, {pipeline_mode = #tpu.pipeline_mode<synchronous>, transform_indices = @transform_1, window_bounds = array<i64: 2, 4, 16>}, {pipeline_mode = #tpu.pipeline_mode<synchronous>, transform_indices = @transform_2, window_bounds = array<i64: 4, 1>}, {pipeline_mode = #tpu.pipeline_mode<synchronous>, transform_indices = @transform_3, window_bounds = array<i64: 8, 1>}, {transform_indices = @transform_4, window_bounds = array<i64: 1, 2, 4, 32>}]} {
    %c0 = arith.constant 0 : index
    %c0_0 = arith.constant 0 : index
    %c0_1 = arith.constant 0 : index
    %0 = vector.load %arg1[%c0, %c0_0, %c0_1] : memref<1x8x32xbf16, #tpu.memory_space<vmem>>, vector<1x8x32xbf16>
    %1 = vector.shape_cast %0 : vector<1x8x32xbf16> to vector<8x32xbf16>
    %2 = arith.extf %1 : vector<8x32xbf16> to vector<8x32xf32>
    %c0_2 = arith.constant 0 : index
    %c0_3 = arith.constant 0 : index
    %3 = vector.load %arg4[%c0_2, %c0_3] : memref<8x1xf32, #tpu.memory_space<vmem>>, vector<8x1xf32>
    %cst = arith.constant 0.000000e+00 : f32
    %4 = vector.broadcast %cst : f32 to vector<8x32xf32>
    %5 = arith.cmpf oge, %2, %4 : vector<8x32xf32>
    %6 = vector.broadcast %3 : vector<8x1xf32> to vector<8x32xf32>
    %7 = arith.mulf %6, %2 : vector<8x32xf32>
    %8 = arith.select %5, %2, %7 : vector<8x32xi1>, vector<8x32xf32>
    %cst_4 = arith.constant 0.000000e+00 : f32
    %9 = vector.broadcast %cst_4 : f32 to vector<8x1xf32>
    %cst_5 = arith.constant 0.000000e+00 : f32
    %10 = vector.broadcast %cst_5 : f32 to vector<8x1xf32>
    %11 = tpu.concatenate %9, %8, %10 in 1 : vector<8x1xf32>, vector<8x32xf32>, vector<8x1xf32> -> vector<8x34xf32>
    %c0_6 = arith.constant 0 : index
    %c0_7 = arith.constant 0 : index
    %12 = vector.load %arg3[%c0_6, %c0_7] : memref<4x1xf32, #tpu.memory_space<vmem>>, vector<4x1xf32>
    %13 = vector.extract_strided_slice %11 {offsets = [0, 1], sizes = [8, 32], strides = [1, 1]} : vector<8x34xf32> to vector<8x32xf32>
    %14 = vector.extract_strided_slice %11 {offsets = [0, 0], sizes = [8, 32], strides = [1, 1]} : vector<8x34xf32> to vector<8x32xf32>
    %c0_8 = arith.constant 0 : index
    %c0_9 = arith.constant 0 : index
    %c0_10 = arith.constant 0 : index
    %15 = vector.load %arg2[%c0_8, %c0_9, %c0_10] : memref<2x4x16xf32, #tpu.memory_space<vmem>>, vector<1x4x16xf32>
    %16 = vector.shape_cast %15 : vector<1x4x16xf32> to vector<4x16xf32>
    %17 = tpu.concatenate %13, %14 in 0 : vector<8x32xf32>, vector<8x32xf32> -> vector<16x32xf32>
    %cst_11 = arith.constant dense<0.000000e+00> : vector<4x32xf32>
    %18 = tpu.matmul %16, %17, %cst_11 {dimension_numbers = #tpu.dot_dimension_numbers<[1], [0], [0], [1], [0, 0, 1, 1], [], []>} : vector<4x16xf32>, vector<16x32xf32>, vector<4x32xf32> -> vector<4x32xf32>
    %19 = vector.broadcast %12 : vector<4x1xf32> to vector<4x32xf32>
    %20 = arith.addf %18, %19 : vector<4x32xf32>
    %21 = arith.truncf %20 : vector<4x32xf32> to vector<4x32xbf16>
    %c0_12 = arith.constant 0 : index
    %c0_13 = arith.constant 0 : index
    %c0_14 = arith.constant 0 : index
    %c0_15 = arith.constant 0 : index
    %22 = vector.load %arg5[%c0_12, %c0_13, %c0_14, %c0_15] : memref<1x2x4x32xbf16, #tpu.memory_space<vmem>>, vector<1x1x4x32xbf16>
    %23 = vector.shape_cast %22 : vector<1x1x4x32xbf16> to vector<4x32xbf16>
    %24 = vector.shape_cast %21 : vector<4x32xbf16> to vector<1x1x4x32xbf16>
    tpu.vector_store %arg5[%c0_12, %c0_13, %c0_14, %c0_15], %24 {strides = array<i32>} : memref<1x2x4x32xbf16, #tpu.memory_space<vmem>>, vector<1x1x4x32xbf16>,
    %25 = vector.extract_strided_slice %11 {offsets = [0, 2], sizes = [8, 32], strides = [1, 1]} : vector<8x34xf32> to vector<8x32xf32>
    %26 = vector.extract_strided_slice %11 {offsets = [0, 1], sizes = [8, 32], strides = [1, 1]} : vector<8x34xf32> to vector<8x32xf32>
    %c1 = arith.constant 1 : index
    %c0_16 = arith.constant 0 : index
    %c0_17 = arith.constant 0 : index
    %27 = vector.load %arg2[%c1, %c0_16, %c0_17] : memref<2x4x16xf32, #tpu.memory_space<vmem>>, vector<1x4x16xf32>
    %28 = vector.shape_cast %27 : vector<1x4x16xf32> to vector<4x16xf32>
    %29 = tpu.concatenate %25, %26 in 0 : vector<8x32xf32>, vector<8x32xf32> -> vector<16x32xf32>
    %cst_18 = arith.constant dense<0.000000e+00> : vector<4x32xf32>
    %30 = tpu.matmul %28, %29, %cst_18 {dimension_numbers = #tpu.dot_dimension_numbers<[1], [0], [0], [1], [0, 0, 1, 1], [], []>} : vector<4x16xf32>, vector<16x32xf32>, vector<4x32xf32> -> vector<4x32xf32>
    %31 = vector.broadcast %12 : vector<4x1xf32> to vector<4x32xf32>
    %32 = arith.addf %30, %31 : vector<4x32xf32>
    %33 = arith.truncf %32 : vector<4x32xf32> to vector<4x32xbf16>
    %c0_19 = arith.constant 0 : index
    %c1_20 = arith.constant 1 : index
    %c0_21 = arith.constant 0 : index
    %c0_22 = arith.constant 0 : index
    %34 = vector.load %arg5[%c0_19, %c1_20, %c0_21, %c0_22] : memref<1x2x4x32xbf16, #tpu.memory_space<vmem>>, vector<1x1x4x32xbf16>
    %35 = vector.shape_cast %34 : vector<1x1x4x32xbf16> to vector<4x32xbf16>
    %36 = vector.shape_cast %33 : vector<4x32xbf16> to vector<1x1x4x32xbf16>
    tpu.vector_store %arg5[%c0_19, %c1_20, %c0_21, %c0_22], %36 {strides = array<i32>} : memref<1x2x4x32xbf16, #tpu.memory_space<vmem>>, vector<1x1x4x32xbf16>,
    return
  }
  func.func @transform_0(%arg0: i32) -> (i32, i32, i32) {
    %c0_i32 = arith.constant 0 : i32
    %c0_i32_0 = arith.constant 0 : i32
    %c0_i32_1 = arith.constant 0 : i32
    return %arg0, %c0_i32, %c0_i32_0 : i32, i32, i32
  }
  func.func @transform_1(%arg0: i32) -> (i32, i32, i32) {
    %c0_i32 = arith.constant 0 : i32
    %c0_i32_0 = arith.constant 0 : i32
    %c0_i32_1 = arith.constant 0 : i32
    %c0_i32_2 = arith.constant 0 : i32
    return %c0_i32, %c0_i32_0, %c0_i32_1 : i32, i32, i32
  }
  func.func @transform_2(%arg0: i32) -> (i32, i32) {
    %c0_i32 = arith.constant 0 : i32
    %c0_i32_0 = arith.constant 0 : i32
    %c0_i32_1 = arith.constant 0 : i32
    return %c0_i32, %c0_i32_0 : i32, i32
  }
  func.func @transform_3(%arg0: i32) -> (i32, i32) {
    %c0_i32 = arith.constant 0 : i32
    %c0_i32_0 = arith.constant 0 : i32
    %c0_i32_1 = arith.constant 0 : i32
    return %c0_i32, %c0_i32_0 : i32, i32
  }
  func.func @transform_4(%arg0: i32) -> (i32, i32, i32, i32) {
    %c0_i32 = arith.constant 0 : i32
    %c0_i32_0 = arith.constant 0 : i32
    %c0_i32_1 = arith.constant 0 : i32
    %c0_i32_2 = arith.constant 0 : i32
    return %arg0, %c0_i32, %c0_i32_0, %c0_i32_1 : i32, i32, i32, i32
  }
}

module attributes {stable_mosaic.version = 11 : i64} {
  func.func @_convtranspose_kernel(%arg0: i32, %arg1: memref<1x16x16xbf16, #tpu.memory_space<vmem>>, %arg2: memref<2x8x32xf32, #tpu.memory_space<vmem>>, %arg3: memref<8x1xf32, #tpu.memory_space<vmem>>, %arg4: memref<16x1xf32, #tpu.memory_space<vmem>>, %arg5: memref<1x2x8x16xbf16, #tpu.memory_space<vmem>>) attributes {dimension_semantics = [#tpu.dimension_semantics<parallel>], iteration_bounds = array<i64: 2>, scalar_prefetch = 0 : i64, scratch_operands = 0 : i64, tpu.core_type = #tpu.core_type<tc>, window_params = [{transform_indices = @transform_0, window_bounds = array<i64: 1, 16, 16>}, {pipeline_mode = #tpu.pipeline_mode<synchronous>, transform_indices = @transform_1, window_bounds = array<i64: 2, 8, 32>}, {pipeline_mode = #tpu.pipeline_mode<synchronous>, transform_indices = @transform_2, window_bounds = array<i64: 8, 1>}, {pipeline_mode = #tpu.pipeline_mode<synchronous>, transform_indices = @transform_3, window_bounds = array<i64: 16, 1>}, {transform_indices = @transform_4, window_bounds = array<i64: 1, 2, 8, 16>}]} {
    %c0 = arith.constant 0 : index
    %c0_0 = arith.constant 0 : index
    %c0_1 = arith.constant 0 : index
    %0 = vector.load %arg1[%c0, %c0_0, %c0_1] : memref<1x16x16xbf16, #tpu.memory_space<vmem>>, vector<1x16x16xbf16>
    %1 = vector.shape_cast %0 : vector<1x16x16xbf16> to vector<16x16xbf16>
    %2 = arith.extf %1 : vector<16x16xbf16> to vector<16x16xf32>
    %c0_2 = arith.constant 0 : index
    %c0_3 = arith.constant 0 : index
    %3 = vector.load %arg4[%c0_2, %c0_3] : memref<16x1xf32, #tpu.memory_space<vmem>>, vector<16x1xf32>
    %cst = arith.constant 0.000000e+00 : f32
    %4 = vector.broadcast %cst : f32 to vector<16x16xf32>
    %5 = arith.cmpf oge, %2, %4 : vector<16x16xf32>
    %6 = vector.broadcast %3 : vector<16x1xf32> to vector<16x16xf32>
    %7 = arith.mulf %6, %2 : vector<16x16xf32>
    %8 = arith.select %5, %2, %7 : vector<16x16xi1>, vector<16x16xf32>
    %cst_4 = arith.constant 0.000000e+00 : f32
    %9 = vector.broadcast %cst_4 : f32 to vector<16x1xf32>
    %cst_5 = arith.constant 0.000000e+00 : f32
    %10 = vector.broadcast %cst_5 : f32 to vector<16x1xf32>
    %11 = tpu.concatenate %9, %8, %10 in 1 : vector<16x1xf32>, vector<16x16xf32>, vector<16x1xf32> -> vector<16x18xf32>
    %c0_6 = arith.constant 0 : index
    %c0_7 = arith.constant 0 : index
    %12 = vector.load %arg3[%c0_6, %c0_7] : memref<8x1xf32, #tpu.memory_space<vmem>>, vector<8x1xf32>
    %13 = vector.extract_strided_slice %11 {offsets = [0, 1], sizes = [16, 16], strides = [1, 1]} : vector<16x18xf32> to vector<16x16xf32>
    %14 = vector.extract_strided_slice %11 {offsets = [0, 0], sizes = [16, 16], strides = [1, 1]} : vector<16x18xf32> to vector<16x16xf32>
    %c0_8 = arith.constant 0 : index
    %c0_9 = arith.constant 0 : index
    %c0_10 = arith.constant 0 : index
    %15 = vector.load %arg2[%c0_8, %c0_9, %c0_10] : memref<2x8x32xf32, #tpu.memory_space<vmem>>, vector<1x8x32xf32>
    %16 = vector.shape_cast %15 : vector<1x8x32xf32> to vector<8x32xf32>
    %17 = tpu.concatenate %13, %14 in 0 : vector<16x16xf32>, vector<16x16xf32> -> vector<32x16xf32>
    %cst_11 = arith.constant dense<0.000000e+00> : vector<8x16xf32>
    %18 = tpu.matmul %16, %17, %cst_11 {dimension_numbers = #tpu.dot_dimension_numbers<[1], [0], [0], [1], [0, 0, 1, 1], [], []>} : vector<8x32xf32>, vector<32x16xf32>, vector<8x16xf32> -> vector<8x16xf32>
    %19 = vector.broadcast %12 : vector<8x1xf32> to vector<8x16xf32>
    %20 = arith.addf %18, %19 : vector<8x16xf32>
    %21 = arith.truncf %20 : vector<8x16xf32> to vector<8x16xbf16>
    %c0_12 = arith.constant 0 : index
    %c0_13 = arith.constant 0 : index
    %c0_14 = arith.constant 0 : index
    %c0_15 = arith.constant 0 : index
    %22 = vector.load %arg5[%c0_12, %c0_13, %c0_14, %c0_15] : memref<1x2x8x16xbf16, #tpu.memory_space<vmem>>, vector<1x1x8x16xbf16>
    %23 = vector.shape_cast %22 : vector<1x1x8x16xbf16> to vector<8x16xbf16>
    %24 = vector.shape_cast %21 : vector<8x16xbf16> to vector<1x1x8x16xbf16>
    tpu.vector_store %arg5[%c0_12, %c0_13, %c0_14, %c0_15], %24 {strides = array<i32>} : memref<1x2x8x16xbf16, #tpu.memory_space<vmem>>, vector<1x1x8x16xbf16>,
    %25 = vector.extract_strided_slice %11 {offsets = [0, 2], sizes = [16, 16], strides = [1, 1]} : vector<16x18xf32> to vector<16x16xf32>
    %26 = vector.extract_strided_slice %11 {offsets = [0, 1], sizes = [16, 16], strides = [1, 1]} : vector<16x18xf32> to vector<16x16xf32>
    %c1 = arith.constant 1 : index
    %c0_16 = arith.constant 0 : index
    %c0_17 = arith.constant 0 : index
    %27 = vector.load %arg2[%c1, %c0_16, %c0_17] : memref<2x8x32xf32, #tpu.memory_space<vmem>>, vector<1x8x32xf32>
    %28 = vector.shape_cast %27 : vector<1x8x32xf32> to vector<8x32xf32>
    %29 = tpu.concatenate %25, %26 in 0 : vector<16x16xf32>, vector<16x16xf32> -> vector<32x16xf32>
    %cst_18 = arith.constant dense<0.000000e+00> : vector<8x16xf32>
    %30 = tpu.matmul %28, %29, %cst_18 {dimension_numbers = #tpu.dot_dimension_numbers<[1], [0], [0], [1], [0, 0, 1, 1], [], []>} : vector<8x32xf32>, vector<32x16xf32>, vector<8x16xf32> -> vector<8x16xf32>
    %31 = vector.broadcast %12 : vector<8x1xf32> to vector<8x16xf32>
    %32 = arith.addf %30, %31 : vector<8x16xf32>
    %33 = arith.truncf %32 : vector<8x16xf32> to vector<8x16xbf16>
    %c0_19 = arith.constant 0 : index
    %c1_20 = arith.constant 1 : index
    %c0_21 = arith.constant 0 : index
    %c0_22 = arith.constant 0 : index
    %34 = vector.load %arg5[%c0_19, %c1_20, %c0_21, %c0_22] : memref<1x2x8x16xbf16, #tpu.memory_space<vmem>>, vector<1x1x8x16xbf16>
    %35 = vector.shape_cast %34 : vector<1x1x8x16xbf16> to vector<8x16xbf16>
    %36 = vector.shape_cast %33 : vector<8x16xbf16> to vector<1x1x8x16xbf16>
    tpu.vector_store %arg5[%c0_19, %c1_20, %c0_21, %c0_22], %36 {strides = array<i32>} : memref<1x2x8x16xbf16, #tpu.memory_space<vmem>>, vector<1x1x8x16xbf16>,
    return
  }
  func.func @transform_0(%arg0: i32) -> (i32, i32, i32) {
    %c0_i32 = arith.constant 0 : i32
    %c0_i32_0 = arith.constant 0 : i32
    %c0_i32_1 = arith.constant 0 : i32
    return %arg0, %c0_i32, %c0_i32_0 : i32, i32, i32
  }
  func.func @transform_1(%arg0: i32) -> (i32, i32, i32) {
    %c0_i32 = arith.constant 0 : i32
    %c0_i32_0 = arith.constant 0 : i32
    %c0_i32_1 = arith.constant 0 : i32
    %c0_i32_2 = arith.constant 0 : i32
    return %c0_i32, %c0_i32_0, %c0_i32_1 : i32, i32, i32
  }
  func.func @transform_2(%arg0: i32) -> (i32, i32) {
    %c0_i32 = arith.constant 0 : i32
    %c0_i32_0 = arith.constant 0 : i32
    %c0_i32_1 = arith.constant 0 : i32
    return %c0_i32, %c0_i32_0 : i32, i32
  }
  func.func @transform_3(%arg0: i32) -> (i32, i32) {
    %c0_i32 = arith.constant 0 : i32
    %c0_i32_0 = arith.constant 0 : i32
    %c0_i32_1 = arith.constant 0 : i32
    return %c0_i32, %c0_i32_0 : i32, i32
  }
  func.func @transform_4(%arg0: i32) -> (i32, i32, i32, i32) {
    %c0_i32 = arith.constant 0 : i32
    %c0_i32_0 = arith.constant 0 : i32
    %c0_i32_1 = arith.constant 0 : i32
    %c0_i32_2 = arith.constant 0 : i32
    return %arg0, %c0_i32, %c0_i32_0, %c0_i32_1 : i32, i32, i32, i32
  }
}

module attributes {stable_mosaic.version = 11 : i64} {
  func.func @_mrf_stage_kernel(%arg0: i32, %arg1: memref<1x11x32xbf16, #tpu.memory_space<vmem>>, %arg2: memref<8x33xf32, #tpu.memory_space<vmem>>, %arg3: memref<8x1xf32, #tpu.memory_space<vmem>>, %arg4: memref<2x8x40xf32, #tpu.memory_space<vmem>>, %arg5: memref<2x8x1xf32, #tpu.memory_space<vmem>>, %arg6: memref<2x8x1xf32, #tpu.memory_space<vmem>>, %arg7: memref<2x8x40xf32, #tpu.memory_space<vmem>>, %arg8: memref<2x8x1xf32, #tpu.memory_space<vmem>>, %arg9: memref<2x8x1xf32, #tpu.memory_space<vmem>>, %arg10: memref<1x8x32xbf16, #tpu.memory_space<vmem>>) attributes {dimension_semantics = [#tpu.dimension_semantics<parallel>], iteration_bounds = array<i64: 2>, scalar_prefetch = 0 : i64, scratch_operands = 0 : i64, tpu.core_type = #tpu.core_type<tc>, window_params = [{transform_indices = @transform_0, window_bounds = array<i64: 1, 11, 32>}, {pipeline_mode = #tpu.pipeline_mode<synchronous>, transform_indices = @transform_1, window_bounds = array<i64: 8, 33>}, {pipeline_mode = #tpu.pipeline_mode<synchronous>, transform_indices = @transform_2, window_bounds = array<i64: 8, 1>}, {pipeline_mode = #tpu.pipeline_mode<synchronous>, transform_indices = @transform_3, window_bounds = array<i64: 2, 8, 40>}, {pipeline_mode = #tpu.pipeline_mode<synchronous>, transform_indices = @transform_4, window_bounds = array<i64: 2, 8, 1>}, {pipeline_mode = #tpu.pipeline_mode<synchronous>, transform_indices = @transform_5, window_bounds = array<i64: 2, 8, 1>}, {pipeline_mode = #tpu.pipeline_mode<synchronous>, transform_indices = @transform_6, window_bounds = array<i64: 2, 8, 40>}, {pipeline_mode = #tpu.pipeline_mode<synchronous>, transform_indices = @transform_7, window_bounds = array<i64: 2, 8, 1>}, {pipeline_mode = #tpu.pipeline_mode<synchronous>, transform_indices = @transform_8, window_bounds = array<i64: 2, 8, 1>}, {transform_indices = @transform_9, window_bounds = array<i64: 1, 8, 32>}]} {
    %c0 = arith.constant 0 : index
    %c0_0 = arith.constant 0 : index
    %c0_1 = arith.constant 0 : index
    %0 = vector.load %arg1[%c0, %c0_0, %c0_1] : memref<1x11x32xbf16, #tpu.memory_space<vmem>>, vector<1x11x32xbf16>
    %1 = vector.shape_cast %0 : vector<1x11x32xbf16> to vector<11x32xbf16>
    %2 = arith.extf %1 : vector<11x32xbf16> to vector<11x32xf32>
    %c0_2 = arith.constant 0 : index
    %c0_3 = arith.constant 0 : index
    %3 = vector.load %arg2[%c0_2, %c0_3] : memref<8x33xf32, #tpu.memory_space<vmem>>, vector<8x33xf32>
    %c0_4 = arith.constant 0 : index
    %c0_5 = arith.constant 0 : index
    %4 = vector.load %arg3[%c0_4, %c0_5] : memref<8x1xf32, #tpu.memory_space<vmem>>, vector<8x1xf32>
    %cst = arith.constant 0.000000e+00 : f32
    %5 = vector.broadcast %cst : f32 to vector<11x1xf32>
    %6 = tpu.concatenate %5, %2, %5 in 1 : vector<11x1xf32>, vector<11x32xf32>, vector<11x1xf32> -> vector<11x34xf32>
    %7 = vector.extract_strided_slice %6 {offsets = [0, 0], sizes = [11, 32], strides = [1, 1]} : vector<11x34xf32> to vector<11x32xf32>
    %8 = vector.extract_strided_slice %6 {offsets = [0, 1], sizes = [11, 32], strides = [1, 1]} : vector<11x34xf32> to vector<11x32xf32>
    %9 = vector.extract_strided_slice %6 {offsets = [0, 2], sizes = [11, 32], strides = [1, 1]} : vector<11x34xf32> to vector<11x32xf32>
    %10 = vector.extract_strided_slice %3 {offsets = [0, 0], sizes = [8, 11], strides = [1, 1]} : vector<8x33xf32> to vector<8x11xf32>
    %cst_6 = arith.constant dense<0.000000e+00> : vector<8x32xf32>
    %11 = tpu.matmul %10, %7, %cst_6 {dimension_numbers = #tpu.dot_dimension_numbers<[1], [0], [0], [1], [0, 0, 1, 1], [], []>} : vector<8x11xf32>, vector<11x32xf32>, vector<8x32xf32> -> vector<8x32xf32>
    %12 = vector.extract_strided_slice %3 {offsets = [0, 11], sizes = [8, 11], strides = [1, 1]} : vector<8x33xf32> to vector<8x11xf32>
    %cst_7 = arith.constant dense<0.000000e+00> : vector<8x32xf32>
    %13 = tpu.matmul %12, %8, %cst_7 {dimension_numbers = #tpu.dot_dimension_numbers<[1], [0], [0], [1], [0, 0, 1, 1], [], []>} : vector<8x11xf32>, vector<11x32xf32>, vector<8x32xf32> -> vector<8x32xf32>
    %14 = arith.addf %11, %13 : vector<8x32xf32>
    %15 = vector.extract_strided_slice %3 {offsets = [0, 22], sizes = [8, 11], strides = [1, 1]} : vector<8x33xf32> to vector<8x11xf32>
    %cst_8 = arith.constant dense<0.000000e+00> : vector<8x32xf32>
    %16 = tpu.matmul %15, %9, %cst_8 {dimension_numbers = #tpu.dot_dimension_numbers<[1], [0], [0], [1], [0, 0, 1, 1], [], []>} : vector<8x11xf32>, vector<11x32xf32>, vector<8x32xf32> -> vector<8x32xf32>
    %17 = arith.addf %14, %16 : vector<8x32xf32>
    %18 = vector.broadcast %4 : vector<8x1xf32> to vector<8x32xf32>
    %19 = arith.addf %17, %18 : vector<8x32xf32>
    %cst_9 = arith.constant 0.000000e+00 : f32
    %20 = vector.broadcast %cst_9 : f32 to vector<8x32xf32>
    %c0_10 = arith.constant 0 : index
    %c0_11 = arith.constant 0 : index
    %c0_12 = arith.constant 0 : index
    %21 = vector.load %arg6[%c0_10, %c0_11, %c0_12] : memref<2x8x1xf32, #tpu.memory_space<vmem>>, vector<1x8x1xf32>
    %22 = vector.shape_cast %21 : vector<1x8x1xf32> to vector<8x1xf32>
    %cst_13 = arith.constant 0.000000e+00 : f32
    %23 = vector.broadcast %cst_13 : f32 to vector<8x32xf32>
    %24 = arith.cmpf oge, %19, %23 : vector<8x32xf32>
    %25 = vector.broadcast %22 : vector<8x1xf32> to vector<8x32xf32>
    %26 = arith.mulf %25, %19 : vector<8x32xf32>
    %27 = arith.select %24, %19, %26 : vector<8x32xi1>, vector<8x32xf32>
    %c0_14 = arith.constant 0 : index
    %c0_15 = arith.constant 0 : index
    %c0_16 = arith.constant 0 : index
    %28 = vector.load %arg4[%c0_14, %c0_15, %c0_16] : memref<2x8x40xf32, #tpu.memory_space<vmem>>, vector<1x8x40xf32>
    %29 = vector.shape_cast %28 : vector<1x8x40xf32> to vector<8x40xf32>
    %c0_17 = arith.constant 0 : index
    %c0_18 = arith.constant 0 : index
    %c0_19 = arith.constant 0 : index
    %30 = vector.load %arg5[%c0_17, %c0_18, %c0_19] : memref<2x8x1xf32, #tpu.memory_space<vmem>>, vector<1x8x1xf32>
    %31 = vector.shape_cast %30 : vector<1x8x1xf32> to vector<8x1xf32>
    %cst_20 = arith.constant 0.000000e+00 : f32
    %32 = vector.broadcast %cst_20 : f32 to vector<8x2xf32>
    %33 = tpu.concatenate %32, %27, %32 in 1 : vector<8x2xf32>, vector<8x32xf32>, vector<8x2xf32> -> vector<8x36xf32>
    %34 = vector.extract_strided_slice %33 {offsets = [0, 0], sizes = [8, 32], strides = [1, 1]} : vector<8x36xf32> to vector<8x32xf32>
    %35 = vector.extract_strided_slice %33 {offsets = [0, 1], sizes = [8, 32], strides = [1, 1]} : vector<8x36xf32> to vector<8x32xf32>
    %36 = vector.extract_strided_slice %33 {offsets = [0, 2], sizes = [8, 32], strides = [1, 1]} : vector<8x36xf32> to vector<8x32xf32>
    %37 = vector.extract_strided_slice %33 {offsets = [0, 3], sizes = [8, 32], strides = [1, 1]} : vector<8x36xf32> to vector<8x32xf32>
    %38 = vector.extract_strided_slice %33 {offsets = [0, 4], sizes = [8, 32], strides = [1, 1]} : vector<8x36xf32> to vector<8x32xf32>
    %39 = tpu.concatenate %34, %35, %36, %37, %38 in 0 : vector<8x32xf32>, vector<8x32xf32>, vector<8x32xf32>, vector<8x32xf32>, vector<8x32xf32> -> vector<40x32xf32>
    %cst_21 = arith.constant dense<0.000000e+00> : vector<8x32xf32>
    %40 = tpu.matmul %29, %39, %cst_21 {dimension_numbers = #tpu.dot_dimension_numbers<[1], [0], [0], [1], [0, 0, 1, 1], [], []>} : vector<8x40xf32>, vector<40x32xf32>, vector<8x32xf32> -> vector<8x32xf32>
    %41 = vector.broadcast %31 : vector<8x1xf32> to vector<8x32xf32>
    %42 = arith.addf %40, %41 : vector<8x32xf32>
    %c0_22 = arith.constant 0 : index
    %c0_23 = arith.constant 0 : index
    %c0_24 = arith.constant 0 : index
    %43 = vector.load %arg9[%c0_22, %c0_23, %c0_24] : memref<2x8x1xf32, #tpu.memory_space<vmem>>, vector<1x8x1xf32>
    %44 = vector.shape_cast %43 : vector<1x8x1xf32> to vector<8x1xf32>
    %cst_25 = arith.constant 0.000000e+00 : f32
    %45 = vector.broadcast %cst_25 : f32 to vector<8x32xf32>
    %46 = arith.cmpf oge, %42, %45 : vector<8x32xf32>
    %47 = vector.broadcast %44 : vector<8x1xf32> to vector<8x32xf32>
    %48 = arith.mulf %47, %42 : vector<8x32xf32>
    %49 = arith.select %46, %42, %48 : vector<8x32xi1>, vector<8x32xf32>
    %c0_26 = arith.constant 0 : index
    %c0_27 = arith.constant 0 : index
    %c0_28 = arith.constant 0 : index
    %50 = vector.load %arg7[%c0_26, %c0_27, %c0_28] : memref<2x8x40xf32, #tpu.memory_space<vmem>>, vector<1x8x40xf32>
    %51 = vector.shape_cast %50 : vector<1x8x40xf32> to vector<8x40xf32>
    %c0_29 = arith.constant 0 : index
    %c0_30 = arith.constant 0 : index
    %c0_31 = arith.constant 0 : index
    %52 = vector.load %arg8[%c0_29, %c0_30, %c0_31] : memref<2x8x1xf32, #tpu.memory_space<vmem>>, vector<1x8x1xf32>
    %53 = vector.shape_cast %52 : vector<1x8x1xf32> to vector<8x1xf32>
    %cst_32 = arith.constant 0.000000e+00 : f32
    %54 = vector.broadcast %cst_32 : f32 to vector<8x2xf32>
    %55 = tpu.concatenate %54, %49, %54 in 1 : vector<8x2xf32>, vector<8x32xf32>, vector<8x2xf32> -> vector<8x36xf32>
    %56 = vector.extract_strided_slice %55 {offsets = [0, 0], sizes = [8, 32], strides = [1, 1]} : vector<8x36xf32> to vector<8x32xf32>
    %57 = vector.extract_strided_slice %55 {offsets = [0, 1], sizes = [8, 32], strides = [1, 1]} : vector<8x36xf32> to vector<8x32xf32>
    %58 = vector.extract_strided_slice %55 {offsets = [0, 2], sizes = [8, 32], strides = [1, 1]} : vector<8x36xf32> to vector<8x32xf32>
    %59 = vector.extract_strided_slice %55 {offsets = [0, 3], sizes = [8, 32], strides = [1, 1]} : vector<8x36xf32> to vector<8x32xf32>
    %60 = vector.extract_strided_slice %55 {offsets = [0, 4], sizes = [8, 32], strides = [1, 1]} : vector<8x36xf32> to vector<8x32xf32>
    %61 = tpu.concatenate %56, %57, %58, %59, %60 in 0 : vector<8x32xf32>, vector<8x32xf32>, vector<8x32xf32>, vector<8x32xf32>, vector<8x32xf32> -> vector<40x32xf32>
    %cst_33 = arith.constant dense<0.000000e+00> : vector<8x32xf32>
    %62 = tpu.matmul %51, %61, %cst_33 {dimension_numbers = #tpu.dot_dimension_numbers<[1], [0], [0], [1], [0, 0, 1, 1], [], []>} : vector<8x40xf32>, vector<40x32xf32>, vector<8x32xf32> -> vector<8x32xf32>
    %63 = vector.broadcast %53 : vector<8x1xf32> to vector<8x32xf32>
    %64 = arith.addf %62, %63 : vector<8x32xf32>
    %65 = arith.addf %19, %64 : vector<8x32xf32>
    %66 = arith.addf %20, %65 : vector<8x32xf32>
    %c1 = arith.constant 1 : index
    %c0_34 = arith.constant 0 : index
    %c0_35 = arith.constant 0 : index
    %67 = vector.load %arg6[%c1, %c0_34, %c0_35] : memref<2x8x1xf32, #tpu.memory_space<vmem>>, vector<1x8x1xf32>
    %68 = vector.shape_cast %67 : vector<1x8x1xf32> to vector<8x1xf32>
    %cst_36 = arith.constant 0.000000e+00 : f32
    %69 = vector.broadcast %cst_36 : f32 to vector<8x32xf32>
    %70 = arith.cmpf oge, %19, %69 : vector<8x32xf32>
    %71 = vector.broadcast %68 : vector<8x1xf32> to vector<8x32xf32>
    %72 = arith.mulf %71, %19 : vector<8x32xf32>
    %73 = arith.select %70, %19, %72 : vector<8x32xi1>, vector<8x32xf32>
    %c1_37 = arith.constant 1 : index
    %c0_38 = arith.constant 0 : index
    %c0_39 = arith.constant 0 : index
    %74 = vector.load %arg4[%c1_37, %c0_38, %c0_39] : memref<2x8x40xf32, #tpu.memory_space<vmem>>, vector<1x8x40xf32>
    %75 = vector.shape_cast %74 : vector<1x8x40xf32> to vector<8x40xf32>
    %c1_40 = arith.constant 1 : index
    %c0_41 = arith.constant 0 : index
    %c0_42 = arith.constant 0 : index
    %76 = vector.load %arg5[%c1_40, %c0_41, %c0_42] : memref<2x8x1xf32, #tpu.memory_space<vmem>>, vector<1x8x1xf32>
    %77 = vector.shape_cast %76 : vector<1x8x1xf32> to vector<8x1xf32>
    %cst_43 = arith.constant 0.000000e+00 : f32
    %78 = vector.broadcast %cst_43 : f32 to vector<8x2xf32>
    %79 = tpu.concatenate %78, %73, %78 in 1 : vector<8x2xf32>, vector<8x32xf32>, vector<8x2xf32> -> vector<8x36xf32>
    %80 = vector.extract_strided_slice %79 {offsets = [0, 0], sizes = [8, 32], strides = [1, 1]} : vector<8x36xf32> to vector<8x32xf32>
    %81 = vector.extract_strided_slice %79 {offsets = [0, 1], sizes = [8, 32], strides = [1, 1]} : vector<8x36xf32> to vector<8x32xf32>
    %82 = vector.extract_strided_slice %79 {offsets = [0, 2], sizes = [8, 32], strides = [1, 1]} : vector<8x36xf32> to vector<8x32xf32>
    %83 = vector.extract_strided_slice %79 {offsets = [0, 3], sizes = [8, 32], strides = [1, 1]} : vector<8x36xf32> to vector<8x32xf32>
    %84 = vector.extract_strided_slice %79 {offsets = [0, 4], sizes = [8, 32], strides = [1, 1]} : vector<8x36xf32> to vector<8x32xf32>
    %85 = tpu.concatenate %80, %81, %82, %83, %84 in 0 : vector<8x32xf32>, vector<8x32xf32>, vector<8x32xf32>, vector<8x32xf32>, vector<8x32xf32> -> vector<40x32xf32>
    %cst_44 = arith.constant dense<0.000000e+00> : vector<8x32xf32>
    %86 = tpu.matmul %75, %85, %cst_44 {dimension_numbers = #tpu.dot_dimension_numbers<[1], [0], [0], [1], [0, 0, 1, 1], [], []>} : vector<8x40xf32>, vector<40x32xf32>, vector<8x32xf32> -> vector<8x32xf32>
    %87 = vector.broadcast %77 : vector<8x1xf32> to vector<8x32xf32>
    %88 = arith.addf %86, %87 : vector<8x32xf32>
    %c1_45 = arith.constant 1 : index
    %c0_46 = arith.constant 0 : index
    %c0_47 = arith.constant 0 : index
    %89 = vector.load %arg9[%c1_45, %c0_46, %c0_47] : memref<2x8x1xf32, #tpu.memory_space<vmem>>, vector<1x8x1xf32>
    %90 = vector.shape_cast %89 : vector<1x8x1xf32> to vector<8x1xf32>
    %cst_48 = arith.constant 0.000000e+00 : f32
    %91 = vector.broadcast %cst_48 : f32 to vector<8x32xf32>
    %92 = arith.cmpf oge, %88, %91 : vector<8x32xf32>
    %93 = vector.broadcast %90 : vector<8x1xf32> to vector<8x32xf32>
    %94 = arith.mulf %93, %88 : vector<8x32xf32>
    %95 = arith.select %92, %88, %94 : vector<8x32xi1>, vector<8x32xf32>
    %c1_49 = arith.constant 1 : index
    %c0_50 = arith.constant 0 : index
    %c0_51 = arith.constant 0 : index
    %96 = vector.load %arg7[%c1_49, %c0_50, %c0_51] : memref<2x8x40xf32, #tpu.memory_space<vmem>>, vector<1x8x40xf32>
    %97 = vector.shape_cast %96 : vector<1x8x40xf32> to vector<8x40xf32>
    %c1_52 = arith.constant 1 : index
    %c0_53 = arith.constant 0 : index
    %c0_54 = arith.constant 0 : index
    %98 = vector.load %arg8[%c1_52, %c0_53, %c0_54] : memref<2x8x1xf32, #tpu.memory_space<vmem>>, vector<1x8x1xf32>
    %99 = vector.shape_cast %98 : vector<1x8x1xf32> to vector<8x1xf32>
    %cst_55 = arith.constant 0.000000e+00 : f32
    %100 = vector.broadcast %cst_55 : f32 to vector<8x2xf32>
    %101 = tpu.concatenate %100, %95, %100 in 1 : vector<8x2xf32>, vector<8x32xf32>, vector<8x2xf32> -> vector<8x36xf32>
    %102 = vector.extract_strided_slice %101 {offsets = [0, 0], sizes = [8, 32], strides = [1, 1]} : vector<8x36xf32> to vector<8x32xf32>
    %103 = vector.extract_strided_slice %101 {offsets = [0, 1], sizes = [8, 32], strides = [1, 1]} : vector<8x36xf32> to vector<8x32xf32>
    %104 = vector.extract_strided_slice %101 {offsets = [0, 2], sizes = [8, 32], strides = [1, 1]} : vector<8x36xf32> to vector<8x32xf32>
    %105 = vector.extract_strided_slice %101 {offsets = [0, 3], sizes = [8, 32], strides = [1, 1]} : vector<8x36xf32> to vector<8x32xf32>
    %106 = vector.extract_strided_slice %101 {offsets = [0, 4], sizes = [8, 32], strides = [1, 1]} : vector<8x36xf32> to vector<8x32xf32>
    %107 = tpu.concatenate %102, %103, %104, %105, %106 in 0 : vector<8x32xf32>, vector<8x32xf32>, vector<8x32xf32>, vector<8x32xf32>, vector<8x32xf32> -> vector<40x32xf32>
    %cst_56 = arith.constant dense<0.000000e+00> : vector<8x32xf32>
    %108 = tpu.matmul %97, %107, %cst_56 {dimension_numbers = #tpu.dot_dimension_numbers<[1], [0], [0], [1], [0, 0, 1, 1], [], []>} : vector<8x40xf32>, vector<40x32xf32>, vector<8x32xf32> -> vector<8x32xf32>
    %109 = vector.broadcast %99 : vector<8x1xf32> to vector<8x32xf32>
    %110 = arith.addf %108, %109 : vector<8x32xf32>
    %111 = arith.addf %19, %110 : vector<8x32xf32>
    %112 = arith.addf %66, %111 : vector<8x32xf32>
    %cst_57 = arith.constant 5.000000e-01 : f32
    %113 = vector.broadcast %cst_57 : f32 to vector<8x32xf32>
    %114 = arith.mulf %112, %113 : vector<8x32xf32>
    %115 = arith.truncf %114 : vector<8x32xf32> to vector<8x32xbf16>
    %c0_58 = arith.constant 0 : index
    %c0_59 = arith.constant 0 : index
    %c0_60 = arith.constant 0 : index
    %116 = vector.load %arg10[%c0_58, %c0_59, %c0_60] : memref<1x8x32xbf16, #tpu.memory_space<vmem>>, vector<1x8x32xbf16>
    %117 = vector.shape_cast %116 : vector<1x8x32xbf16> to vector<8x32xbf16>
    %118 = vector.shape_cast %115 : vector<8x32xbf16> to vector<1x8x32xbf16>
    tpu.vector_store %arg10[%c0_58, %c0_59, %c0_60], %118 {strides = array<i32>} : memref<1x8x32xbf16, #tpu.memory_space<vmem>>, vector<1x8x32xbf16>,
    return
  }
  func.func @transform_0(%arg0: i32) -> (i32, i32, i32) {
    %c0_i32 = arith.constant 0 : i32
    %c0_i32_0 = arith.constant 0 : i32
    %c0_i32_1 = arith.constant 0 : i32
    return %arg0, %c0_i32, %c0_i32_0 : i32, i32, i32
  }
  func.func @transform_1(%arg0: i32) -> (i32, i32) {
    %c0_i32 = arith.constant 0 : i32
    %c0_i32_0 = arith.constant 0 : i32
    %c0_i32_1 = arith.constant 0 : i32
    return %c0_i32, %c0_i32_0 : i32, i32
  }
  func.func @transform_2(%arg0: i32) -> (i32, i32) {
    %c0_i32 = arith.constant 0 : i32
    %c0_i32_0 = arith.constant 0 : i32
    %c0_i32_1 = arith.constant 0 : i32
    return %c0_i32, %c0_i32_0 : i32, i32
  }
  func.func @transform_3(%arg0: i32) -> (i32, i32, i32) {
    %c0_i32 = arith.constant 0 : i32
    %c0_i32_0 = arith.constant 0 : i32
    %c0_i32_1 = arith.constant 0 : i32
    %c0_i32_2 = arith.constant 0 : i32
    return %c0_i32, %c0_i32_0, %c0_i32_1 : i32, i32, i32
  }
  func.func @transform_4(%arg0: i32) -> (i32, i32, i32) {
    %c0_i32 = arith.constant 0 : i32
    %c0_i32_0 = arith.constant 0 : i32
    %c0_i32_1 = arith.constant 0 : i32
    %c0_i32_2 = arith.constant 0 : i32
    return %c0_i32, %c0_i32_0, %c0_i32_1 : i32, i32, i32
  }
  func.func @transform_5(%arg0: i32) -> (i32, i32, i32) {
    %c0_i32 = arith.constant 0 : i32
    %c0_i32_0 = arith.constant 0 : i32
    %c0_i32_1 = arith.constant 0 : i32
    %c0_i32_2 = arith.constant 0 : i32
    return %c0_i32, %c0_i32_0, %c0_i32_1 : i32, i32, i32
  }
  func.func @transform_6(%arg0: i32) -> (i32, i32, i32) {
    %c0_i32 = arith.constant 0 : i32
    %c0_i32_0 = arith.constant 0 : i32
    %c0_i32_1 = arith.constant 0 : i32
    %c0_i32_2 = arith.constant 0 : i32
    return %c0_i32, %c0_i32_0, %c0_i32_1 : i32, i32, i32
  }
  func.func @transform_7(%arg0: i32) -> (i32, i32, i32) {
    %c0_i32 = arith.constant 0 : i32
    %c0_i32_0 = arith.constant 0 : i32
    %c0_i32_1 = arith.constant 0 : i32
    %c0_i32_2 = arith.constant 0 : i32
    return %c0_i32, %c0_i32_0, %c0_i32_1 : i32, i32, i32
  }
  func.func @transform_8(%arg0: i32) -> (i32, i32, i32) {
    %c0_i32 = arith.constant 0 : i32
    %c0_i32_0 = arith.constant 0 : i32
    %c0_i32_1 = arith.constant 0 : i32
    %c0_i32_2 = arith.constant 0 : i32
    return %c0_i32, %c0_i32_0, %c0_i32_1 : i32, i32, i32
  }
  func.func @transform_9(%arg0: i32) -> (i32, i32, i32) {
    %c0_i32 = arith.constant 0 : i32
    %c0_i32_0 = arith.constant 0 : i32
    %c0_i32_1 = arith.constant 0 : i32
    return %arg0, %c0_i32, %c0_i32_0 : i32, i32, i32
  }
}

module attributes {stable_mosaic.version = 11 : i64} {
  func.func @_mrf_stage_kernel(%arg0: i32, %arg1: memref<1x7x64xbf16, #tpu.memory_space<vmem>>, %arg2: memref<4x21xf32, #tpu.memory_space<vmem>>, %arg3: memref<4x1xf32, #tpu.memory_space<vmem>>, %arg4: memref<2x4x20xf32, #tpu.memory_space<vmem>>, %arg5: memref<2x4x1xf32, #tpu.memory_space<vmem>>, %arg6: memref<2x4x1xf32, #tpu.memory_space<vmem>>, %arg7: memref<2x4x20xf32, #tpu.memory_space<vmem>>, %arg8: memref<2x4x1xf32, #tpu.memory_space<vmem>>, %arg9: memref<2x4x1xf32, #tpu.memory_space<vmem>>, %arg10: memref<1x4x64xbf16, #tpu.memory_space<vmem>>) attributes {dimension_semantics = [#tpu.dimension_semantics<parallel>], iteration_bounds = array<i64: 2>, scalar_prefetch = 0 : i64, scratch_operands = 0 : i64, tpu.core_type = #tpu.core_type<tc>, window_params = [{transform_indices = @transform_0, window_bounds = array<i64: 1, 7, 64>}, {pipeline_mode = #tpu.pipeline_mode<synchronous>, transform_indices = @transform_1, window_bounds = array<i64: 4, 21>}, {pipeline_mode = #tpu.pipeline_mode<synchronous>, transform_indices = @transform_2, window_bounds = array<i64: 4, 1>}, {pipeline_mode = #tpu.pipeline_mode<synchronous>, transform_indices = @transform_3, window_bounds = array<i64: 2, 4, 20>}, {pipeline_mode = #tpu.pipeline_mode<synchronous>, transform_indices = @transform_4, window_bounds = array<i64: 2, 4, 1>}, {pipeline_mode = #tpu.pipeline_mode<synchronous>, transform_indices = @transform_5, window_bounds = array<i64: 2, 4, 1>}, {pipeline_mode = #tpu.pipeline_mode<synchronous>, transform_indices = @transform_6, window_bounds = array<i64: 2, 4, 20>}, {pipeline_mode = #tpu.pipeline_mode<synchronous>, transform_indices = @transform_7, window_bounds = array<i64: 2, 4, 1>}, {pipeline_mode = #tpu.pipeline_mode<synchronous>, transform_indices = @transform_8, window_bounds = array<i64: 2, 4, 1>}, {transform_indices = @transform_9, window_bounds = array<i64: 1, 4, 64>}]} {
    %c0 = arith.constant 0 : index
    %c0_0 = arith.constant 0 : index
    %c0_1 = arith.constant 0 : index
    %0 = vector.load %arg1[%c0, %c0_0, %c0_1] : memref<1x7x64xbf16, #tpu.memory_space<vmem>>, vector<1x7x64xbf16>
    %1 = vector.shape_cast %0 : vector<1x7x64xbf16> to vector<7x64xbf16>
    %2 = arith.extf %1 : vector<7x64xbf16> to vector<7x64xf32>
    %c0_2 = arith.constant 0 : index
    %c0_3 = arith.constant 0 : index
    %3 = vector.load %arg2[%c0_2, %c0_3] : memref<4x21xf32, #tpu.memory_space<vmem>>, vector<4x21xf32>
    %c0_4 = arith.constant 0 : index
    %c0_5 = arith.constant 0 : index
    %4 = vector.load %arg3[%c0_4, %c0_5] : memref<4x1xf32, #tpu.memory_space<vmem>>, vector<4x1xf32>
    %cst = arith.constant 0.000000e+00 : f32
    %5 = vector.broadcast %cst : f32 to vector<7x1xf32>
    %6 = tpu.concatenate %5, %2, %5 in 1 : vector<7x1xf32>, vector<7x64xf32>, vector<7x1xf32> -> vector<7x66xf32>
    %7 = vector.extract_strided_slice %6 {offsets = [0, 0], sizes = [7, 64], strides = [1, 1]} : vector<7x66xf32> to vector<7x64xf32>
    %8 = vector.extract_strided_slice %6 {offsets = [0, 1], sizes = [7, 64], strides = [1, 1]} : vector<7x66xf32> to vector<7x64xf32>
    %9 = vector.extract_strided_slice %6 {offsets = [0, 2], sizes = [7, 64], strides = [1, 1]} : vector<7x66xf32> to vector<7x64xf32>
    %10 = vector.extract_strided_slice %3 {offsets = [0, 0], sizes = [4, 7], strides = [1, 1]} : vector<4x21xf32> to vector<4x7xf32>
    %cst_6 = arith.constant dense<0.000000e+00> : vector<4x64xf32>
    %11 = tpu.matmul %10, %7, %cst_6 {dimension_numbers = #tpu.dot_dimension_numbers<[1], [0], [0], [1], [0, 0, 1, 1], [], []>} : vector<4x7xf32>, vector<7x64xf32>, vector<4x64xf32> -> vector<4x64xf32>
    %12 = vector.extract_strided_slice %3 {offsets = [0, 7], sizes = [4, 7], strides = [1, 1]} : vector<4x21xf32> to vector<4x7xf32>
    %cst_7 = arith.constant dense<0.000000e+00> : vector<4x64xf32>
    %13 = tpu.matmul %12, %8, %cst_7 {dimension_numbers = #tpu.dot_dimension_numbers<[1], [0], [0], [1], [0, 0, 1, 1], [], []>} : vector<4x7xf32>, vector<7x64xf32>, vector<4x64xf32> -> vector<4x64xf32>
    %14 = arith.addf %11, %13 : vector<4x64xf32>
    %15 = vector.extract_strided_slice %3 {offsets = [0, 14], sizes = [4, 7], strides = [1, 1]} : vector<4x21xf32> to vector<4x7xf32>
    %cst_8 = arith.constant dense<0.000000e+00> : vector<4x64xf32>
    %16 = tpu.matmul %15, %9, %cst_8 {dimension_numbers = #tpu.dot_dimension_numbers<[1], [0], [0], [1], [0, 0, 1, 1], [], []>} : vector<4x7xf32>, vector<7x64xf32>, vector<4x64xf32> -> vector<4x64xf32>
    %17 = arith.addf %14, %16 : vector<4x64xf32>
    %18 = vector.broadcast %4 : vector<4x1xf32> to vector<4x64xf32>
    %19 = arith.addf %17, %18 : vector<4x64xf32>
    %cst_9 = arith.constant 0.000000e+00 : f32
    %20 = vector.broadcast %cst_9 : f32 to vector<4x64xf32>
    %c0_10 = arith.constant 0 : index
    %c0_11 = arith.constant 0 : index
    %c0_12 = arith.constant 0 : index
    %21 = vector.load %arg6[%c0_10, %c0_11, %c0_12] : memref<2x4x1xf32, #tpu.memory_space<vmem>>, vector<1x4x1xf32>
    %22 = vector.shape_cast %21 : vector<1x4x1xf32> to vector<4x1xf32>
    %cst_13 = arith.constant 0.000000e+00 : f32
    %23 = vector.broadcast %cst_13 : f32 to vector<4x64xf32>
    %24 = arith.cmpf oge, %19, %23 : vector<4x64xf32>
    %25 = vector.broadcast %22 : vector<4x1xf32> to vector<4x64xf32>
    %26 = arith.mulf %25, %19 : vector<4x64xf32>
    %27 = arith.select %24, %19, %26 : vector<4x64xi1>, vector<4x64xf32>
    %c0_14 = arith.constant 0 : index
    %c0_15 = arith.constant 0 : index
    %c0_16 = arith.constant 0 : index
    %28 = vector.load %arg4[%c0_14, %c0_15, %c0_16] : memref<2x4x20xf32, #tpu.memory_space<vmem>>, vector<1x4x20xf32>
    %29 = vector.shape_cast %28 : vector<1x4x20xf32> to vector<4x20xf32>
    %c0_17 = arith.constant 0 : index
    %c0_18 = arith.constant 0 : index
    %c0_19 = arith.constant 0 : index
    %30 = vector.load %arg5[%c0_17, %c0_18, %c0_19] : memref<2x4x1xf32, #tpu.memory_space<vmem>>, vector<1x4x1xf32>
    %31 = vector.shape_cast %30 : vector<1x4x1xf32> to vector<4x1xf32>
    %cst_20 = arith.constant 0.000000e+00 : f32
    %32 = vector.broadcast %cst_20 : f32 to vector<4x2xf32>
    %33 = tpu.concatenate %32, %27, %32 in 1 : vector<4x2xf32>, vector<4x64xf32>, vector<4x2xf32> -> vector<4x68xf32>
    %34 = vector.extract_strided_slice %33 {offsets = [0, 0], sizes = [4, 64], strides = [1, 1]} : vector<4x68xf32> to vector<4x64xf32>
    %35 = vector.extract_strided_slice %33 {offsets = [0, 1], sizes = [4, 64], strides = [1, 1]} : vector<4x68xf32> to vector<4x64xf32>
    %36 = vector.extract_strided_slice %33 {offsets = [0, 2], sizes = [4, 64], strides = [1, 1]} : vector<4x68xf32> to vector<4x64xf32>
    %37 = vector.extract_strided_slice %33 {offsets = [0, 3], sizes = [4, 64], strides = [1, 1]} : vector<4x68xf32> to vector<4x64xf32>
    %38 = vector.extract_strided_slice %33 {offsets = [0, 4], sizes = [4, 64], strides = [1, 1]} : vector<4x68xf32> to vector<4x64xf32>
    %39 = vector.extract_strided_slice %29 {offsets = [0, 0], sizes = [4, 4], strides = [1, 1]} : vector<4x20xf32> to vector<4x4xf32>
    %cst_21 = arith.constant dense<0.000000e+00> : vector<4x64xf32>
    %40 = tpu.matmul %39, %34, %cst_21 {dimension_numbers = #tpu.dot_dimension_numbers<[1], [0], [0], [1], [0, 0, 1, 1], [], []>} : vector<4x4xf32>, vector<4x64xf32>, vector<4x64xf32> -> vector<4x64xf32>
    %41 = vector.extract_strided_slice %29 {offsets = [0, 4], sizes = [4, 4], strides = [1, 1]} : vector<4x20xf32> to vector<4x4xf32>
    %cst_22 = arith.constant dense<0.000000e+00> : vector<4x64xf32>
    %42 = tpu.matmul %41, %35, %cst_22 {dimension_numbers = #tpu.dot_dimension_numbers<[1], [0], [0], [1], [0, 0, 1, 1], [], []>} : vector<4x4xf32>, vector<4x64xf32>, vector<4x64xf32> -> vector<4x64xf32>
    %43 = arith.addf %40, %42 : vector<4x64xf32>
    %44 = vector.extract_strided_slice %29 {offsets = [0, 8], sizes = [4, 4], strides = [1, 1]} : vector<4x20xf32> to vector<4x4xf32>
    %cst_23 = arith.constant dense<0.000000e+00> : vector<4x64xf32>
    %45 = tpu.matmul %44, %36, %cst_23 {dimension_numbers = #tpu.dot_dimension_numbers<[1], [0], [0], [1], [0, 0, 1, 1], [], []>} : vector<4x4xf32>, vector<4x64xf32>, vector<4x64xf32> -> vector<4x64xf32>
    %46 = arith.addf %43, %45 : vector<4x64xf32>
    %47 = vector.extract_strided_slice %29 {offsets = [0, 12], sizes = [4, 4], strides = [1, 1]} : vector<4x20xf32> to vector<4x4xf32>
    %cst_24 = arith.constant dense<0.000000e+00> : vector<4x64xf32>
    %48 = tpu.matmul %47, %37, %cst_24 {dimension_numbers = #tpu.dot_dimension_numbers<[1], [0], [0], [1], [0, 0, 1, 1], [], []>} : vector<4x4xf32>, vector<4x64xf32>, vector<4x64xf32> -> vector<4x64xf32>
    %49 = arith.addf %46, %48 : vector<4x64xf32>
    %50 = vector.extract_strided_slice %29 {offsets = [0, 16], sizes = [4, 4], strides = [1, 1]} : vector<4x20xf32> to vector<4x4xf32>
    %cst_25 = arith.constant dense<0.000000e+00> : vector<4x64xf32>
    %51 = tpu.matmul %50, %38, %cst_25 {dimension_numbers = #tpu.dot_dimension_numbers<[1], [0], [0], [1], [0, 0, 1, 1], [], []>} : vector<4x4xf32>, vector<4x64xf32>, vector<4x64xf32> -> vector<4x64xf32>
    %52 = arith.addf %49, %51 : vector<4x64xf32>
    %53 = vector.broadcast %31 : vector<4x1xf32> to vector<4x64xf32>
    %54 = arith.addf %52, %53 : vector<4x64xf32>
    %c0_26 = arith.constant 0 : index
    %c0_27 = arith.constant 0 : index
    %c0_28 = arith.constant 0 : index
    %55 = vector.load %arg9[%c0_26, %c0_27, %c0_28] : memref<2x4x1xf32, #tpu.memory_space<vmem>>, vector<1x4x1xf32>
    %56 = vector.shape_cast %55 : vector<1x4x1xf32> to vector<4x1xf32>
    %cst_29 = arith.constant 0.000000e+00 : f32
    %57 = vector.broadcast %cst_29 : f32 to vector<4x64xf32>
    %58 = arith.cmpf oge, %54, %57 : vector<4x64xf32>
    %59 = vector.broadcast %56 : vector<4x1xf32> to vector<4x64xf32>
    %60 = arith.mulf %59, %54 : vector<4x64xf32>
    %61 = arith.select %58, %54, %60 : vector<4x64xi1>, vector<4x64xf32>
    %c0_30 = arith.constant 0 : index
    %c0_31 = arith.constant 0 : index
    %c0_32 = arith.constant 0 : index
    %62 = vector.load %arg7[%c0_30, %c0_31, %c0_32] : memref<2x4x20xf32, #tpu.memory_space<vmem>>, vector<1x4x20xf32>
    %63 = vector.shape_cast %62 : vector<1x4x20xf32> to vector<4x20xf32>
    %c0_33 = arith.constant 0 : index
    %c0_34 = arith.constant 0 : index
    %c0_35 = arith.constant 0 : index
    %64 = vector.load %arg8[%c0_33, %c0_34, %c0_35] : memref<2x4x1xf32, #tpu.memory_space<vmem>>, vector<1x4x1xf32>
    %65 = vector.shape_cast %64 : vector<1x4x1xf32> to vector<4x1xf32>
    %cst_36 = arith.constant 0.000000e+00 : f32
    %66 = vector.broadcast %cst_36 : f32 to vector<4x2xf32>
    %67 = tpu.concatenate %66, %61, %66 in 1 : vector<4x2xf32>, vector<4x64xf32>, vector<4x2xf32> -> vector<4x68xf32>
    %68 = vector.extract_strided_slice %67 {offsets = [0, 0], sizes = [4, 64], strides = [1, 1]} : vector<4x68xf32> to vector<4x64xf32>
    %69 = vector.extract_strided_slice %67 {offsets = [0, 1], sizes = [4, 64], strides = [1, 1]} : vector<4x68xf32> to vector<4x64xf32>
    %70 = vector.extract_strided_slice %67 {offsets = [0, 2], sizes = [4, 64], strides = [1, 1]} : vector<4x68xf32> to vector<4x64xf32>
    %71 = vector.extract_strided_slice %67 {offsets = [0, 3], sizes = [4, 64], strides = [1, 1]} : vector<4x68xf32> to vector<4x64xf32>
    %72 = vector.extract_strided_slice %67 {offsets = [0, 4], sizes = [4, 64], strides = [1, 1]} : vector<4x68xf32> to vector<4x64xf32>
    %73 = vector.extract_strided_slice %63 {offsets = [0, 0], sizes = [4, 4], strides = [1, 1]} : vector<4x20xf32> to vector<4x4xf32>
    %cst_37 = arith.constant dense<0.000000e+00> : vector<4x64xf32>
    %74 = tpu.matmul %73, %68, %cst_37 {dimension_numbers = #tpu.dot_dimension_numbers<[1], [0], [0], [1], [0, 0, 1, 1], [], []>} : vector<4x4xf32>, vector<4x64xf32>, vector<4x64xf32> -> vector<4x64xf32>
    %75 = vector.extract_strided_slice %63 {offsets = [0, 4], sizes = [4, 4], strides = [1, 1]} : vector<4x20xf32> to vector<4x4xf32>
    %cst_38 = arith.constant dense<0.000000e+00> : vector<4x64xf32>
    %76 = tpu.matmul %75, %69, %cst_38 {dimension_numbers = #tpu.dot_dimension_numbers<[1], [0], [0], [1], [0, 0, 1, 1], [], []>} : vector<4x4xf32>, vector<4x64xf32>, vector<4x64xf32> -> vector<4x64xf32>
    %77 = arith.addf %74, %76 : vector<4x64xf32>
    %78 = vector.extract_strided_slice %63 {offsets = [0, 8], sizes = [4, 4], strides = [1, 1]} : vector<4x20xf32> to vector<4x4xf32>
    %cst_39 = arith.constant dense<0.000000e+00> : vector<4x64xf32>
    %79 = tpu.matmul %78, %70, %cst_39 {dimension_numbers = #tpu.dot_dimension_numbers<[1], [0], [0], [1], [0, 0, 1, 1], [], []>} : vector<4x4xf32>, vector<4x64xf32>, vector<4x64xf32> -> vector<4x64xf32>
    %80 = arith.addf %77, %79 : vector<4x64xf32>
    %81 = vector.extract_strided_slice %63 {offsets = [0, 12], sizes = [4, 4], strides = [1, 1]} : vector<4x20xf32> to vector<4x4xf32>
    %cst_40 = arith.constant dense<0.000000e+00> : vector<4x64xf32>
    %82 = tpu.matmul %81, %71, %cst_40 {dimension_numbers = #tpu.dot_dimension_numbers<[1], [0], [0], [1], [0, 0, 1, 1], [], []>} : vector<4x4xf32>, vector<4x64xf32>, vector<4x64xf32> -> vector<4x64xf32>
    %83 = arith.addf %80, %82 : vector<4x64xf32>
    %84 = vector.extract_strided_slice %63 {offsets = [0, 16], sizes = [4, 4], strides = [1, 1]} : vector<4x20xf32> to vector<4x4xf32>
    %cst_41 = arith.constant dense<0.000000e+00> : vector<4x64xf32>
    %85 = tpu.matmul %84, %72, %cst_41 {dimension_numbers = #tpu.dot_dimension_numbers<[1], [0], [0], [1], [0, 0, 1, 1], [], []>} : vector<4x4xf32>, vector<4x64xf32>, vector<4x64xf32> -> vector<4x64xf32>
    %86 = arith.addf %83, %85 : vector<4x64xf32>
    %87 = vector.broadcast %65 : vector<4x1xf32> to vector<4x64xf32>
    %88 = arith.addf %86, %87 : vector<4x64xf32>
    %89 = arith.addf %19, %88 : vector<4x64xf32>
    %90 = arith.addf %20, %89 : vector<4x64xf32>
    %c1 = arith.constant 1 : index
    %c0_42 = arith.constant 0 : index
    %c0_43 = arith.constant 0 : index
    %91 = vector.load %arg6[%c1, %c0_42, %c0_43] : memref<2x4x1xf32, #tpu.memory_space<vmem>>, vector<1x4x1xf32>
    %92 = vector.shape_cast %91 : vector<1x4x1xf32> to vector<4x1xf32>
    %cst_44 = arith.constant 0.000000e+00 : f32
    %93 = vector.broadcast %cst_44 : f32 to vector<4x64xf32>
    %94 = arith.cmpf oge, %19, %93 : vector<4x64xf32>
    %95 = vector.broadcast %92 : vector<4x1xf32> to vector<4x64xf32>
    %96 = arith.mulf %95, %19 : vector<4x64xf32>
    %97 = arith.select %94, %19, %96 : vector<4x64xi1>, vector<4x64xf32>
    %c1_45 = arith.constant 1 : index
    %c0_46 = arith.constant 0 : index
    %c0_47 = arith.constant 0 : index
    %98 = vector.load %arg4[%c1_45, %c0_46, %c0_47] : memref<2x4x20xf32, #tpu.memory_space<vmem>>, vector<1x4x20xf32>
    %99 = vector.shape_cast %98 : vector<1x4x20xf32> to vector<4x20xf32>
    %c1_48 = arith.constant 1 : index
    %c0_49 = arith.constant 0 : index
    %c0_50 = arith.constant 0 : index
    %100 = vector.load %arg5[%c1_48, %c0_49, %c0_50] : memref<2x4x1xf32, #tpu.memory_space<vmem>>, vector<1x4x1xf32>
    %101 = vector.shape_cast %100 : vector<1x4x1xf32> to vector<4x1xf32>
    %cst_51 = arith.constant 0.000000e+00 : f32
    %102 = vector.broadcast %cst_51 : f32 to vector<4x2xf32>
    %103 = tpu.concatenate %102, %97, %102 in 1 : vector<4x2xf32>, vector<4x64xf32>, vector<4x2xf32> -> vector<4x68xf32>
    %104 = vector.extract_strided_slice %103 {offsets = [0, 0], sizes = [4, 64], strides = [1, 1]} : vector<4x68xf32> to vector<4x64xf32>
    %105 = vector.extract_strided_slice %103 {offsets = [0, 1], sizes = [4, 64], strides = [1, 1]} : vector<4x68xf32> to vector<4x64xf32>
    %106 = vector.extract_strided_slice %103 {offsets = [0, 2], sizes = [4, 64], strides = [1, 1]} : vector<4x68xf32> to vector<4x64xf32>
    %107 = vector.extract_strided_slice %103 {offsets = [0, 3], sizes = [4, 64], strides = [1, 1]} : vector<4x68xf32> to vector<4x64xf32>
    %108 = vector.extract_strided_slice %103 {offsets = [0, 4], sizes = [4, 64], strides = [1, 1]} : vector<4x68xf32> to vector<4x64xf32>
    %109 = vector.extract_strided_slice %99 {offsets = [0, 0], sizes = [4, 4], strides = [1, 1]} : vector<4x20xf32> to vector<4x4xf32>
    %cst_52 = arith.constant dense<0.000000e+00> : vector<4x64xf32>
    %110 = tpu.matmul %109, %104, %cst_52 {dimension_numbers = #tpu.dot_dimension_numbers<[1], [0], [0], [1], [0, 0, 1, 1], [], []>} : vector<4x4xf32>, vector<4x64xf32>, vector<4x64xf32> -> vector<4x64xf32>
    %111 = vector.extract_strided_slice %99 {offsets = [0, 4], sizes = [4, 4], strides = [1, 1]} : vector<4x20xf32> to vector<4x4xf32>
    %cst_53 = arith.constant dense<0.000000e+00> : vector<4x64xf32>
    %112 = tpu.matmul %111, %105, %cst_53 {dimension_numbers = #tpu.dot_dimension_numbers<[1], [0], [0], [1], [0, 0, 1, 1], [], []>} : vector<4x4xf32>, vector<4x64xf32>, vector<4x64xf32> -> vector<4x64xf32>
    %113 = arith.addf %110, %112 : vector<4x64xf32>
    %114 = vector.extract_strided_slice %99 {offsets = [0, 8], sizes = [4, 4], strides = [1, 1]} : vector<4x20xf32> to vector<4x4xf32>
    %cst_54 = arith.constant dense<0.000000e+00> : vector<4x64xf32>
    %115 = tpu.matmul %114, %106, %cst_54 {dimension_numbers = #tpu.dot_dimension_numbers<[1], [0], [0], [1], [0, 0, 1, 1], [], []>} : vector<4x4xf32>, vector<4x64xf32>, vector<4x64xf32> -> vector<4x64xf32>
    %116 = arith.addf %113, %115 : vector<4x64xf32>
    %117 = vector.extract_strided_slice %99 {offsets = [0, 12], sizes = [4, 4], strides = [1, 1]} : vector<4x20xf32> to vector<4x4xf32>
    %cst_55 = arith.constant dense<0.000000e+00> : vector<4x64xf32>
    %118 = tpu.matmul %117, %107, %cst_55 {dimension_numbers = #tpu.dot_dimension_numbers<[1], [0], [0], [1], [0, 0, 1, 1], [], []>} : vector<4x4xf32>, vector<4x64xf32>, vector<4x64xf32> -> vector<4x64xf32>
    %119 = arith.addf %116, %118 : vector<4x64xf32>
    %120 = vector.extract_strided_slice %99 {offsets = [0, 16], sizes = [4, 4], strides = [1, 1]} : vector<4x20xf32> to vector<4x4xf32>
    %cst_56 = arith.constant dense<0.000000e+00> : vector<4x64xf32>
    %121 = tpu.matmul %120, %108, %cst_56 {dimension_numbers = #tpu.dot_dimension_numbers<[1], [0], [0], [1], [0, 0, 1, 1], [], []>} : vector<4x4xf32>, vector<4x64xf32>, vector<4x64xf32> -> vector<4x64xf32>
    %122 = arith.addf %119, %121 : vector<4x64xf32>
    %123 = vector.broadcast %101 : vector<4x1xf32> to vector<4x64xf32>
    %124 = arith.addf %122, %123 : vector<4x64xf32>
    %c1_57 = arith.constant 1 : index
    %c0_58 = arith.constant 0 : index
    %c0_59 = arith.constant 0 : index
    %125 = vector.load %arg9[%c1_57, %c0_58, %c0_59] : memref<2x4x1xf32, #tpu.memory_space<vmem>>, vector<1x4x1xf32>
    %126 = vector.shape_cast %125 : vector<1x4x1xf32> to vector<4x1xf32>
    %cst_60 = arith.constant 0.000000e+00 : f32
    %127 = vector.broadcast %cst_60 : f32 to vector<4x64xf32>
    %128 = arith.cmpf oge, %124, %127 : vector<4x64xf32>
    %129 = vector.broadcast %126 : vector<4x1xf32> to vector<4x64xf32>
    %130 = arith.mulf %129, %124 : vector<4x64xf32>
    %131 = arith.select %128, %124, %130 : vector<4x64xi1>, vector<4x64xf32>
    %c1_61 = arith.constant 1 : index
    %c0_62 = arith.constant 0 : index
    %c0_63 = arith.constant 0 : index
    %132 = vector.load %arg7[%c1_61, %c0_62, %c0_63] : memref<2x4x20xf32, #tpu.memory_space<vmem>>, vector<1x4x20xf32>
    %133 = vector.shape_cast %132 : vector<1x4x20xf32> to vector<4x20xf32>
    %c1_64 = arith.constant 1 : index
    %c0_65 = arith.constant 0 : index
    %c0_66 = arith.constant 0 : index
    %134 = vector.load %arg8[%c1_64, %c0_65, %c0_66] : memref<2x4x1xf32, #tpu.memory_space<vmem>>, vector<1x4x1xf32>
    %135 = vector.shape_cast %134 : vector<1x4x1xf32> to vector<4x1xf32>
    %cst_67 = arith.constant 0.000000e+00 : f32
    %136 = vector.broadcast %cst_67 : f32 to vector<4x2xf32>
    %137 = tpu.concatenate %136, %131, %136 in 1 : vector<4x2xf32>, vector<4x64xf32>, vector<4x2xf32> -> vector<4x68xf32>
    %138 = vector.extract_strided_slice %137 {offsets = [0, 0], sizes = [4, 64], strides = [1, 1]} : vector<4x68xf32> to vector<4x64xf32>
    %139 = vector.extract_strided_slice %137 {offsets = [0, 1], sizes = [4, 64], strides = [1, 1]} : vector<4x68xf32> to vector<4x64xf32>
    %140 = vector.extract_strided_slice %137 {offsets = [0, 2], sizes = [4, 64], strides = [1, 1]} : vector<4x68xf32> to vector<4x64xf32>
    %141 = vector.extract_strided_slice %137 {offsets = [0, 3], sizes = [4, 64], strides = [1, 1]} : vector<4x68xf32> to vector<4x64xf32>
    %142 = vector.extract_strided_slice %137 {offsets = [0, 4], sizes = [4, 64], strides = [1, 1]} : vector<4x68xf32> to vector<4x64xf32>
    %143 = vector.extract_strided_slice %133 {offsets = [0, 0], sizes = [4, 4], strides = [1, 1]} : vector<4x20xf32> to vector<4x4xf32>
    %cst_68 = arith.constant dense<0.000000e+00> : vector<4x64xf32>
    %144 = tpu.matmul %143, %138, %cst_68 {dimension_numbers = #tpu.dot_dimension_numbers<[1], [0], [0], [1], [0, 0, 1, 1], [], []>} : vector<4x4xf32>, vector<4x64xf32>, vector<4x64xf32> -> vector<4x64xf32>
    %145 = vector.extract_strided_slice %133 {offsets = [0, 4], sizes = [4, 4], strides = [1, 1]} : vector<4x20xf32> to vector<4x4xf32>
    %cst_69 = arith.constant dense<0.000000e+00> : vector<4x64xf32>
    %146 = tpu.matmul %145, %139, %cst_69 {dimension_numbers = #tpu.dot_dimension_numbers<[1], [0], [0], [1], [0, 0, 1, 1], [], []>} : vector<4x4xf32>, vector<4x64xf32>, vector<4x64xf32> -> vector<4x64xf32>
    %147 = arith.addf %144, %146 : vector<4x64xf32>
    %148 = vector.extract_strided_slice %133 {offsets = [0, 8], sizes = [4, 4], strides = [1, 1]} : vector<4x20xf32> to vector<4x4xf32>
    %cst_70 = arith.constant dense<0.000000e+00> : vector<4x64xf32>
    %149 = tpu.matmul %148, %140, %cst_70 {dimension_numbers = #tpu.dot_dimension_numbers<[1], [0], [0], [1], [0, 0, 1, 1], [], []>} : vector<4x4xf32>, vector<4x64xf32>, vector<4x64xf32> -> vector<4x64xf32>
    %150 = arith.addf %147, %149 : vector<4x64xf32>
    %151 = vector.extract_strided_slice %133 {offsets = [0, 12], sizes = [4, 4], strides = [1, 1]} : vector<4x20xf32> to vector<4x4xf32>
    %cst_71 = arith.constant dense<0.000000e+00> : vector<4x64xf32>
    %152 = tpu.matmul %151, %141, %cst_71 {dimension_numbers = #tpu.dot_dimension_numbers<[1], [0], [0], [1], [0, 0, 1, 1], [], []>} : vector<4x4xf32>, vector<4x64xf32>, vector<4x64xf32> -> vector<4x64xf32>
    %153 = arith.addf %150, %152 : vector<4x64xf32>
    %154 = vector.extract_strided_slice %133 {offsets = [0, 16], sizes = [4, 4], strides = [1, 1]} : vector<4x20xf32> to vector<4x4xf32>
    %cst_72 = arith.constant dense<0.000000e+00> : vector<4x64xf32>
    %155 = tpu.matmul %154, %142, %cst_72 {dimension_numbers = #tpu.dot_dimension_numbers<[1], [0], [0], [1], [0, 0, 1, 1], [], []>} : vector<4x4xf32>, vector<4x64xf32>, vector<4x64xf32> -> vector<4x64xf32>
    %156 = arith.addf %153, %155 : vector<4x64xf32>
    %157 = vector.broadcast %135 : vector<4x1xf32> to vector<4x64xf32>
    %158 = arith.addf %156, %157 : vector<4x64xf32>
    %159 = arith.addf %19, %158 : vector<4x64xf32>
    %160 = arith.addf %90, %159 : vector<4x64xf32>
    %cst_73 = arith.constant 5.000000e-01 : f32
    %161 = vector.broadcast %cst_73 : f32 to vector<4x64xf32>
    %162 = arith.mulf %160, %161 : vector<4x64xf32>
    %163 = arith.truncf %162 : vector<4x64xf32> to vector<4x64xbf16>
    %c0_74 = arith.constant 0 : index
    %c0_75 = arith.constant 0 : index
    %c0_76 = arith.constant 0 : index
    %164 = vector.load %arg10[%c0_74, %c0_75, %c0_76] : memref<1x4x64xbf16, #tpu.memory_space<vmem>>, vector<1x4x64xbf16>
    %165 = vector.shape_cast %164 : vector<1x4x64xbf16> to vector<4x64xbf16>
    %166 = vector.shape_cast %163 : vector<4x64xbf16> to vector<1x4x64xbf16>
    tpu.vector_store %arg10[%c0_74, %c0_75, %c0_76], %166 {strides = array<i32>} : memref<1x4x64xbf16, #tpu.memory_space<vmem>>, vector<1x4x64xbf16>,
    return
  }
  func.func @transform_0(%arg0: i32) -> (i32, i32, i32) {
    %c0_i32 = arith.constant 0 : i32
    %c0_i32_0 = arith.constant 0 : i32
    %c0_i32_1 = arith.constant 0 : i32
    return %arg0, %c0_i32, %c0_i32_0 : i32, i32, i32
  }
  func.func @transform_1(%arg0: i32) -> (i32, i32) {
    %c0_i32 = arith.constant 0 : i32
    %c0_i32_0 = arith.constant 0 : i32
    %c0_i32_1 = arith.constant 0 : i32
    return %c0_i32, %c0_i32_0 : i32, i32
  }
  func.func @transform_2(%arg0: i32) -> (i32, i32) {
    %c0_i32 = arith.constant 0 : i32
    %c0_i32_0 = arith.constant 0 : i32
    %c0_i32_1 = arith.constant 0 : i32
    return %c0_i32, %c0_i32_0 : i32, i32
  }
  func.func @transform_3(%arg0: i32) -> (i32, i32, i32) {
    %c0_i32 = arith.constant 0 : i32
    %c0_i32_0 = arith.constant 0 : i32
    %c0_i32_1 = arith.constant 0 : i32
    %c0_i32_2 = arith.constant 0 : i32
    return %c0_i32, %c0_i32_0, %c0_i32_1 : i32, i32, i32
  }
  func.func @transform_4(%arg0: i32) -> (i32, i32, i32) {
    %c0_i32 = arith.constant 0 : i32
    %c0_i32_0 = arith.constant 0 : i32
    %c0_i32_1 = arith.constant 0 : i32
    %c0_i32_2 = arith.constant 0 : i32
    return %c0_i32, %c0_i32_0, %c0_i32_1 : i32, i32, i32
  }
  func.func @transform_5(%arg0: i32) -> (i32, i32, i32) {
    %c0_i32 = arith.constant 0 : i32
    %c0_i32_0 = arith.constant 0 : i32
    %c0_i32_1 = arith.constant 0 : i32
    %c0_i32_2 = arith.constant 0 : i32
    return %c0_i32, %c0_i32_0, %c0_i32_1 : i32, i32, i32
  }
  func.func @transform_6(%arg0: i32) -> (i32, i32, i32) {
    %c0_i32 = arith.constant 0 : i32
    %c0_i32_0 = arith.constant 0 : i32
    %c0_i32_1 = arith.constant 0 : i32
    %c0_i32_2 = arith.constant 0 : i32
    return %c0_i32, %c0_i32_0, %c0_i32_1 : i32, i32, i32
  }
  func.func @transform_7(%arg0: i32) -> (i32, i32, i32) {
    %c0_i32 = arith.constant 0 : i32
    %c0_i32_0 = arith.constant 0 : i32
    %c0_i32_1 = arith.constant 0 : i32
    %c0_i32_2 = arith.constant 0 : i32
    return %c0_i32, %c0_i32_0, %c0_i32_1 : i32, i32, i32
  }
  func.func @transform_8(%arg0: i32) -> (i32, i32, i32) {
    %c0_i32 = arith.constant 0 : i32
    %c0_i32_0 = arith.constant 0 : i32
    %c0_i32_1 = arith.constant 0 : i32
    %c0_i32_2 = arith.constant 0 : i32
    return %c0_i32, %c0_i32_0, %c0_i32_1 : i32, i32, i32
  }
  func.func @transform_9(%arg0: i32) -> (i32, i32, i32) {
    %c0_i32 = arith.constant 0 : i32
    %c0_i32_0 = arith.constant 0 : i32
    %c0_i32_1 = arith.constant 0 : i32
    return %arg0, %c0_i32, %c0_i32_0 : i32, i32, i32
  }
}

module attributes {stable_mosaic.version = 11 : i64} {
  func.func @_convtranspose_kernel(%arg0: i32, %arg1: memref<1x4x64xbf16, #tpu.memory_space<vmem>>, %arg2: memref<2x2x8xf32, #tpu.memory_space<vmem>>, %arg3: memref<2x1xf32, #tpu.memory_space<vmem>>, %arg4: memref<4x1xf32, #tpu.memory_space<vmem>>, %arg5: memref<1x2x2x64xbf16, #tpu.memory_space<vmem>>) attributes {dimension_semantics = [#tpu.dimension_semantics<parallel>], iteration_bounds = array<i64: 2>, scalar_prefetch = 0 : i64, scratch_operands = 0 : i64, tpu.core_type = #tpu.core_type<tc>, window_params = [{transform_indices = @transform_0, window_bounds = array<i64: 1, 4, 64>}, {pipeline_mode = #tpu.pipeline_mode<synchronous>, transform_indices = @transform_1, window_bounds = array<i64: 2, 2, 8>}, {pipeline_mode = #tpu.pipeline_mode<synchronous>, transform_indices = @transform_2, window_bounds = array<i64: 2, 1>}, {pipeline_mode = #tpu.pipeline_mode<synchronous>, transform_indices = @transform_3, window_bounds = array<i64: 4, 1>}, {transform_indices = @transform_4, window_bounds = array<i64: 1, 2, 2, 64>}]} {
    %c0 = arith.constant 0 : index
    %c0_0 = arith.constant 0 : index
    %c0_1 = arith.constant 0 : index
    %0 = vector.load %arg1[%c0, %c0_0, %c0_1] : memref<1x4x64xbf16, #tpu.memory_space<vmem>>, vector<1x4x64xbf16>
    %1 = vector.shape_cast %0 : vector<1x4x64xbf16> to vector<4x64xbf16>
    %2 = arith.extf %1 : vector<4x64xbf16> to vector<4x64xf32>
    %c0_2 = arith.constant 0 : index
    %c0_3 = arith.constant 0 : index
    %3 = vector.load %arg4[%c0_2, %c0_3] : memref<4x1xf32, #tpu.memory_space<vmem>>, vector<4x1xf32>
    %cst = arith.constant 0.000000e+00 : f32
    %4 = vector.broadcast %cst : f32 to vector<4x64xf32>
    %5 = arith.cmpf oge, %2, %4 : vector<4x64xf32>
    %6 = vector.broadcast %3 : vector<4x1xf32> to vector<4x64xf32>
    %7 = arith.mulf %6, %2 : vector<4x64xf32>
    %8 = arith.select %5, %2, %7 : vector<4x64xi1>, vector<4x64xf32>
    %cst_4 = arith.constant 0.000000e+00 : f32
    %9 = vector.broadcast %cst_4 : f32 to vector<4x1xf32>
    %cst_5 = arith.constant 0.000000e+00 : f32
    %10 = vector.broadcast %cst_5 : f32 to vector<4x1xf32>
    %11 = tpu.concatenate %9, %8, %10 in 1 : vector<4x1xf32>, vector<4x64xf32>, vector<4x1xf32> -> vector<4x66xf32>
    %c0_6 = arith.constant 0 : index
    %c0_7 = arith.constant 0 : index
    %12 = vector.load %arg3[%c0_6, %c0_7] : memref<2x1xf32, #tpu.memory_space<vmem>>, vector<2x1xf32>
    %13 = vector.extract_strided_slice %11 {offsets = [0, 1], sizes = [4, 64], strides = [1, 1]} : vector<4x66xf32> to vector<4x64xf32>
    %14 = vector.extract_strided_slice %11 {offsets = [0, 0], sizes = [4, 64], strides = [1, 1]} : vector<4x66xf32> to vector<4x64xf32>
    %c0_8 = arith.constant 0 : index
    %c0_9 = arith.constant 0 : index
    %c0_10 = arith.constant 0 : index
    %15 = vector.load %arg2[%c0_8, %c0_9, %c0_10] : memref<2x2x8xf32, #tpu.memory_space<vmem>>, vector<1x2x8xf32>
    %16 = vector.shape_cast %15 : vector<1x2x8xf32> to vector<2x8xf32>
    %17 = vector.extract_strided_slice %16 {offsets = [0, 0], sizes = [2, 4], strides = [1, 1]} : vector<2x8xf32> to vector<2x4xf32>
    %cst_11 = arith.constant dense<0.000000e+00> : vector<2x64xf32>
    %18 = tpu.matmul %17, %13, %cst_11 {dimension_numbers = #tpu.dot_dimension_numbers<[1], [0], [0], [1], [0, 0, 1, 1], [], []>} : vector<2x4xf32>, vector<4x64xf32>, vector<2x64xf32> -> vector<2x64xf32>
    %19 = vector.extract_strided_slice %16 {offsets = [0, 4], sizes = [2, 4], strides = [1, 1]} : vector<2x8xf32> to vector<2x4xf32>
    %cst_12 = arith.constant dense<0.000000e+00> : vector<2x64xf32>
    %20 = tpu.matmul %19, %14, %cst_12 {dimension_numbers = #tpu.dot_dimension_numbers<[1], [0], [0], [1], [0, 0, 1, 1], [], []>} : vector<2x4xf32>, vector<4x64xf32>, vector<2x64xf32> -> vector<2x64xf32>
    %21 = arith.addf %18, %20 : vector<2x64xf32>
    %22 = vector.broadcast %12 : vector<2x1xf32> to vector<2x64xf32>
    %23 = arith.addf %21, %22 : vector<2x64xf32>
    %24 = arith.truncf %23 : vector<2x64xf32> to vector<2x64xbf16>
    %c0_13 = arith.constant 0 : index
    %c0_14 = arith.constant 0 : index
    %c0_15 = arith.constant 0 : index
    %c0_16 = arith.constant 0 : index
    %25 = vector.load %arg5[%c0_13, %c0_14, %c0_15, %c0_16] : memref<1x2x2x64xbf16, #tpu.memory_space<vmem>>, vector<1x1x2x64xbf16>
    %26 = vector.shape_cast %25 : vector<1x1x2x64xbf16> to vector<2x64xbf16>
    %27 = vector.shape_cast %24 : vector<2x64xbf16> to vector<1x1x2x64xbf16>
    tpu.vector_store %arg5[%c0_13, %c0_14, %c0_15, %c0_16], %27 {strides = array<i32>} : memref<1x2x2x64xbf16, #tpu.memory_space<vmem>>, vector<1x1x2x64xbf16>,
    %28 = vector.extract_strided_slice %11 {offsets = [0, 2], sizes = [4, 64], strides = [1, 1]} : vector<4x66xf32> to vector<4x64xf32>
    %29 = vector.extract_strided_slice %11 {offsets = [0, 1], sizes = [4, 64], strides = [1, 1]} : vector<4x66xf32> to vector<4x64xf32>
    %c1 = arith.constant 1 : index
    %c0_17 = arith.constant 0 : index
    %c0_18 = arith.constant 0 : index
    %30 = vector.load %arg2[%c1, %c0_17, %c0_18] : memref<2x2x8xf32, #tpu.memory_space<vmem>>, vector<1x2x8xf32>
    %31 = vector.shape_cast %30 : vector<1x2x8xf32> to vector<2x8xf32>
    %32 = vector.extract_strided_slice %31 {offsets = [0, 0], sizes = [2, 4], strides = [1, 1]} : vector<2x8xf32> to vector<2x4xf32>
    %cst_19 = arith.constant dense<0.000000e+00> : vector<2x64xf32>
    %33 = tpu.matmul %32, %28, %cst_19 {dimension_numbers = #tpu.dot_dimension_numbers<[1], [0], [0], [1], [0, 0, 1, 1], [], []>} : vector<2x4xf32>, vector<4x64xf32>, vector<2x64xf32> -> vector<2x64xf32>
    %34 = vector.extract_strided_slice %31 {offsets = [0, 4], sizes = [2, 4], strides = [1, 1]} : vector<2x8xf32> to vector<2x4xf32>
    %cst_20 = arith.constant dense<0.000000e+00> : vector<2x64xf32>
    %35 = tpu.matmul %34, %29, %cst_20 {dimension_numbers = #tpu.dot_dimension_numbers<[1], [0], [0], [1], [0, 0, 1, 1], [], []>} : vector<2x4xf32>, vector<4x64xf32>, vector<2x64xf32> -> vector<2x64xf32>
    %36 = arith.addf %33, %35 : vector<2x64xf32>
    %37 = vector.broadcast %12 : vector<2x1xf32> to vector<2x64xf32>
    %38 = arith.addf %36, %37 : vector<2x64xf32>
    %39 = arith.truncf %38 : vector<2x64xf32> to vector<2x64xbf16>
    %c0_21 = arith.constant 0 : index
    %c1_22 = arith.constant 1 : index
    %c0_23 = arith.constant 0 : index
    %c0_24 = arith.constant 0 : index
    %40 = vector.load %arg5[%c0_21, %c1_22, %c0_23, %c0_24] : memref<1x2x2x64xbf16, #tpu.memory_space<vmem>>, vector<1x1x2x64xbf16>
    %41 = vector.shape_cast %40 : vector<1x1x2x64xbf16> to vector<2x64xbf16>
    %42 = vector.shape_cast %39 : vector<2x64xbf16> to vector<1x1x2x64xbf16>
    tpu.vector_store %arg5[%c0_21, %c1_22, %c0_23, %c0_24], %42 {strides = array<i32>} : memref<1x2x2x64xbf16, #tpu.memory_space<vmem>>, vector<1x1x2x64xbf16>,
    return
  }
  func.func @transform_0(%arg0: i32) -> (i32, i32, i32) {
    %c0_i32 = arith.constant 0 : i32
    %c0_i32_0 = arith.constant 0 : i32
    %c0_i32_1 = arith.constant 0 : i32
    return %arg0, %c0_i32, %c0_i32_0 : i32, i32, i32
  }
  func.func @transform_1(%arg0: i32) -> (i32, i32, i32) {
    %c0_i32 = arith.constant 0 : i32
    %c0_i32_0 = arith.constant 0 : i32
    %c0_i32_1 = arith.constant 0 : i32
    %c0_i32_2 = arith.constant 0 : i32
    return %c0_i32, %c0_i32_0, %c0_i32_1 : i32, i32, i32
  }
  func.func @transform_2(%arg0: i32) -> (i32, i32) {
    %c0_i32 = arith.constant 0 : i32
    %c0_i32_0 = arith.constant 0 : i32
    %c0_i32_1 = arith.constant 0 : i32
    return %c0_i32, %c0_i32_0 : i32, i32
  }
  func.func @transform_3(%arg0: i32) -> (i32, i32) {
    %c0_i32 = arith.constant 0 : i32
    %c0_i32_0 = arith.constant 0 : i32
    %c0_i32_1 = arith.constant 0 : i32
    return %c0_i32, %c0_i32_0 : i32, i32
  }
  func.func @transform_4(%arg0: i32) -> (i32, i32, i32, i32) {
    %c0_i32 = arith.constant 0 : i32
    %c0_i32_0 = arith.constant 0 : i32
    %c0_i32_1 = arith.constant 0 : i32
    %c0_i32_2 = arith.constant 0 : i32
    return %arg0, %c0_i32, %c0_i32_0, %c0_i32_1 : i32, i32, i32, i32
  }
}

module attributes {stable_mosaic.version = 11 : i64} {
  func.func @_conv_kernel(%arg0: i32, %arg1: memref<1x2x128xbf16, #tpu.memory_space<vmem>>, %arg2: memref<1x14xf32, #tpu.memory_space<vmem>>, %arg3: memref<1x1xf32, #tpu.memory_space<vmem>>, %arg4: memref<2x1xf32, #tpu.memory_space<vmem>>, %arg5: memref<1x1x128xf32, #tpu.memory_space<vmem>>) attributes {dimension_semantics = [#tpu.dimension_semantics<parallel>], iteration_bounds = array<i64: 2>, scalar_prefetch = 0 : i64, scratch_operands = 0 : i64, tpu.core_type = #tpu.core_type<tc>, window_params = [{transform_indices = @transform_0, window_bounds = array<i64: 1, 2, 128>}, {pipeline_mode = #tpu.pipeline_mode<synchronous>, transform_indices = @transform_1, window_bounds = array<i64: 1, 14>}, {pipeline_mode = #tpu.pipeline_mode<synchronous>, transform_indices = @transform_2, window_bounds = array<i64: 1, 1>}, {pipeline_mode = #tpu.pipeline_mode<synchronous>, transform_indices = @transform_3, window_bounds = array<i64: 2, 1>}, {transform_indices = @transform_4, window_bounds = array<i64: 1, 1, 128>}]} {
    %c0 = arith.constant 0 : index
    %c0_0 = arith.constant 0 : index
    %c0_1 = arith.constant 0 : index
    %0 = vector.load %arg1[%c0, %c0_0, %c0_1] : memref<1x2x128xbf16, #tpu.memory_space<vmem>>, vector<1x2x128xbf16>
    %1 = vector.shape_cast %0 : vector<1x2x128xbf16> to vector<2x128xbf16>
    %2 = arith.extf %1 : vector<2x128xbf16> to vector<2x128xf32>
    %c0_2 = arith.constant 0 : index
    %c0_3 = arith.constant 0 : index
    %3 = vector.load %arg4[%c0_2, %c0_3] : memref<2x1xf32, #tpu.memory_space<vmem>>, vector<2x1xf32>
    %cst = arith.constant 0.000000e+00 : f32
    %4 = vector.broadcast %cst : f32 to vector<2x128xf32>
    %5 = arith.cmpf oge, %2, %4 : vector<2x128xf32>
    %6 = vector.broadcast %3 : vector<2x1xf32> to vector<2x128xf32>
    %7 = arith.mulf %6, %2 : vector<2x128xf32>
    %8 = arith.select %5, %2, %7 : vector<2x128xi1>, vector<2x128xf32>
    %c0_4 = arith.constant 0 : index
    %c0_5 = arith.constant 0 : index
    %9 = vector.load %arg2[%c0_4, %c0_5] : memref<1x14xf32, #tpu.memory_space<vmem>>, vector<1x14xf32>
    %c0_6 = arith.constant 0 : index
    %c0_7 = arith.constant 0 : index
    %10 = vector.load %arg3[%c0_6, %c0_7] : memref<1x1xf32, #tpu.memory_space<vmem>>, vector<1x1xf32>
    %cst_8 = arith.constant 0.000000e+00 : f32
    %11 = vector.broadcast %cst_8 : f32 to vector<2x3xf32>
    %12 = tpu.concatenate %11, %8, %11 in 1 : vector<2x3xf32>, vector<2x128xf32>, vector<2x3xf32> -> vector<2x134xf32>
    %13 = vector.extract_strided_slice %12 {offsets = [0, 0], sizes = [2, 128], strides = [1, 1]} : vector<2x134xf32> to vector<2x128xf32>
    %14 = vector.extract_strided_slice %12 {offsets = [0, 1], sizes = [2, 128], strides = [1, 1]} : vector<2x134xf32> to vector<2x128xf32>
    %15 = vector.extract_strided_slice %12 {offsets = [0, 2], sizes = [2, 128], strides = [1, 1]} : vector<2x134xf32> to vector<2x128xf32>
    %16 = vector.extract_strided_slice %12 {offsets = [0, 3], sizes = [2, 128], strides = [1, 1]} : vector<2x134xf32> to vector<2x128xf32>
    %17 = vector.extract_strided_slice %12 {offsets = [0, 4], sizes = [2, 128], strides = [1, 1]} : vector<2x134xf32> to vector<2x128xf32>
    %18 = vector.extract_strided_slice %12 {offsets = [0, 5], sizes = [2, 128], strides = [1, 1]} : vector<2x134xf32> to vector<2x128xf32>
    %19 = vector.extract_strided_slice %12 {offsets = [0, 6], sizes = [2, 128], strides = [1, 1]} : vector<2x134xf32> to vector<2x128xf32>
    %20 = vector.extract_strided_slice %9 {offsets = [0, 0], sizes = [1, 2], strides = [1, 1]} : vector<1x14xf32> to vector<1x2xf32>
    %cst_9 = arith.constant dense<0.000000e+00> : vector<1x128xf32>
    %21 = tpu.matmul %20, %13, %cst_9 {dimension_numbers = #tpu.dot_dimension_numbers<[1], [0], [0], [1], [0, 0, 1, 1], [], []>} : vector<1x2xf32>, vector<2x128xf32>, vector<1x128xf32> -> vector<1x128xf32>
    %22 = vector.extract_strided_slice %9 {offsets = [0, 2], sizes = [1, 2], strides = [1, 1]} : vector<1x14xf32> to vector<1x2xf32>
    %cst_10 = arith.constant dense<0.000000e+00> : vector<1x128xf32>
    %23 = tpu.matmul %22, %14, %cst_10 {dimension_numbers = #tpu.dot_dimension_numbers<[1], [0], [0], [1], [0, 0, 1, 1], [], []>} : vector<1x2xf32>, vector<2x128xf32>, vector<1x128xf32> -> vector<1x128xf32>
    %24 = arith.addf %21, %23 : vector<1x128xf32>
    %25 = vector.extract_strided_slice %9 {offsets = [0, 4], sizes = [1, 2], strides = [1, 1]} : vector<1x14xf32> to vector<1x2xf32>
    %cst_11 = arith.constant dense<0.000000e+00> : vector<1x128xf32>
    %26 = tpu.matmul %25, %15, %cst_11 {dimension_numbers = #tpu.dot_dimension_numbers<[1], [0], [0], [1], [0, 0, 1, 1], [], []>} : vector<1x2xf32>, vector<2x128xf32>, vector<1x128xf32> -> vector<1x128xf32>
    %27 = arith.addf %24, %26 : vector<1x128xf32>
    %28 = vector.extract_strided_slice %9 {offsets = [0, 6], sizes = [1, 2], strides = [1, 1]} : vector<1x14xf32> to vector<1x2xf32>
    %cst_12 = arith.constant dense<0.000000e+00> : vector<1x128xf32>
    %29 = tpu.matmul %28, %16, %cst_12 {dimension_numbers = #tpu.dot_dimension_numbers<[1], [0], [0], [1], [0, 0, 1, 1], [], []>} : vector<1x2xf32>, vector<2x128xf32>, vector<1x128xf32> -> vector<1x128xf32>
    %30 = arith.addf %27, %29 : vector<1x128xf32>
    %31 = vector.extract_strided_slice %9 {offsets = [0, 8], sizes = [1, 2], strides = [1, 1]} : vector<1x14xf32> to vector<1x2xf32>
    %cst_13 = arith.constant dense<0.000000e+00> : vector<1x128xf32>
    %32 = tpu.matmul %31, %17, %cst_13 {dimension_numbers = #tpu.dot_dimension_numbers<[1], [0], [0], [1], [0, 0, 1, 1], [], []>} : vector<1x2xf32>, vector<2x128xf32>, vector<1x128xf32> -> vector<1x128xf32>
    %33 = arith.addf %30, %32 : vector<1x128xf32>
    %34 = vector.extract_strided_slice %9 {offsets = [0, 10], sizes = [1, 2], strides = [1, 1]} : vector<1x14xf32> to vector<1x2xf32>
    %cst_14 = arith.constant dense<0.000000e+00> : vector<1x128xf32>
    %35 = tpu.matmul %34, %18, %cst_14 {dimension_numbers = #tpu.dot_dimension_numbers<[1], [0], [0], [1], [0, 0, 1, 1], [], []>} : vector<1x2xf32>, vector<2x128xf32>, vector<1x128xf32> -> vector<1x128xf32>
    %36 = arith.addf %33, %35 : vector<1x128xf32>
    %37 = vector.extract_strided_slice %9 {offsets = [0, 12], sizes = [1, 2], strides = [1, 1]} : vector<1x14xf32> to vector<1x2xf32>
    %cst_15 = arith.constant dense<0.000000e+00> : vector<1x128xf32>
    %38 = tpu.matmul %37, %19, %cst_15 {dimension_numbers = #tpu.dot_dimension_numbers<[1], [0], [0], [1], [0, 0, 1, 1], [], []>} : vector<1x2xf32>, vector<2x128xf32>, vector<1x128xf32> -> vector<1x128xf32>
    %39 = arith.addf %36, %38 : vector<1x128xf32>
    %40 = vector.broadcast %10 : vector<1x1xf32> to vector<1x128xf32>
    %41 = arith.addf %39, %40 : vector<1x128xf32>
    %42 = math.tanh %41 : vector<1x128xf32>
    %c0_16 = arith.constant 0 : index
    %c0_17 = arith.constant 0 : index
    %c0_18 = arith.constant 0 : index
    %43 = vector.load %arg5[%c0_16, %c0_17, %c0_18] : memref<1x1x128xf32, #tpu.memory_space<vmem>>, vector<1x1x128xf32>
    %44 = vector.shape_cast %43 : vector<1x1x128xf32> to vector<1x128xf32>
    %45 = vector.shape_cast %42 : vector<1x128xf32> to vector<1x1x128xf32>
    tpu.vector_store %arg5[%c0_16, %c0_17, %c0_18], %45 {strides = array<i32>} : memref<1x1x128xf32, #tpu.memory_space<vmem>>, vector<1x1x128xf32>,
    return
  }
  func.func @transform_0(%arg0: i32) -> (i32, i32, i32) {
    %c0_i32 = arith.constant 0 : i32
    %c0_i32_0 = arith.constant 0 : i32
    %c0_i32_1 = arith.constant 0 : i32
    return %arg0, %c0_i32, %c0_i32_0 : i32, i32, i32
  }
  func.func @transform_1(%arg0: i32) -> (i32, i32) {
    %c0_i32 = arith.constant 0 : i32
    %c0_i32_0 = arith.constant 0 : i32
    %c0_i32_1 = arith.constant 0 : i32
    return %c0_i32, %c0_i32_0 : i32, i32
  }
  func.func @transform_2(%arg0: i32) -> (i32, i32) {
    %c0_i32 = arith.constant 0 : i32
    %c0_i32_0 = arith.constant 0 : i32
    %c0_i32_1 = arith.constant 0 : i32
    return %c0_i32, %c0_i32_0 : i32, i32
  }
  func.func @transform_3(%arg0: i32) -> (i32, i32) {
    %c0_i32 = arith.constant 0 : i32
    %c0_i32_0 = arith.constant 0 : i32
    %c0_i32_1 = arith.constant 0 : i32
    return %c0_i32, %c0_i32_0 : i32, i32
  }
  func.func @transform_4(%arg0: i32) -> (i32, i32, i32) {
    %c0_i32 = arith.constant 0 : i32
    %c0_i32_0 = arith.constant 0 : i32
    %c0_i32_1 = arith.constant 0 : i32
    return %arg0, %c0_i32, %c0_i32_0 : i32, i32, i32
  }
}

module attributes {stable_mosaic.version = 11 : i64} {
  func.func @_mrf_stage_kernel(%arg0: i32, %arg1: memref<1x2x128xbf16, #tpu.memory_space<vmem>>, %arg2: memref<2x2x10xf32, #tpu.memory_space<vmem>>, %arg3: memref<2x2x1xf32, #tpu.memory_space<vmem>>, %arg4: memref<2x2x1xf32, #tpu.memory_space<vmem>>, %arg5: memref<2x2x10xf32, #tpu.memory_space<vmem>>, %arg6: memref<2x2x1xf32, #tpu.memory_space<vmem>>, %arg7: memref<2x2x1xf32, #tpu.memory_space<vmem>>, %arg8: memref<1x2x128xbf16, #tpu.memory_space<vmem>>) attributes {dimension_semantics = [#tpu.dimension_semantics<parallel>], iteration_bounds = array<i64: 2>, scalar_prefetch = 0 : i64, scratch_operands = 0 : i64, tpu.core_type = #tpu.core_type<tc>, window_params = [{transform_indices = @transform_0, window_bounds = array<i64: 1, 2, 128>}, {pipeline_mode = #tpu.pipeline_mode<synchronous>, transform_indices = @transform_1, window_bounds = array<i64: 2, 2, 10>}, {pipeline_mode = #tpu.pipeline_mode<synchronous>, transform_indices = @transform_2, window_bounds = array<i64: 2, 2, 1>}, {pipeline_mode = #tpu.pipeline_mode<synchronous>, transform_indices = @transform_3, window_bounds = array<i64: 2, 2, 1>}, {pipeline_mode = #tpu.pipeline_mode<synchronous>, transform_indices = @transform_4, window_bounds = array<i64: 2, 2, 10>}, {pipeline_mode = #tpu.pipeline_mode<synchronous>, transform_indices = @transform_5, window_bounds = array<i64: 2, 2, 1>}, {pipeline_mode = #tpu.pipeline_mode<synchronous>, transform_indices = @transform_6, window_bounds = array<i64: 2, 2, 1>}, {transform_indices = @transform_7, window_bounds = array<i64: 1, 2, 128>}]} {
    %c0 = arith.constant 0 : index
    %c0_0 = arith.constant 0 : index
    %c0_1 = arith.constant 0 : index
    %0 = vector.load %arg1[%c0, %c0_0, %c0_1] : memref<1x2x128xbf16, #tpu.memory_space<vmem>>, vector<1x2x128xbf16>
    %1 = vector.shape_cast %0 : vector<1x2x128xbf16> to vector<2x128xbf16>
    %2 = arith.extf %1 : vector<2x128xbf16> to vector<2x128xf32>
    %cst = arith.constant 0.000000e+00 : f32
    %3 = vector.broadcast %cst : f32 to vector<2x128xf32>
    %c0_2 = arith.constant 0 : index
    %c0_3 = arith.constant 0 : index
    %c0_4 = arith.constant 0 : index
    %4 = vector.load %arg4[%c0_2, %c0_3, %c0_4] : memref<2x2x1xf32, #tpu.memory_space<vmem>>, vector<1x2x1xf32>
    %5 = vector.shape_cast %4 : vector<1x2x1xf32> to vector<2x1xf32>
    %cst_5 = arith.constant 0.000000e+00 : f32
    %6 = vector.broadcast %cst_5 : f32 to vector<2x128xf32>
    %7 = arith.cmpf oge, %2, %6 : vector<2x128xf32>
    %8 = vector.broadcast %5 : vector<2x1xf32> to vector<2x128xf32>
    %9 = arith.mulf %8, %2 : vector<2x128xf32>
    %10 = arith.select %7, %2, %9 : vector<2x128xi1>, vector<2x128xf32>
    %c0_6 = arith.constant 0 : index
    %c0_7 = arith.constant 0 : index
    %c0_8 = arith.constant 0 : index
    %11 = vector.load %arg2[%c0_6, %c0_7, %c0_8] : memref<2x2x10xf32, #tpu.memory_space<vmem>>, vector<1x2x10xf32>
    %12 = vector.shape_cast %11 : vector<1x2x10xf32> to vector<2x10xf32>
    %c0_9 = arith.constant 0 : index
    %c0_10 = arith.constant 0 : index
    %c0_11 = arith.constant 0 : index
    %13 = vector.load %arg3[%c0_9, %c0_10, %c0_11] : memref<2x2x1xf32, #tpu.memory_space<vmem>>, vector<1x2x1xf32>
    %14 = vector.shape_cast %13 : vector<1x2x1xf32> to vector<2x1xf32>
    %cst_12 = arith.constant 0.000000e+00 : f32
    %15 = vector.broadcast %cst_12 : f32 to vector<2x2xf32>
    %16 = tpu.concatenate %15, %10, %15 in 1 : vector<2x2xf32>, vector<2x128xf32>, vector<2x2xf32> -> vector<2x132xf32>
    %17 = vector.extract_strided_slice %16 {offsets = [0, 0], sizes = [2, 128], strides = [1, 1]} : vector<2x132xf32> to vector<2x128xf32>
    %18 = vector.extract_strided_slice %16 {offsets = [0, 1], sizes = [2, 128], strides = [1, 1]} : vector<2x132xf32> to vector<2x128xf32>
    %19 = vector.extract_strided_slice %16 {offsets = [0, 2], sizes = [2, 128], strides = [1, 1]} : vector<2x132xf32> to vector<2x128xf32>
    %20 = vector.extract_strided_slice %16 {offsets = [0, 3], sizes = [2, 128], strides = [1, 1]} : vector<2x132xf32> to vector<2x128xf32>
    %21 = vector.extract_strided_slice %16 {offsets = [0, 4], sizes = [2, 128], strides = [1, 1]} : vector<2x132xf32> to vector<2x128xf32>
    %22 = vector.extract_strided_slice %12 {offsets = [0, 0], sizes = [2, 2], strides = [1, 1]} : vector<2x10xf32> to vector<2x2xf32>
    %cst_13 = arith.constant dense<0.000000e+00> : vector<2x128xf32>
    %23 = tpu.matmul %22, %17, %cst_13 {dimension_numbers = #tpu.dot_dimension_numbers<[1], [0], [0], [1], [0, 0, 1, 1], [], []>} : vector<2x2xf32>, vector<2x128xf32>, vector<2x128xf32> -> vector<2x128xf32>
    %24 = vector.extract_strided_slice %12 {offsets = [0, 2], sizes = [2, 2], strides = [1, 1]} : vector<2x10xf32> to vector<2x2xf32>
    %cst_14 = arith.constant dense<0.000000e+00> : vector<2x128xf32>
    %25 = tpu.matmul %24, %18, %cst_14 {dimension_numbers = #tpu.dot_dimension_numbers<[1], [0], [0], [1], [0, 0, 1, 1], [], []>} : vector<2x2xf32>, vector<2x128xf32>, vector<2x128xf32> -> vector<2x128xf32>
    %26 = arith.addf %23, %25 : vector<2x128xf32>
    %27 = vector.extract_strided_slice %12 {offsets = [0, 4], sizes = [2, 2], strides = [1, 1]} : vector<2x10xf32> to vector<2x2xf32>
    %cst_15 = arith.constant dense<0.000000e+00> : vector<2x128xf32>
    %28 = tpu.matmul %27, %19, %cst_15 {dimension_numbers = #tpu.dot_dimension_numbers<[1], [0], [0], [1], [0, 0, 1, 1], [], []>} : vector<2x2xf32>, vector<2x128xf32>, vector<2x128xf32> -> vector<2x128xf32>
    %29 = arith.addf %26, %28 : vector<2x128xf32>
    %30 = vector.extract_strided_slice %12 {offsets = [0, 6], sizes = [2, 2], strides = [1, 1]} : vector<2x10xf32> to vector<2x2xf32>
    %cst_16 = arith.constant dense<0.000000e+00> : vector<2x128xf32>
    %31 = tpu.matmul %30, %20, %cst_16 {dimension_numbers = #tpu.dot_dimension_numbers<[1], [0], [0], [1], [0, 0, 1, 1], [], []>} : vector<2x2xf32>, vector<2x128xf32>, vector<2x128xf32> -> vector<2x128xf32>
    %32 = arith.addf %29, %31 : vector<2x128xf32>
    %33 = vector.extract_strided_slice %12 {offsets = [0, 8], sizes = [2, 2], strides = [1, 1]} : vector<2x10xf32> to vector<2x2xf32>
    %cst_17 = arith.constant dense<0.000000e+00> : vector<2x128xf32>
    %34 = tpu.matmul %33, %21, %cst_17 {dimension_numbers = #tpu.dot_dimension_numbers<[1], [0], [0], [1], [0, 0, 1, 1], [], []>} : vector<2x2xf32>, vector<2x128xf32>, vector<2x128xf32> -> vector<2x128xf32>
    %35 = arith.addf %32, %34 : vector<2x128xf32>
    %36 = vector.broadcast %14 : vector<2x1xf32> to vector<2x128xf32>
    %37 = arith.addf %35, %36 : vector<2x128xf32>
    %c0_18 = arith.constant 0 : index
    %c0_19 = arith.constant 0 : index
    %c0_20 = arith.constant 0 : index
    %38 = vector.load %arg7[%c0_18, %c0_19, %c0_20] : memref<2x2x1xf32, #tpu.memory_space<vmem>>, vector<1x2x1xf32>
    %39 = vector.shape_cast %38 : vector<1x2x1xf32> to vector<2x1xf32>
    %cst_21 = arith.constant 0.000000e+00 : f32
    %40 = vector.broadcast %cst_21 : f32 to vector<2x128xf32>
    %41 = arith.cmpf oge, %37, %40 : vector<2x128xf32>
    %42 = vector.broadcast %39 : vector<2x1xf32> to vector<2x128xf32>
    %43 = arith.mulf %42, %37 : vector<2x128xf32>
    %44 = arith.select %41, %37, %43 : vector<2x128xi1>, vector<2x128xf32>
    %c0_22 = arith.constant 0 : index
    %c0_23 = arith.constant 0 : index
    %c0_24 = arith.constant 0 : index
    %45 = vector.load %arg5[%c0_22, %c0_23, %c0_24] : memref<2x2x10xf32, #tpu.memory_space<vmem>>, vector<1x2x10xf32>
    %46 = vector.shape_cast %45 : vector<1x2x10xf32> to vector<2x10xf32>
    %c0_25 = arith.constant 0 : index
    %c0_26 = arith.constant 0 : index
    %c0_27 = arith.constant 0 : index
    %47 = vector.load %arg6[%c0_25, %c0_26, %c0_27] : memref<2x2x1xf32, #tpu.memory_space<vmem>>, vector<1x2x1xf32>
    %48 = vector.shape_cast %47 : vector<1x2x1xf32> to vector<2x1xf32>
    %cst_28 = arith.constant 0.000000e+00 : f32
    %49 = vector.broadcast %cst_28 : f32 to vector<2x2xf32>
    %50 = tpu.concatenate %49, %44, %49 in 1 : vector<2x2xf32>, vector<2x128xf32>, vector<2x2xf32> -> vector<2x132xf32>
    %51 = vector.extract_strided_slice %50 {offsets = [0, 0], sizes = [2, 128], strides = [1, 1]} : vector<2x132xf32> to vector<2x128xf32>
    %52 = vector.extract_strided_slice %50 {offsets = [0, 1], sizes = [2, 128], strides = [1, 1]} : vector<2x132xf32> to vector<2x128xf32>
    %53 = vector.extract_strided_slice %50 {offsets = [0, 2], sizes = [2, 128], strides = [1, 1]} : vector<2x132xf32> to vector<2x128xf32>
    %54 = vector.extract_strided_slice %50 {offsets = [0, 3], sizes = [2, 128], strides = [1, 1]} : vector<2x132xf32> to vector<2x128xf32>
    %55 = vector.extract_strided_slice %50 {offsets = [0, 4], sizes = [2, 128], strides = [1, 1]} : vector<2x132xf32> to vector<2x128xf32>
    %56 = vector.extract_strided_slice %46 {offsets = [0, 0], sizes = [2, 2], strides = [1, 1]} : vector<2x10xf32> to vector<2x2xf32>
    %cst_29 = arith.constant dense<0.000000e+00> : vector<2x128xf32>
    %57 = tpu.matmul %56, %51, %cst_29 {dimension_numbers = #tpu.dot_dimension_numbers<[1], [0], [0], [1], [0, 0, 1, 1], [], []>} : vector<2x2xf32>, vector<2x128xf32>, vector<2x128xf32> -> vector<2x128xf32>
    %58 = vector.extract_strided_slice %46 {offsets = [0, 2], sizes = [2, 2], strides = [1, 1]} : vector<2x10xf32> to vector<2x2xf32>
    %cst_30 = arith.constant dense<0.000000e+00> : vector<2x128xf32>
    %59 = tpu.matmul %58, %52, %cst_30 {dimension_numbers = #tpu.dot_dimension_numbers<[1], [0], [0], [1], [0, 0, 1, 1], [], []>} : vector<2x2xf32>, vector<2x128xf32>, vector<2x128xf32> -> vector<2x128xf32>
    %60 = arith.addf %57, %59 : vector<2x128xf32>
    %61 = vector.extract_strided_slice %46 {offsets = [0, 4], sizes = [2, 2], strides = [1, 1]} : vector<2x10xf32> to vector<2x2xf32>
    %cst_31 = arith.constant dense<0.000000e+00> : vector<2x128xf32>
    %62 = tpu.matmul %61, %53, %cst_31 {dimension_numbers = #tpu.dot_dimension_numbers<[1], [0], [0], [1], [0, 0, 1, 1], [], []>} : vector<2x2xf32>, vector<2x128xf32>, vector<2x128xf32> -> vector<2x128xf32>
    %63 = arith.addf %60, %62 : vector<2x128xf32>
    %64 = vector.extract_strided_slice %46 {offsets = [0, 6], sizes = [2, 2], strides = [1, 1]} : vector<2x10xf32> to vector<2x2xf32>
    %cst_32 = arith.constant dense<0.000000e+00> : vector<2x128xf32>
    %65 = tpu.matmul %64, %54, %cst_32 {dimension_numbers = #tpu.dot_dimension_numbers<[1], [0], [0], [1], [0, 0, 1, 1], [], []>} : vector<2x2xf32>, vector<2x128xf32>, vector<2x128xf32> -> vector<2x128xf32>
    %66 = arith.addf %63, %65 : vector<2x128xf32>
    %67 = vector.extract_strided_slice %46 {offsets = [0, 8], sizes = [2, 2], strides = [1, 1]} : vector<2x10xf32> to vector<2x2xf32>
    %cst_33 = arith.constant dense<0.000000e+00> : vector<2x128xf32>
    %68 = tpu.matmul %67, %55, %cst_33 {dimension_numbers = #tpu.dot_dimension_numbers<[1], [0], [0], [1], [0, 0, 1, 1], [], []>} : vector<2x2xf32>, vector<2x128xf32>, vector<2x128xf32> -> vector<2x128xf32>
    %69 = arith.addf %66, %68 : vector<2x128xf32>
    %70 = vector.broadcast %48 : vector<2x1xf32> to vector<2x128xf32>
    %71 = arith.addf %69, %70 : vector<2x128xf32>
    %72 = arith.addf %2, %71 : vector<2x128xf32>
    %73 = arith.addf %3, %72 : vector<2x128xf32>
    %c1 = arith.constant 1 : index
    %c0_34 = arith.constant 0 : index
    %c0_35 = arith.constant 0 : index
    %74 = vector.load %arg4[%c1, %c0_34, %c0_35] : memref<2x2x1xf32, #tpu.memory_space<vmem>>, vector<1x2x1xf32>
    %75 = vector.shape_cast %74 : vector<1x2x1xf32> to vector<2x1xf32>
    %cst_36 = arith.constant 0.000000e+00 : f32
    %76 = vector.broadcast %cst_36 : f32 to vector<2x128xf32>
    %77 = arith.cmpf oge, %2, %76 : vector<2x128xf32>
    %78 = vector.broadcast %75 : vector<2x1xf32> to vector<2x128xf32>
    %79 = arith.mulf %78, %2 : vector<2x128xf32>
    %80 = arith.select %77, %2, %79 : vector<2x128xi1>, vector<2x128xf32>
    %c1_37 = arith.constant 1 : index
    %c0_38 = arith.constant 0 : index
    %c0_39 = arith.constant 0 : index
    %81 = vector.load %arg2[%c1_37, %c0_38, %c0_39] : memref<2x2x10xf32, #tpu.memory_space<vmem>>, vector<1x2x10xf32>
    %82 = vector.shape_cast %81 : vector<1x2x10xf32> to vector<2x10xf32>
    %c1_40 = arith.constant 1 : index
    %c0_41 = arith.constant 0 : index
    %c0_42 = arith.constant 0 : index
    %83 = vector.load %arg3[%c1_40, %c0_41, %c0_42] : memref<2x2x1xf32, #tpu.memory_space<vmem>>, vector<1x2x1xf32>
    %84 = vector.shape_cast %83 : vector<1x2x1xf32> to vector<2x1xf32>
    %cst_43 = arith.constant 0.000000e+00 : f32
    %85 = vector.broadcast %cst_43 : f32 to vector<2x2xf32>
    %86 = tpu.concatenate %85, %80, %85 in 1 : vector<2x2xf32>, vector<2x128xf32>, vector<2x2xf32> -> vector<2x132xf32>
    %87 = vector.extract_strided_slice %86 {offsets = [0, 0], sizes = [2, 128], strides = [1, 1]} : vector<2x132xf32> to vector<2x128xf32>
    %88 = vector.extract_strided_slice %86 {offsets = [0, 1], sizes = [2, 128], strides = [1, 1]} : vector<2x132xf32> to vector<2x128xf32>
    %89 = vector.extract_strided_slice %86 {offsets = [0, 2], sizes = [2, 128], strides = [1, 1]} : vector<2x132xf32> to vector<2x128xf32>
    %90 = vector.extract_strided_slice %86 {offsets = [0, 3], sizes = [2, 128], strides = [1, 1]} : vector<2x132xf32> to vector<2x128xf32>
    %91 = vector.extract_strided_slice %86 {offsets = [0, 4], sizes = [2, 128], strides = [1, 1]} : vector<2x132xf32> to vector<2x128xf32>
    %92 = vector.extract_strided_slice %82 {offsets = [0, 0], sizes = [2, 2], strides = [1, 1]} : vector<2x10xf32> to vector<2x2xf32>
    %cst_44 = arith.constant dense<0.000000e+00> : vector<2x128xf32>
    %93 = tpu.matmul %92, %87, %cst_44 {dimension_numbers = #tpu.dot_dimension_numbers<[1], [0], [0], [1], [0, 0, 1, 1], [], []>} : vector<2x2xf32>, vector<2x128xf32>, vector<2x128xf32> -> vector<2x128xf32>
    %94 = vector.extract_strided_slice %82 {offsets = [0, 2], sizes = [2, 2], strides = [1, 1]} : vector<2x10xf32> to vector<2x2xf32>
    %cst_45 = arith.constant dense<0.000000e+00> : vector<2x128xf32>
    %95 = tpu.matmul %94, %88, %cst_45 {dimension_numbers = #tpu.dot_dimension_numbers<[1], [0], [0], [1], [0, 0, 1, 1], [], []>} : vector<2x2xf32>, vector<2x128xf32>, vector<2x128xf32> -> vector<2x128xf32>
    %96 = arith.addf %93, %95 : vector<2x128xf32>
    %97 = vector.extract_strided_slice %82 {offsets = [0, 4], sizes = [2, 2], strides = [1, 1]} : vector<2x10xf32> to vector<2x2xf32>
    %cst_46 = arith.constant dense<0.000000e+00> : vector<2x128xf32>
    %98 = tpu.matmul %97, %89, %cst_46 {dimension_numbers = #tpu.dot_dimension_numbers<[1], [0], [0], [1], [0, 0, 1, 1], [], []>} : vector<2x2xf32>, vector<2x128xf32>, vector<2x128xf32> -> vector<2x128xf32>
    %99 = arith.addf %96, %98 : vector<2x128xf32>
    %100 = vector.extract_strided_slice %82 {offsets = [0, 6], sizes = [2, 2], strides = [1, 1]} : vector<2x10xf32> to vector<2x2xf32>
    %cst_47 = arith.constant dense<0.000000e+00> : vector<2x128xf32>
    %101 = tpu.matmul %100, %90, %cst_47 {dimension_numbers = #tpu.dot_dimension_numbers<[1], [0], [0], [1], [0, 0, 1, 1], [], []>} : vector<2x2xf32>, vector<2x128xf32>, vector<2x128xf32> -> vector<2x128xf32>
    %102 = arith.addf %99, %101 : vector<2x128xf32>
    %103 = vector.extract_strided_slice %82 {offsets = [0, 8], sizes = [2, 2], strides = [1, 1]} : vector<2x10xf32> to vector<2x2xf32>
    %cst_48 = arith.constant dense<0.000000e+00> : vector<2x128xf32>
    %104 = tpu.matmul %103, %91, %cst_48 {dimension_numbers = #tpu.dot_dimension_numbers<[1], [0], [0], [1], [0, 0, 1, 1], [], []>} : vector<2x2xf32>, vector<2x128xf32>, vector<2x128xf32> -> vector<2x128xf32>
    %105 = arith.addf %102, %104 : vector<2x128xf32>
    %106 = vector.broadcast %84 : vector<2x1xf32> to vector<2x128xf32>
    %107 = arith.addf %105, %106 : vector<2x128xf32>
    %c1_49 = arith.constant 1 : index
    %c0_50 = arith.constant 0 : index
    %c0_51 = arith.constant 0 : index
    %108 = vector.load %arg7[%c1_49, %c0_50, %c0_51] : memref<2x2x1xf32, #tpu.memory_space<vmem>>, vector<1x2x1xf32>
    %109 = vector.shape_cast %108 : vector<1x2x1xf32> to vector<2x1xf32>
    %cst_52 = arith.constant 0.000000e+00 : f32
    %110 = vector.broadcast %cst_52 : f32 to vector<2x128xf32>
    %111 = arith.cmpf oge, %107, %110 : vector<2x128xf32>
    %112 = vector.broadcast %109 : vector<2x1xf32> to vector<2x128xf32>
    %113 = arith.mulf %112, %107 : vector<2x128xf32>
    %114 = arith.select %111, %107, %113 : vector<2x128xi1>, vector<2x128xf32>
    %c1_53 = arith.constant 1 : index
    %c0_54 = arith.constant 0 : index
    %c0_55 = arith.constant 0 : index
    %115 = vector.load %arg5[%c1_53, %c0_54, %c0_55] : memref<2x2x10xf32, #tpu.memory_space<vmem>>, vector<1x2x10xf32>
    %116 = vector.shape_cast %115 : vector<1x2x10xf32> to vector<2x10xf32>
    %c1_56 = arith.constant 1 : index
    %c0_57 = arith.constant 0 : index
    %c0_58 = arith.constant 0 : index
    %117 = vector.load %arg6[%c1_56, %c0_57, %c0_58] : memref<2x2x1xf32, #tpu.memory_space<vmem>>, vector<1x2x1xf32>
    %118 = vector.shape_cast %117 : vector<1x2x1xf32> to vector<2x1xf32>
    %cst_59 = arith.constant 0.000000e+00 : f32
    %119 = vector.broadcast %cst_59 : f32 to vector<2x2xf32>
    %120 = tpu.concatenate %119, %114, %119 in 1 : vector<2x2xf32>, vector<2x128xf32>, vector<2x2xf32> -> vector<2x132xf32>
    %121 = vector.extract_strided_slice %120 {offsets = [0, 0], sizes = [2, 128], strides = [1, 1]} : vector<2x132xf32> to vector<2x128xf32>
    %122 = vector.extract_strided_slice %120 {offsets = [0, 1], sizes = [2, 128], strides = [1, 1]} : vector<2x132xf32> to vector<2x128xf32>
    %123 = vector.extract_strided_slice %120 {offsets = [0, 2], sizes = [2, 128], strides = [1, 1]} : vector<2x132xf32> to vector<2x128xf32>
    %124 = vector.extract_strided_slice %120 {offsets = [0, 3], sizes = [2, 128], strides = [1, 1]} : vector<2x132xf32> to vector<2x128xf32>
    %125 = vector.extract_strided_slice %120 {offsets = [0, 4], sizes = [2, 128], strides = [1, 1]} : vector<2x132xf32> to vector<2x128xf32>
    %126 = vector.extract_strided_slice %116 {offsets = [0, 0], sizes = [2, 2], strides = [1, 1]} : vector<2x10xf32> to vector<2x2xf32>
    %cst_60 = arith.constant dense<0.000000e+00> : vector<2x128xf32>
    %127 = tpu.matmul %126, %121, %cst_60 {dimension_numbers = #tpu.dot_dimension_numbers<[1], [0], [0], [1], [0, 0, 1, 1], [], []>} : vector<2x2xf32>, vector<2x128xf32>, vector<2x128xf32> -> vector<2x128xf32>
    %128 = vector.extract_strided_slice %116 {offsets = [0, 2], sizes = [2, 2], strides = [1, 1]} : vector<2x10xf32> to vector<2x2xf32>
    %cst_61 = arith.constant dense<0.000000e+00> : vector<2x128xf32>
    %129 = tpu.matmul %128, %122, %cst_61 {dimension_numbers = #tpu.dot_dimension_numbers<[1], [0], [0], [1], [0, 0, 1, 1], [], []>} : vector<2x2xf32>, vector<2x128xf32>, vector<2x128xf32> -> vector<2x128xf32>
    %130 = arith.addf %127, %129 : vector<2x128xf32>
    %131 = vector.extract_strided_slice %116 {offsets = [0, 4], sizes = [2, 2], strides = [1, 1]} : vector<2x10xf32> to vector<2x2xf32>
    %cst_62 = arith.constant dense<0.000000e+00> : vector<2x128xf32>
    %132 = tpu.matmul %131, %123, %cst_62 {dimension_numbers = #tpu.dot_dimension_numbers<[1], [0], [0], [1], [0, 0, 1, 1], [], []>} : vector<2x2xf32>, vector<2x128xf32>, vector<2x128xf32> -> vector<2x128xf32>
    %133 = arith.addf %130, %132 : vector<2x128xf32>
    %134 = vector.extract_strided_slice %116 {offsets = [0, 6], sizes = [2, 2], strides = [1, 1]} : vector<2x10xf32> to vector<2x2xf32>
    %cst_63 = arith.constant dense<0.000000e+00> : vector<2x128xf32>
    %135 = tpu.matmul %134, %124, %cst_63 {dimension_numbers = #tpu.dot_dimension_numbers<[1], [0], [0], [1], [0, 0, 1, 1], [], []>} : vector<2x2xf32>, vector<2x128xf32>, vector<2x128xf32> -> vector<2x128xf32>
    %136 = arith.addf %133, %135 : vector<2x128xf32>
    %137 = vector.extract_strided_slice %116 {offsets = [0, 8], sizes = [2, 2], strides = [1, 1]} : vector<2x10xf32> to vector<2x2xf32>
    %cst_64 = arith.constant dense<0.000000e+00> : vector<2x128xf32>
    %138 = tpu.matmul %137, %125, %cst_64 {dimension_numbers = #tpu.dot_dimension_numbers<[1], [0], [0], [1], [0, 0, 1, 1], [], []>} : vector<2x2xf32>, vector<2x128xf32>, vector<2x128xf32> -> vector<2x128xf32>
    %139 = arith.addf %136, %138 : vector<2x128xf32>
    %140 = vector.broadcast %118 : vector<2x1xf32> to vector<2x128xf32>
    %141 = arith.addf %139, %140 : vector<2x128xf32>
    %142 = arith.addf %2, %141 : vector<2x128xf32>
    %143 = arith.addf %73, %142 : vector<2x128xf32>
    %cst_65 = arith.constant 5.000000e-01 : f32
    %144 = vector.broadcast %cst_65 : f32 to vector<2x128xf32>
    %145 = arith.mulf %143, %144 : vector<2x128xf32>
    %146 = arith.truncf %145 : vector<2x128xf32> to vector<2x128xbf16>
    %c0_66 = arith.constant 0 : index
    %c0_67 = arith.constant 0 : index
    %c0_68 = arith.constant 0 : index
    %147 = vector.load %arg8[%c0_66, %c0_67, %c0_68] : memref<1x2x128xbf16, #tpu.memory_space<vmem>>, vector<1x2x128xbf16>
    %148 = vector.shape_cast %147 : vector<1x2x128xbf16> to vector<2x128xbf16>
    %149 = vector.shape_cast %146 : vector<2x128xbf16> to vector<1x2x128xbf16>
    tpu.vector_store %arg8[%c0_66, %c0_67, %c0_68], %149 {strides = array<i32>} : memref<1x2x128xbf16, #tpu.memory_space<vmem>>, vector<1x2x128xbf16>,
    return
  }
  func.func @transform_0(%arg0: i32) -> (i32, i32, i32) {
    %c0_i32 = arith.constant 0 : i32
    %c0_i32_0 = arith.constant 0 : i32
    %c0_i32_1 = arith.constant 0 : i32
    return %arg0, %c0_i32, %c0_i32_0 : i32, i32, i32
  }
  func.func @transform_1(%arg0: i32) -> (i32, i32, i32) {
    %c0_i32 = arith.constant 0 : i32
    %c0_i32_0 = arith.constant 0 : i32
    %c0_i32_1 = arith.constant 0 : i32
    %c0_i32_2 = arith.constant 0 : i32
    return %c0_i32, %c0_i32_0, %c0_i32_1 : i32, i32, i32
  }
  func.func @transform_2(%arg0: i32) -> (i32, i32, i32) {
    %c0_i32 = arith.constant 0 : i32
    %c0_i32_0 = arith.constant 0 : i32
    %c0_i32_1 = arith.constant 0 : i32
    %c0_i32_2 = arith.constant 0 : i32
    return %c0_i32, %c0_i32_0, %c0_i32_1 : i32, i32, i32
  }
  func.func @transform_3(%arg0: i32) -> (i32, i32, i32) {
    %c0_i32 = arith.constant 0 : i32
    %c0_i32_0 = arith.constant 0 : i32
    %c0_i32_1 = arith.constant 0 : i32
    %c0_i32_2 = arith.constant 0 : i32
    return %c0_i32, %c0_i32_0, %c0_i32_1 : i32, i32, i32
  }
  func.func @transform_4(%arg0: i32) -> (i32, i32, i32) {
    %c0_i32 = arith.constant 0 : i32
    %c0_i32_0 = arith.constant 0 : i32
    %c0_i32_1 = arith.constant 0 : i32
    %c0_i32_2 = arith.constant 0 : i32
    return %c0_i32, %c0_i32_0, %c0_i32_1 : i32, i32, i32
  }
  func.func @transform_5(%arg0: i32) -> (i32, i32, i32) {
    %c0_i32 = arith.constant 0 : i32
    %c0_i32_0 = arith.constant 0 : i32
    %c0_i32_1 = arith.constant 0 : i32
    %c0_i32_2 = arith.constant 0 : i32
    return %c0_i32, %c0_i32_0, %c0_i32_1 : i32, i32, i32
  }
  func.func @transform_6(%arg0: i32) -> (i32, i32, i32) {
    %c0_i32 = arith.constant 0 : i32
    %c0_i32_0 = arith.constant 0 : i32
    %c0_i32_1 = arith.constant 0 : i32
    %c0_i32_2 = arith.constant 0 : i32
    return %c0_i32, %c0_i32_0, %c0_i32_1 : i32, i32, i32
  }
  func.func @transform_7(%arg0: i32) -> (i32, i32, i32) {
    %c0_i32 = arith.constant 0 : i32
    %c0_i32_0 = arith.constant 0 : i32
    %c0_i32_1 = arith.constant 0 : i32
    return %arg0, %c0_i32, %c0_i32_0 : i32, i32, i32
  }
}

</mosaic_0001>

<bundles_post_ra>
// kernel: forward.11
= control target key start
LH: loop header
LB: loop body
LE: loop exit
PB: predicated region body
PF: predicated region fallthrough
CT: control target
= control target key end

     0   :  { %s824_s15 = smov 0   ;;  %s890_s0 = inlined_call_operand.vmem [shape: bf16[2,32,8], index: 0, kind: input, shape index: {}]   ;;  %s891_s1 = inlined_call_operand.vmem [shape: f32[2,16,64], index: 1, kind: input, shape index: {}]   ;;  %s892_s2 = inlined_call_operand.vmem [shape: f32[16,1], index: 2, kind: input, shape index: {}]   ;;  %s893_s3 = inlined_call_operand.vmem [shape: f32[32,1], index: 3, kind: input, shape index: {}]   ;;  %s894_s4 = inlined_call_operand.vmem [shape: bf16[2,2,16,8], index: 4, kind: output, shape index: {}]  }
   0x1 LB: > { %s585_s16 = sadd.s32 4294967295, %s793_s15   ;;  %p589_p0 = scmp.ge.s32.totalorder %s793_s15, 1  ;;  %s793_s15 = sphi %s824_s15, %s14_s15  }
   0x2   : > { %p162_p1 = scmp.lt.s32.totalorder %s793_s15, 3 }
   0x4   : > { %p163_p2 = pnand %p589_p0, %p162_p1 }
   0x5   : > { %v208_v0 = vld [vmem:[%s893_s3 + $0x10] sm:$0xff] (!%p163_p2)  ;;  %v206_v1 = vld [vmem:[%s893_s3] sm:$0xff] (!%p163_p2)  ;;  %v795_v2 = vmov (!%p163_p2), 0   ;;  %v209_v3 = vld [vmem:[%s893_s3 + $0x18] sm:$0xff] (!%p163_p2)  ;;  %p188_p3 = scmp.lt.s32.totalorder (!%p163_p2), %s585_s16, 1  ;;  %s796_s29 = smov (!%p163_p2), 1  }
   0x6   : > { %166 = sbr.rel (%p163_p2) target bundleno = 725 (0x2d5), region = 36  ;;  %726 = vset.pattern.permute.xlu1 (!%p163_p2), %v795_v2  ;;  %725 = vset.pattern.permute.xlu0 (!%p163_p2), %v795_v2  ;;  %v207_v4 = vld [vmem:[%s893_s3 + $0x8] sm:$0xff] (!%p163_p2)  ;;  %vm258_vm4 = vcmask (!%p163_p2), 7168   ;;  %vm263_vm5 = vcmask (!%p163_p2), 72704   ;;  %s797_s30 = smov (!%p163_p2), 126   ;;  %v270_v43 = vld [vmem:[%s891_s1] sm:$0xff] (!%p163_p2) }
   0x7   : > { %226 = vperm.xlu1 (!%p163_p2), %726, %v208_v0   ;;  %216 = vperm.xlu0 (!%p163_p2), %725, %v206_v1   ;;  %s798_s5 = smov (!%p163_p2), 127   ;;  %vm318_vm6 = vcmask (!%p163_p2), 523264   ;;  %v598_v44 = vld [vmem:[%s891_s1 + $0x10] sm:$0xff] (!%p163_p2)  ;;  %v269_v61 = vld [vmem:[%s892_s2 + $0x8] sm:$0xff] (!%p163_p2)  ;;  %v268_v62 = vld [vmem:[%s892_s2] sm:$0xff] (!%p163_p2)  ;;  %vm408_vm7 = vcmask (!%p163_p2), 60416  }
   0x8   : > { %659 = vmatprep.mubr.msk.f32.mxu0 (!%p163_p2), %vm318_vm6, %v270_v43  ;;  %678 = vmatprep.mubr.msk.f32.mxu1 (!%p163_p2), %vm318_vm6, %v598_v44 }
   0xb   : > { %231 = vperm.xlu1 (!%p163_p2), %726, %v209_v3   ;;  %221 = vperm.xlu0 (!%p163_p2), %725, %v207_v4  }
   0xd   : > { %s896_s16 = smov (!%p188_p3, %s585_s16), 1 }
   0xe   : > { %s608_s25 = sshll.u32 %s896_s16, 4 }
   0xf   : > { %s192_s28 = scalar_lea.vmem %s890_s0, %s608_s25  ;;  %s197_s22 = scalar_lea.vmem %s894_s4, %s608_s25 }
  0x10   : > { %v622_v5 = vld [vmem:[%s192_s28 + $0x8] sm:$0xff]   ;;  %v615_v6 = vld [vmem:[%s192_s28] sm:$0xff]  }
  0x11   : > { %v620_v7 = vunpack.c.l.bf16 %v622_v5  ;;  %v616_v8 = vunpack.c.l.bf16 %v615_v6  ;;  %v621_v11 = vunpack.c.h.bf16 %v622_v5  ;;  %v617_v12 = vunpack.c.h.bf16 %v615_v6 }
  0x13   : > { %vm212_vm0 = vcmp.ge.f32.partialorder %v620_v7, 0.0  ;;  %vm213_vm1 = vcmp.ge.f32.partialorder %v621_v11, 0.0  ;;  %vm210_vm2 = vcmp.ge.f32.partialorder %v616_v8, 0.0  ;;  %vm211_vm3 = vcmp.ge.f32.partialorder %v617_v12, 0.0 }
  0x86   : > { %v227_v9 = vpop.permute.xlu1 %226  ;;  %v217_v10 = vpop.permute.xlu0 %216 }
  0x87   : > { %v236_v13 = vmul.f32 %v620_v7, %v227_v9  ;;  %v234_v14 = vmul.f32 %v616_v8, %v217_v10 }
  0x89   : > { %v240_v19 = vsel %vm212_vm0, %v620_v7, %v236_v13  ;;  %v238_v21 = vsel %vm210_vm2, %v616_v8, %v234_v14 }
  0x8a   : > { %v232_v15 = vpop.permute.xlu1 %231  ;;  %v222_v16 = vpop.permute.xlu0 %221 }
  0x8b   : > { %v237_v17 = vmul.f32 %v621_v11, %v232_v15  ;;  %v235_v18 = vmul.f32 %v617_v12, %v222_v16  ;;  %v271_v15 = vld [vmem:[%s891_s1 + $0x8] sm:$0xff]  ;;  %v599_v16 = vld [vmem:[%s891_s1 + $0x18] sm:$0xff] }
  0x8d   : > { %v241_v20 = vsel %vm213_vm1, %v621_v11, %v237_v17  ;;  %v239_v22 = vsel %vm211_vm3, %v617_v12, %v235_v18 }
  0x8e   : > { %v732_v23 = vpack.i.bf16 %v241_v20, %v240_v19  ;;  %v727_v24 = vpack.i.bf16 %v239_v22, %v238_v21 }
  0x90   : > { %733 = vrot.lane.b32.xlu1 %v732_v23, %s796_s29  ;;  %728 = vrot.lane.b32.xlu0 %v727_v24, %s796_s29 }
 0x102   : > { %v734_v25 = vpop.permute.xlu1 %733  ;;  %v729_v26 = vpop.permute.xlu0 %728 }
 0x103   : > { %v736_v27 = vunpack.i.h.bf16 %v734_v25  ;;  %v735_v28 = vunpack.i.l.bf16 %v734_v25  ;;  %v731_v29 = vunpack.i.h.bf16 %v729_v26  ;;  %v730_v30 = vunpack.i.l.bf16 %v729_v26 }
 0x105   : > { %v262_v31 = vsel %vm258_vm4, 0.0, %v736_v27  ;;  %v261_v32 = vsel %vm258_vm4, 0.0, %v735_v28  ;;  %v260_v33 = vsel %vm258_vm4, 0.0, %v731_v29  ;;  %v259_v34 = vsel %vm258_vm4, 0.0, %v730_v30 }
 0x106   : > { %v267_v35 = vsel %vm263_vm5, %v262_v31, 0.0  ;;  %v266_v36 = vsel %vm263_vm5, %v261_v32, 0.0  ;;  %v265_v37 = vsel %vm263_vm5, %v260_v33, 0.0  ;;  %v264_v38 = vsel %vm263_vm5, %v259_v34, 0.0 }
 0x107   : > { %v742_v39 = vpack.i.bf16 %v267_v35, %v266_v36  ;;  %v737_v40 = vpack.i.bf16 %v265_v37, %v264_v38 }
 0x109   : > { %743 = vrot.lane.b32.xlu1 %v742_v39, %s796_s29  ;;  %738 = vrot.lane.b32.xlu0 %v737_v40, %s796_s29 }
 0x10d   : > { %753 = vrot.lane.b32.xlu1 %v737_v40, %s797_s30  ;;  %748 = vrot.lane.b32.xlu0 %v737_v40, %s798_s5 }
 0x111   : > { %763 = vrot.lane.b32.xlu1 %v742_v39, %s797_s30  ;;  %758 = vrot.lane.b32.xlu0 %v742_v39, %s798_s5 }
 0x17b   : > { %v744_v41 = vpop.permute.xlu1 %743  ;;  %v739_v42 = vpop.permute.xlu0 %738 }
 0x17c   : > { %773 = vrot.lane.b32.xlu1 %v739_v42, %s797_s30  ;;  %768 = vrot.lane.b32.xlu0 %v739_v42, %s798_s5 }
 0x17f   : > { %v754_v45 = vpop.permute.xlu1 %753  ;;  %v749_v46 = vpop.permute.xlu0 %748 }
 0x180   : > { %v756_v47 = vunpack.i.h.bf16 %v754_v45  ;;  %v755_v48 = vunpack.i.l.bf16 %v754_v45  ;;  %v751_v49 = vunpack.i.h.bf16 %v749_v46  ;;  %v750_v50 = vunpack.i.l.bf16 %v749_v46  ;;  %783 = vrot.lane.b32.xlu1 %v744_v41, %s797_s30  ;;  %778 = vrot.lane.b32.xlu0 %v744_v41, %s798_s5 }
 0x182   : > { %v681_v51 = vpack.c.bf16 %v751_v49, %v750_v50  ;;  %v697_v52 = vpack.c.bf16 %v756_v47, %v755_v48 }
 0x183   : > { %v764_v53 = vpop.permute.xlu1 %763  ;;  %v759_v54 = vpop.permute.xlu0 %758 }
 0x184   : > { %v766_v55 = vunpack.i.h.bf16 %v764_v53  ;;  %v765_v56 = vunpack.i.l.bf16 %v764_v53  ;;  %v761_v57 = vunpack.i.h.bf16 %v759_v54  ;;  %v760_v58 = vunpack.i.l.bf16 %v759_v54  ;;  %682 = vmatprep.subr.bf16.mxu0 %v681_v51  ;;  %698 = vmatprep.subr.bf16.mxu1 %v697_v52 }
 0x185   : > { %684 = vmatpush3.bf16.msra.mxu0 %v681_v51  ;;  %700 = vmatpush3.bf16.msra.mxu1 %v697_v52 }
 0x186   : > { %v701_v59 = vpack.c.bf16 %v766_v55, %v765_v56  ;;  %v685_v60 = vpack.c.bf16 %v761_v57, %v760_v58  ;;  %291 = vperm.xlu1 %726, %v269_v61   ;;  %286 = vperm.xlu0 %725, %v268_v62  }
 0x188   : > { %686 = vmatprep.subr.bf16.mxu0 %v685_v60  ;;  %702 = vmatprep.subr.bf16.mxu1 %v701_v59 }
 0x189   : > { %688 = vmatpush3.bf16.msra.mxu0 %v685_v60  ;;  %704 = vmatpush3.bf16.msra.mxu1 %v701_v59 }
 0x1ee   : > { %v774_v63 = vpop.permute.xlu1 %773  ;;  %v769_v0 = vpop.permute.xlu0 %768 }
 0x1ef   : > { %v776_v1 = vunpack.i.h.bf16 %v774_v63  ;;  %v775_v2 = vunpack.i.l.bf16 %v774_v63  ;;  %v771_v3 = vunpack.i.h.bf16 %v769_v0  ;;  %v770_v4 = vunpack.i.l.bf16 %v769_v0 }
 0x1f1   : > { %v705_v5 = vpack.c.bf16 %v776_v1, %v775_v2  ;;  %v689_v6 = vpack.c.bf16 %v771_v3, %v770_v4 }
 0x1f2   : > { %v784_v7 = vpop.permute.xlu1 %783  ;;  %v779_v8 = vpop.permute.xlu0 %778 }
 0x1f3   : > { %690 = vmatprep.subr.bf16.mxu0 %v689_v6  ;;  %706 = vmatprep.subr.bf16.mxu1 %v705_v5  ;;  %v786_v9 = vunpack.i.h.bf16 %v784_v7  ;;  %v785_v10 = vunpack.i.l.bf16 %v784_v7  ;;  %v781_v11 = vunpack.i.h.bf16 %v779_v8  ;;  %v780_v12 = vunpack.i.l.bf16 %v779_v8 }
 0x1f4   : > { %692 = vmatpush3.bf16.msra.mxu0 %v689_v6  ;;  %708 = vmatpush3.bf16.msra.mxu1 %v705_v5 }
 0x1f5   : > { %v709_v13 = vpack.c.bf16 %v786_v9, %v785_v10  ;;  %v693_v14 = vpack.c.bf16 %v781_v11, %v780_v12 }
 0x1f7   : > { %694 = vmatprep.subr.bf16.mxu0 %v693_v14  ;;  %710 = vmatprep.subr.bf16.mxu1 %v709_v13 }
 0x1f8   : > { %696 = vmatpush3.bf16.msra.mxu0 %v693_v14  ;;  %712 = vmatpush3.bf16.msra.mxu1 %v709_v13 }
 0x1fb   : > { %660 = vmatmul.mubr.msk.f32.vlgmr.msra.gmra.mrb[0].mxu0 %vm318_vm6, %v271_v15  ;;  %679 = vmatmul.mubr.msk.f32.vlgmr.msra.gmra.mrb[0].mxu1 %vm318_vm6, %v599_v16 }
 0x205   : > { %v292_v17 = vpop.permute.xlu1 %291  ;;  %v287_v18 = vpop.permute.xlu0 %286 }
 0x2ce   : > { %v661_v19 = vpop.f32.mrb[0].mxu0  ;;  %v680_v20 = vpop.f32.mrb[0].mxu1 }
 0x2cf   : > { %v397_v21 = vadd.f32 %v661_v19, %v292_v17  ;;  %v516_v22 = vadd.f32 %v680_v20, %v292_v17  ;;  %v391_v23 = vpop.f32.mrb[1].mxu0  ;;  %v510_v24 = vpop.f32.mrb[1].mxu1 }
 0x2d0   : > { %v392_v25 = vadd.f32 %v391_v23, %v287_v18  ;;  %v511_v26 = vadd.f32 %v510_v24, %v287_v18 }
 0x2d1   : > { %v611_v27 = vpack.c.bf16 %v397_v21, %v397_v21  ;;  %v613_v28 = vpack.c.bf16 %v516_v22, %v516_v22 }
 0x2d2   : > { %v610_v29 = vpack.c.bf16 %v392_v25, %v392_v25  ;;  %v612_v30 = vpack.c.bf16 %v511_v26, %v511_v26 }
 0x2d3   : > { %410 = vst.msk [vmem:[%s197_s22 + $0x4] sm:$0xf] %vm408_vm7, %v611_v27  ;;  %605 = vst.msk [vmem:[%s197_s22 + $0xc] sm:$0xf] %vm408_vm7, %v613_v28 }
 0x2d4   : > { %409 = vst.msk [vmem:[%s197_s22] sm:$0xf] %vm408_vm7, %v610_v29  ;;  %604 = vst.msk [vmem:[%s197_s22 + $0x8] sm:$0xf] %vm408_vm7, %v612_v30 }
 0x2d5 PF: > { %s14_s15 = sadd.s32 1, %s793_s15  }
 0x2d6   : > { %p11_p4 = scmp.ge.s32.totalorder %s14_s15, 4  }
 0x2d8   :  { %13 = sbr.rel (!%p11_p4) target bundleno = 1 (0x1), region = 68 }

// kernel: forward.14
= control target key start
LH: loop header
LB: loop body
LE: loop exit
PB: predicated region body
PF: predicated region fallthrough
CT: control target
= control target key end

     0   :  { %s1427_s24 = smov 0   ;;  %s1611_s0 = inlined_call_operand.vmem [shape: bf16[2,16,16], index: 0, kind: input, shape index: {}]   ;;  %s1612_s1 = inlined_call_operand.vmem [shape: f32[2,16,80], index: 1, kind: input, shape index: {}]   ;;  %s1613_s2 = inlined_call_operand.vmem [shape: f32[2,16,1], index: 2, kind: input, shape index: {}]   ;;  %s1614_s3 = inlined_call_operand.vmem [shape: f32[2,16,1], index: 3, kind: input, shape index: {}]   ;;  %s1615_s4 = inlined_call_operand.vmem [shape: f32[2,16,80], index: 4, kind: input, shape index: {}]   ;;  %s1616_s5 = inlined_call_operand.vmem [shape: f32[2,16,1], index: 5, kind: input, shape index: {}]   ;;  %s1617_s6 = inlined_call_operand.vmem [shape: f32[2,16,1], index: 6, kind: input, shape index: {}]   ;;  %s1618_s7 = inlined_call_operand.vmem [shape: bf16[2,16,16], index: 7, kind: output, shape index: {}]  }
   0x1 LB: > { %s970_s25 = sadd.s32 4294967295, %s1379_s24   ;;  %p974_p0 = scmp.ge.s32.totalorder %s1379_s24, 1  ;;  %s1379_s24 = sphi %s1427_s24, %s17_s24  }
   0x2   : > { %p237_p1 = scmp.lt.s32.totalorder %s1379_s24, 3 }
   0x4   : > { %p238_p2 = pnand %p974_p0, %p237_p1 }
   0x5   : > { %v283_v0 = vld [vmem:[%s1614_s3] sm:$0xff] (!%p238_p2)  ;;  %v987_v1 = vld [vmem:[%s1614_s3 + $0x10] sm:$0xff] (!%p238_p2)  ;;  %v1381_v2 = vmov (!%p238_p2), 0   ;;  %v284_v3 = vld [vmem:[%s1614_s3 + $0x8] sm:$0xff] (!%p238_p2)  ;;  %p269_p3 = scmp.lt.s32.totalorder (!%p238_p2), %s970_s25, 1  ;;  %s1382_s15 = smov (!%p238_p2), 2  }
   0x6   : > { %241 = sbr.rel (%p238_p2) target bundleno = 1118 (0x45e), region = 48  ;;  %1271 = vset.pattern.permute.xlu0 (!%p238_p2), %v1381_v2  ;;  %1272 = vset.pattern.permute.xlu1 (!%p238_p2), %v1381_v2  ;;  %v988_v4 = vld [vmem:[%s1614_s3 + $0x18] sm:$0xff] (!%p238_p2)  ;;  %vm313_vm2 = vcmask (!%p238_p2), 15360   ;;  %vm316_vm3 = vcmask (!%p238_p2), 146432   ;;  %s1383_s16 = smov (!%p238_p2), 126   ;;  %v301_v41 = vld [vmem:[%s1612_s1] sm:$0xff] (!%p238_p2) }
   0x7   : > { %289 = vperm.xlu0 (!%p238_p2), %1271, %v283_v0   ;;  %597 = vperm.xlu1 (!%p238_p2), %1272, %v987_v1   ;;  %vm1475_vm4 = vmpackc.low (!%p238_p2), %vm316_vm3, %vm316_vm3  ;;  %s1384_s17 = smov (!%p238_p2), 127   ;;  %s1385_s18 = smov (!%p238_p2), 124   ;;  %vm355_vm5 = vcmask (!%p238_p2), 654336   ;;  %v304_v42 = vld [vmem:[%s1613_s2 + $0x8] sm:$0xff] (!%p238_p2)  ;;  %v303_v43 = vld [vmem:[%s1613_s2] sm:$0xff] (!%p238_p2)  ;;  %vm912_vm10 = vcmask (!%p238_p2), 125952  }
   0x8   : > { %s1386_s19 = smov (!%p238_p2), 125   ;;  %1087 = vmatprep.mubr.msk.f32.mxu0 (!%p238_p2), %vm355_vm5, %v301_v41  ;;  %v438_v44 = vld [vmem:[%s1617_s6 + $0x8] sm:$0xff] (!%p238_p2)  ;;  %v437_v45 = vld [vmem:[%s1617_s6] sm:$0xff] (!%p238_p2)  ;;  %v992_v46 = vld [vmem:[%s1613_s2 + $0x18] sm:$0xff] (!%p238_p2) }
   0x9   : > { %v991_v47 = vld [vmem:[%s1613_s2 + $0x10] sm:$0xff] (!%p238_p2)  ;;  %v998_v48 = vld [vmem:[%s1617_s6 + $0x18] sm:$0xff] (!%p238_p2) }
   0xa   : > { %v997_v49 = vld [vmem:[%s1617_s6 + $0x10] sm:$0xff] (!%p238_p2)  ;;  %v1000_v30 = vld [vmem:[%s1615_s4 + $0x18] sm:$0xff] (!%p238_p2) }
   0xb   : > { %294 = vperm.xlu0 (!%p238_p2), %1271, %v284_v3   ;;  %602 = vperm.xlu1 (!%p238_p2), %1272, %v988_v4  }
   0xd   : > { %s1622_s25 = smov (!%p269_p3, %s970_s25), 1 }
   0xe   : > { %s1011_s11 = sshll.u32 %s1622_s25, 3 }
   0xf   : > { %s273_s14 = scalar_lea.vmem %s1611_s0, %s1011_s11  ;;  %s278_s29 = scalar_lea.vmem %s1618_s7, %s1011_s11 }
  0x10   : > { %v1016_v5 = vld [vmem:[%s273_s14] sm:$0xff]  }
  0x11   : > { %v1455_v6 = vunpack.c.l.bf16 %v1016_v5  ;;  %v1457_v8 = vunpack.c.h.bf16 %v1016_v5  ;;  %v302_v5 = vld [vmem:[%s1612_s1 + $0x8] sm:$0xff] }
  0x13   : > { %vm285_vm0 = vcmp.ge.f32.partialorder %v1455_v6, 0.0  ;;  %vm286_vm1 = vcmp.ge.f32.partialorder %v1457_v8, 0.0 }
  0x86   : > { %v290_v7 = vpop.permute.xlu0 %289  ;;  %v598_v9 = vpop.permute.xlu1 %597 }
  0x87   : > { %v605_v10 = vmul.f32 %v1455_v6, %v598_v9  ;;  %v297_v11 = vmul.f32 %v1455_v6, %v290_v7  ;;  %v989_v7 = vld [vmem:[%s1612_s1 + $0x10] sm:$0xff] }
  0x89   : > { %v607_v16 = vsel %vm285_vm0, %v1455_v6, %v605_v10  ;;  %v299_v17 = vsel %vm285_vm0, %v1455_v6, %v297_v11 }
  0x8a   : > { %v295_v12 = vpop.permute.xlu0 %294  ;;  %v603_v13 = vpop.permute.xlu1 %602 }
  0x8b   : > { %v298_v14 = vmul.f32 %v1457_v8, %v295_v12  ;;  %v606_v15 = vmul.f32 %v1457_v8, %v603_v13 }
  0x8d   : > { %v300_v18 = vsel %vm286_vm1, %v1457_v8, %v298_v14  ;;  %v608_v19 = vsel %vm286_vm1, %v1457_v8, %v606_v15 }
  0x8e   : > { %v1273_v20 = vpack.i.bf16 %v300_v18, %v299_v17  ;;  %v1278_v21 = vpack.i.bf16 %v608_v19, %v607_v16 }
  0x90   : > { %1274 = vrot.lane.b32.xlu0 %v1273_v20, %s1382_s15  ;;  %1279 = vrot.lane.b32.xlu1 %v1278_v21, %s1382_s15 }
 0x102   : > { %v1275_v22 = vpop.permute.xlu0 %1274  ;;  %v1280_v23 = vpop.permute.xlu1 %1279 }
 0x103   : > { %v1277_v24 = vunpack.i.h.bf16 %v1275_v22  ;;  %v1276_v25 = vunpack.i.l.bf16 %v1275_v22  ;;  %v1282_v26 = vunpack.i.h.bf16 %v1280_v23  ;;  %v1281_v27 = vunpack.i.l.bf16 %v1280_v23  ;;  %v990_v22 = vld [vmem:[%s1612_s1 + $0x18] sm:$0xff] }
 0x105   : > { %v314_v28 = vsel %vm313_vm2, 0.0, %v1276_v25  ;;  %v315_v29 = vsel %vm313_vm2, 0.0, %v1277_v24  ;;  %v624_v31 = vsel %vm313_vm2, 0.0, %v1282_v26  ;;  %v623_v35 = vsel %vm313_vm2, 0.0, %v1281_v27 }
 0x106   : > { %v317_v32 = vsel %vm316_vm3, %v314_v28, 0.0  ;;  %v318_v33 = vsel %vm316_vm3, %v315_v29, 0.0  ;;  %v1159_v34 = vpack.c.bf16 %v315_v29, %v314_v28  ;;  %v1483_v37 = vpack.c.bf16 %v624_v31, %v623_v35 }
 0x107   : > { %v1288_v36 = vpack.i.bf16 %v318_v33, %v317_v32  ;;  %v626_v38 = vsel %vm316_vm3, %v624_v31, 0.0  ;;  %v625_v39 = vsel %vm316_vm3, %v623_v35, 0.0 }
 0x108   : > { %1161 = vmatprep.subr.msk.bf16.mxu0 %vm1475_vm4, %v1159_v34  ;;  %v1308_v40 = vpack.i.bf16 %v626_v38, %v625_v39 }
 0x109   : > { %1164 = vmatpush3.bf16.msk.msra.mxu0 %vm1475_vm4, %v1159_v34  ;;  %1289 = vrot.lane.b32.xlu1 %v1288_v36, %s1383_s16 }
 0x10a   : > { %1284 = vrot.lane.b32.xlu0 %v1288_v36, %s1384_s17 }
 0x10d   : > { %1299 = vrot.lane.b32.xlu1 %v1288_v36, %s1385_s18 }
 0x10e   : > { %1294 = vrot.lane.b32.xlu0 %v1288_v36, %s1386_s19 }
 0x111   : > { %1309 = vrot.lane.b32.xlu1 %v1308_v40, %s1383_s16 }
 0x112   : > { %1304 = vrot.lane.b32.xlu0 %v1308_v40, %s1384_s17 }
 0x115   : > { %1319 = vrot.lane.b32.xlu1 %v1308_v40, %s1385_s18 }
 0x116   : > { %1314 = vrot.lane.b32.xlu0 %v1308_v40, %s1386_s19 }
 0x119   : > { %352 = vperm.xlu1 %1272, %v304_v42  }
 0x11a   : > { %347 = vperm.xlu0 %1271, %v303_v43  }
 0x11d   : > { %448 = vperm.xlu1 %1272, %v438_v44  }
 0x11e   : > { %443 = vperm.xlu0 %1271, %v437_v45  }
 0x121   : > { %660 = vperm.xlu1 %1272, %v992_v46  }
 0x122   : > { %655 = vperm.xlu0 %1271, %v991_v47  }
 0x125   : > { %756 = vperm.xlu1 %1272, %v998_v48  }
 0x126   : > { %751 = vperm.xlu0 %1271, %v997_v49  }
 0x17b   : > { %v1290_v50 = vpop.permute.xlu1 %1289 }
 0x17c   : > { %v1285_v51 = vpop.permute.xlu0 %1284  ;;  %v1292_v52 = vunpack.i.h.bf16 %v1290_v50  ;;  %v1291_v53 = vunpack.i.l.bf16 %v1290_v50 }
 0x17d   : > { %v1287_v54 = vunpack.i.h.bf16 %v1285_v51  ;;  %v1286_v55 = vunpack.i.l.bf16 %v1285_v51 }
 0x17e   : > { %v1169_v58 = vpack.c.bf16 %v1292_v52, %v1291_v53 }
 0x17f   : > { %v1165_v56 = vpack.c.bf16 %v1287_v54, %v1286_v55  ;;  %v1300_v61 = vpop.permute.xlu1 %1299 }
 0x180   : > { %v1295_v57 = vpop.permute.xlu0 %1294  ;;  %v1302_v62 = vunpack.i.h.bf16 %v1300_v61  ;;  %v1301_v63 = vunpack.i.l.bf16 %v1300_v61 }
 0x181   : > { %v1297_v59 = vunpack.i.h.bf16 %v1295_v57  ;;  %v1296_v60 = vunpack.i.l.bf16 %v1295_v57  ;;  %1166 = vmatprep.subr.bf16.mxu0 %v1165_v56 }
 0x182   : > { %1168 = vmatpush3.bf16.msra.mxu0 %v1165_v56  ;;  %v1177_v1 = vpack.c.bf16 %v1302_v62, %v1301_v63 }
 0x183   : > { %1170 = vmatprep.subr.bf16.mxu0 %v1169_v58  ;;  %v1173_v0 = vpack.c.bf16 %v1297_v59, %v1296_v60  ;;  %v1310_v9 = vpop.permute.xlu1 %1309  ;;  %v455_v59 = vld [vmem:[%s1615_s4] sm:$0xff] }
 0x184   : > { %v1305_v2 = vpop.permute.xlu0 %1304  ;;  %v1312_v10 = vunpack.i.h.bf16 %v1310_v9  ;;  %v1311_v11 = vunpack.i.l.bf16 %v1310_v9  ;;  %1110 = vmatprep.mubr.msk.f32.mxu1 %vm355_vm5, %v455_v59  ;;  %v1002_v9 = vld [vmem:[%s1616_s5 + $0x18] sm:$0xff] }
 0x185   : > { %v1307_v3 = vunpack.i.h.bf16 %v1305_v2  ;;  %v1306_v4 = vunpack.i.l.bf16 %v1305_v2 }
 0x186   : > { %1172 = vmatpush3.bf16.msra.mxu0 %v1169_v58  ;;  %v1213_v14 = vpack.c.bf16 %v1312_v10, %v1311_v11  ;;  %v1001_v10 = vld [vmem:[%s1616_s5 + $0x10] sm:$0xff] }
 0x187   : > { %1174 = vmatprep.subr.bf16.mxu0 %v1173_v0  ;;  %v1209_v12 = vpack.c.bf16 %v1307_v3, %v1306_v4  ;;  %v1320_v17 = vpop.permute.xlu1 %1319 }
 0x188   : > { %v1315_v13 = vpop.permute.xlu0 %1314  ;;  %v1322_v18 = vunpack.i.h.bf16 %v1320_v17  ;;  %v1321_v19 = vunpack.i.l.bf16 %v1320_v17 }
 0x189   : > { %v1317_v15 = vunpack.i.h.bf16 %v1315_v13  ;;  %v1316_v16 = vunpack.i.l.bf16 %v1315_v13 }
 0x18a   : > { %1176 = vmatpush3.bf16.msra.mxu0 %v1173_v0  ;;  %v1221_v21 = vpack.c.bf16 %v1322_v18, %v1321_v19 }
 0x18b   : > { %1178 = vmatprep.subr.bf16.mxu0 %v1177_v1  ;;  %v1217_v20 = vpack.c.bf16 %v1317_v15, %v1316_v16 }
 0x18e   : > { %1180 = vmatpush3.bf16.msra.mxu0 %v1177_v1 }
 0x18f   : > { %1205 = vmatprep.subr.msk.bf16.mxu0 %vm1475_vm4, %v1483_v37 }
 0x191   : > { %1088 = vmatmul.mubr.msk.f32.vlgmr.msra.gmra.mrb[0].mxu0 %vm355_vm5, %v302_v5  ;;  %v458_v5 = vld [vmem:[%s1616_s5 + $0x8] sm:$0xff] }
 0x192   : > { %1208 = vmatpush3.bf16.msk.msra.mxu0 %vm1475_vm4, %v1483_v37  ;;  %1133 = vmatprep.mubr.msk.f32.mxu0 %vm355_vm5, %v989_v7  ;;  %v457_v7 = vld [vmem:[%s1616_s5] sm:$0xff] }
 0x193   : > { %1210 = vmatprep.subr.bf16.mxu0 %v1209_v12 }
 0x196   : > { %1212 = vmatpush3.bf16.msra.mxu0 %v1209_v12 }
 0x197   : > { %1214 = vmatprep.subr.bf16.mxu0 %v1213_v14 }
 0x198   : > { %v353_v23 = vpop.permute.xlu1 %352 }
 0x199   : > { %v348_v24 = vpop.permute.xlu0 %347 }
 0x19a   : > { %1216 = vmatpush3.bf16.msra.mxu0 %v1213_v14 }
 0x19b   : > { %1218 = vmatprep.subr.bf16.mxu0 %v1217_v20 }
 0x19c   : > { %v449_v28 = vpop.permute.xlu1 %448 }
 0x19d   : > { %v444_v31 = vpop.permute.xlu0 %443 }
 0x19e   : > { %1220 = vmatpush3.bf16.msra.mxu0 %v1217_v20 }
 0x19f   : > { %1222 = vmatprep.subr.bf16.mxu0 %v1221_v21 }
 0x1a0   : > { %v661_v37 = vpop.permute.xlu1 %660 }
 0x1a1   : > { %v656_v38 = vpop.permute.xlu0 %655 }
 0x1a2   : > { %1224 = vmatpush3.bf16.msra.mxu0 %v1221_v21 }
 0x1a4   : > { %v757_v42 = vpop.permute.xlu1 %756 }
 0x1a5   : > { %1134 = vmatmul.mubr.msk.f32.vlgmr.msra.gmra.mrb[2].mxu0 %vm355_vm5, %v990_v22  ;;  %v752_v44 = vpop.permute.xlu0 %751 }
 0x264   : > { %v1089_v25 = vpop.f32.mrb[0].mxu0 }
 0x265   : > { %v434_v26 = vadd.f32 %v1089_v25, %v353_v23  ;;  %v428_v27 = vpop.f32.mrb[1].mxu0 }
 0x266   : > { %v429_v29 = vadd.f32 %v428_v27, %v348_v24  ;;  %v456_v27 = vld [vmem:[%s1615_s4 + $0x8] sm:$0xff] }
 0x267   : > { %vm440_vm6 = vcmp.ge.f32.partialorder %v434_v26, 0.0  ;;  %v452_v32 = vmul.f32 %v449_v28, %v434_v26 }
 0x268   : > { %vm439_vm7 = vcmp.ge.f32.partialorder %v429_v29, 0.0  ;;  %v451_v33 = vmul.f32 %v444_v31, %v429_v29  ;;  %v999_v31 = vld [vmem:[%s1615_s4 + $0x10] sm:$0xff] }
 0x269   : > { %v454_v34 = vsel %vm440_vm6, %v434_v26, %v452_v32 }
 0x26a   : > { %v453_v35 = vsel %vm439_vm7, %v429_v29, %v451_v33 }
 0x26b   : > { %v1323_v36 = vpack.i.bf16 %v454_v34, %v453_v35 }
 0x26d   : > { %1324 = vrot.lane.b32.xlu0 %v1323_v36, %s1382_s15 }
 0x278   : > { %v1135_v39 = vpop.f32.mrb[2].mxu0 }
 0x279   : > { %v741_v40 = vadd.f32 %v1135_v39, %v661_v37  ;;  %v735_v41 = vpop.f32.mrb[3].mxu0 }
 0x27a   : > { %v736_v43 = vadd.f32 %v735_v41, %v656_v38 }
 0x27b   : > { %vm748_vm8 = vcmp.ge.f32.partialorder %v741_v40, 0.0  ;;  %v760_v45 = vmul.f32 %v757_v42, %v741_v40 }
 0x27c   : > { %vm747_vm9 = vcmp.ge.f32.partialorder %v736_v43, 0.0  ;;  %v759_v46 = vmul.f32 %v752_v44, %v736_v43 }
 0x27d   : > { %v762_v47 = vsel %vm748_vm8, %v741_v40, %v760_v45 }
 0x27e   : > { %v761_v48 = vsel %vm747_vm9, %v736_v43, %v759_v46 }
 0x27f   : > { %v1328_v49 = vpack.i.bf16 %v762_v47, %v761_v48  ;;  %v1247_v48 = vadd.f32 %v1457_v8, %v1457_v8 }
 0x281   : > { %1329 = vrot.lane.b32.xlu1 %v1328_v49, %s1382_s15  ;;  %v1251_v49 = vadd.f32 %v1455_v6, %v1455_v6 }
 0x2df   : > { %v1325_v50 = vpop.permute.xlu0 %1324 }
 0x2e0   : > { %v1327_v51 = vunpack.i.h.bf16 %v1325_v50  ;;  %v1326_v52 = vunpack.i.l.bf16 %v1325_v50 }
 0x2e2   : > { %v467_v53 = vsel %vm313_vm2, 0.0, %v1326_v52  ;;  %v468_v54 = vsel %vm313_vm2, 0.0, %v1327_v51 }
 0x2e3   : > { %v469_v55 = vsel %vm316_vm3, %v467_v53, 0.0  ;;  %v470_v56 = vsel %vm316_vm3, %v468_v54, 0.0  ;;  %v1181_v57 = vpack.c.bf16 %v468_v54, %v467_v53 }
 0x2e4   : > { %v1338_v58 = vpack.i.bf16 %v470_v56, %v469_v55 }
 0x2e5   : > { %1183 = vmatprep.subr.msk.bf16.mxu1 %vm1475_vm4, %v1181_v57 }
 0x2e6   : > { %1186 = vmatpush3.bf16.msk.msra.mxu1 %vm1475_vm4, %v1181_v57  ;;  %1339 = vrot.lane.b32.xlu1 %v1338_v58, %s1383_s16 }
 0x2e7   : > { %1334 = vrot.lane.b32.xlu0 %v1338_v58, %s1384_s17 }
 0x2ea   : > { %1349 = vrot.lane.b32.xlu1 %v1338_v58, %s1385_s18 }
 0x2eb   : > { %1344 = vrot.lane.b32.xlu0 %v1338_v58, %s1386_s19 }
 0x2f3   : > { %v1330_v60 = vpop.permute.xlu1 %1329 }
 0x2f4   : > { %v1332_v61 = vunpack.i.h.bf16 %v1330_v60  ;;  %v1331_v62 = vunpack.i.l.bf16 %v1330_v60 }
 0x2f6   : > { %v778_v63 = vsel %vm313_vm2, 0.0, %v1332_v61  ;;  %v777_v0 = vsel %vm313_vm2, 0.0, %v1331_v62 }
 0x2f7   : > { %v780_v1 = vsel %vm316_vm3, %v778_v63, 0.0  ;;  %v779_v2 = vsel %vm316_vm3, %v777_v0, 0.0  ;;  %v1225_v3 = vpack.c.bf16 %v778_v63, %v777_v0 }
 0x2f8   : > { %v1358_v4 = vpack.i.bf16 %v780_v1, %v779_v2 }
 0x2fa   : > { %1359 = vrot.lane.b32.xlu1 %v1358_v4, %s1383_s16  ;;  %1354 = vrot.lane.b32.xlu0 %v1358_v4, %s1384_s17 }
 0x2fe   : > { %1369 = vrot.lane.b32.xlu1 %v1358_v4, %s1385_s18  ;;  %1364 = vrot.lane.b32.xlu0 %v1358_v4, %s1386_s19 }
 0x302   : > { %504 = vperm.xlu1 %1272, %v458_v5   ;;  %499 = vperm.xlu0 %1271, %v457_v7  }
 0x306   : > { %814 = vperm.xlu1 %1272, %v1002_v9   ;;  %809 = vperm.xlu0 %1271, %v1001_v10  }
 0x358   : > { %v1340_v11 = vpop.permute.xlu1 %1339 }
 0x359   : > { %v1335_v12 = vpop.permute.xlu0 %1334  ;;  %v1342_v13 = vunpack.i.h.bf16 %v1340_v11  ;;  %v1341_v14 = vunpack.i.l.bf16 %v1340_v11 }
 0x35a   : > { %v1337_v15 = vunpack.i.h.bf16 %v1335_v12  ;;  %v1336_v16 = vunpack.i.l.bf16 %v1335_v12 }
 0x35b   : > { %v1191_v19 = vpack.c.bf16 %v1342_v13, %v1341_v14 }
 0x35c   : > { %v1187_v17 = vpack.c.bf16 %v1337_v15, %v1336_v16  ;;  %v1350_v22 = vpop.permute.xlu1 %1349 }
 0x35d   : > { %v1345_v18 = vpop.permute.xlu0 %1344  ;;  %v1352_v23 = vunpack.i.h.bf16 %v1350_v22  ;;  %v1351_v24 = vunpack.i.l.bf16 %v1350_v22 }
 0x35e   : > { %v1347_v20 = vunpack.i.h.bf16 %v1345_v18  ;;  %v1346_v21 = vunpack.i.l.bf16 %v1345_v18  ;;  %1188 = vmatprep.subr.bf16.mxu1 %v1187_v17 }
 0x35f   : > { %1190 = vmatpush3.bf16.msra.mxu1 %v1187_v17  ;;  %v1199_v26 = vpack.c.bf16 %v1352_v23, %v1351_v24 }
 0x360   : > { %1192 = vmatprep.subr.bf16.mxu1 %v1191_v19  ;;  %v1195_v25 = vpack.c.bf16 %v1347_v20, %v1346_v21 }
 0x363   : > { %1194 = vmatpush3.bf16.msra.mxu1 %v1191_v19 }
 0x364   : > { %1196 = vmatprep.subr.bf16.mxu1 %v1195_v25 }
 0x367   : > { %1198 = vmatpush3.bf16.msra.mxu1 %v1195_v25 }
 0x368   : > { %1200 = vmatprep.subr.bf16.mxu1 %v1199_v26 }
 0x36b   : > { %1202 = vmatpush3.bf16.msra.mxu1 %v1199_v26 }
 0x36c   : > { %1227 = vmatprep.subr.msk.bf16.mxu1 %vm1475_vm4, %v1225_v3  ;;  %v1360_v28 = vpop.permute.xlu1 %1359  ;;  %v1355_v29 = vpop.permute.xlu0 %1354 }
 0x36d   : > { %v1357_v32 = vunpack.i.h.bf16 %v1355_v29  ;;  %v1356_v33 = vunpack.i.l.bf16 %v1355_v29  ;;  %v1362_v34 = vunpack.i.h.bf16 %v1360_v28  ;;  %v1361_v35 = vunpack.i.l.bf16 %v1360_v28 }
 0x36e   : > { %1111 = vmatmul.mubr.msk.f32.vlgmr.msra.gmra.mrb[0].mxu1 %vm355_vm5, %v456_v27 }
 0x36f   : > { %v1231_v36 = vpack.c.bf16 %v1357_v32, %v1356_v33  ;;  %1230 = vmatpush3.bf16.msk.msra.mxu1 %vm1475_vm4, %v1225_v3  ;;  %1156 = vmatprep.mubr.msk.f32.mxu1 %vm355_vm5, %v999_v31  ;;  %v1235_v38 = vpack.c.bf16 %v1362_v34, %v1361_v35 }
 0x370   : > { %v1365_v37 = vpop.permute.xlu0 %1364  ;;  %v1370_v41 = vpop.permute.xlu1 %1369 }
 0x371   : > { %1232 = vmatprep.subr.bf16.mxu1 %v1231_v36  ;;  %v1367_v39 = vunpack.i.h.bf16 %v1365_v37  ;;  %v1366_v40 = vunpack.i.l.bf16 %v1365_v37  ;;  %v1372_v42 = vunpack.i.h.bf16 %v1370_v41  ;;  %v1371_v43 = vunpack.i.l.bf16 %v1370_v41 }
 0x373   : > { %1234 = vmatpush3.bf16.msra.mxu1 %v1231_v36  ;;  %v1239_v44 = vpack.c.bf16 %v1367_v39, %v1366_v40  ;;  %v1243_v45 = vpack.c.bf16 %v1372_v42, %v1371_v43 }
 0x374   : > { %1236 = vmatprep.subr.bf16.mxu1 %v1235_v38 }
 0x377   : > { %1238 = vmatpush3.bf16.msra.mxu1 %v1235_v38 }
 0x378   : > { %1240 = vmatprep.subr.bf16.mxu1 %v1239_v44 }
 0x37b   : > { %1242 = vmatpush3.bf16.msra.mxu1 %v1239_v44 }
 0x37c   : > { %1244 = vmatprep.subr.bf16.mxu1 %v1243_v45 }
 0x37f   : > { %1246 = vmatpush3.bf16.msra.mxu1 %v1243_v45 }
 0x381   : > { %v505_v46 = vpop.permute.xlu1 %504  ;;  %v500_v47 = vpop.permute.xlu0 %499 }
 0x382   : > { %1157 = vmatmul.mubr.msk.f32.vlgmr.msra.gmra.mrb[0].mxu1 %vm355_vm5, %v1000_v30  ;;  %v1248_v51 = vadd.f32 %v1247_v48, %v505_v46  ;;  %v1252_v53 = vadd.f32 %v1251_v49, %v500_v47 }
 0x385   : > { %v815_v50 = vpop.permute.xlu1 %814  ;;  %v810_v52 = vpop.permute.xlu0 %809 }
 0x386   : > { %v1249_v54 = vadd.f32 %v1248_v51, %v815_v50  ;;  %v1253_v55 = vadd.f32 %v1252_v53, %v810_v52 }
 0x455   : > { %v1158_v56 = vpop.f32.mrb[0].mxu1 }
 0x456   : > { %v1250_v57 = vadd.f32 %v1249_v54, %v1158_v56  ;;  %v889_v58 = vpop.f32.mrb[1].mxu1 }
 0x457   : > { %v1254_v59 = vadd.f32 %v1253_v55, %v889_v58 }
 0x458   : > { %v903_v60 = vmul.f32 0.5, %v1250_v57 }
 0x459   : > { %v902_v8 = vmul.f32 0.5, %v1254_v59 }
 0x45a   : > { %v1014_v61 = vpack.c.bf16 %v903_v60, %v903_v60 }
 0x45b   : > { %v1013_v6 = vpack.c.bf16 %v902_v8, %v902_v8 }
 0x45c   : > { %914 = vst.msk [vmem:[%s278_s29 + $0x4] sm:$0xf] %vm912_vm10, %v1014_v61 }
 0x45d   : > { %913 = vst.msk [vmem:[%s278_s29] sm:$0xf] %vm912_vm10, %v1013_v6 }
 0x45e PF: > { %s17_s24 = sadd.s32 1, %s1379_s24  }
 0x45f   : > { %p14_p4 = scmp.ge.s32.totalorder %s17_s24, 4  }
 0x461   :  { %16 = sbr.rel (!%p14_p4) target bundleno = 1 (0x1), region = 84 }

// kernel: forward.10
= control target key start
LH: loop header
LB: loop body
LE: loop exit
PB: predicated region body
PF: predicated region fallthrough
CT: control target
= control target key end

     0   :  { %s1272_s12 = smov 0   ;;  %s1414_s0 = inlined_call_operand.vmem [shape: f32[2,4,8], index: 0, kind: input, shape index: {}]   ;;  %s1415_s1 = inlined_call_operand.vmem [shape: f32[32,28], index: 1, kind: input, shape index: {}]   ;;  %s1416_s2 = inlined_call_operand.vmem [shape: f32[32,1], index: 2, kind: input, shape index: {}]   ;;  %s1417_s3 = inlined_call_operand.vmem [shape: bf16[2,32,8], index: 3, kind: output, shape index: {}]  }
   0x1 LB: > { %s1037_s13 = sadd.s32 4294967295, %s1237_s12   ;;  %p1041_p0 = scmp.ge.s32.totalorder %s1237_s12, 1  ;;  %s1237_s12 = sphi %s1272_s12, %s13_s12  }
   0x2   : > { %p136_p1 = scmp.lt.s32.totalorder %s1237_s12, 3 }
   0x4   : > { %p137_p2 = pnand %p1041_p0, %p136_p1 }
   0x5   : > { %p159_p3 = scmp.lt.s32.totalorder (!%p137_p2), %s1037_s13, 1  ;;  %v1283_v0 = vld [vmem:[%s1415_s1] sm:$0xff] (!%p137_p2)  ;;  %s1239_s16 = smov (!%p137_p2), 124   ;;  %v1292_v1 = vld [vmem:[%s1415_s1 + $0x8] sm:$0xff] (!%p137_p2)  ;;  %v1303_v3 = vld [vmem:[%s1415_s1 + $0x10] sm:$0xff] (!%p137_p2)  ;;  %vm200_vm0 = vcmask (!%p137_p2), 31744  }
   0x6   : > { %140 = sbr.rel (%p137_p2) target bundleno = 501 (0x1f5), region = 32  ;;  %189 = vrot.lane.b32.xlu1 (!%p137_p2), %v1283_v0, %s1239_s16  ;;  %s1240_s23 = smov (!%p137_p2), 3   ;;  %v1315_v4 = vld [vmem:[%s1415_s1 + $0x18] sm:$0xff] (!%p137_p2)  ;;  %vm181_vm1 = vcmask (!%p137_p2), 23552   ;;  %vm183_vm2 = vcmask (!%p137_p2), 89088   ;;  %v1250_v10 = vmov (!%p137_p2), 0  }
   0x7   : > { %s1241_s26 = smov (!%p137_p2), 116   ;;  %s1242_s27 = smov (!%p137_p2), 112   ;;  %1229 = vset.pattern.permute.xlu1 (!%p137_p2), %v1250_v10  ;;  %1230 = vset.pattern.permute.xlu0 (!%p137_p2), %v1250_v10  ;;  %v173_v11 = vld [vmem:[%s1416_s2] sm:$0xff] (!%p137_p2)  ;;  %v174_v12 = vld [vmem:[%s1416_s2 + $0x8] sm:$0xff] (!%p137_p2)  ;;  %v175_v13 = vld [vmem:[%s1416_s2 + $0x10] sm:$0xff] (!%p137_p2)  ;;  %vm209_vm3 = vcmask (!%p137_p2), 1043456  }
   0x8   : > { %s1243_s30 = smov (!%p137_p2), 108   ;;  %s1244_s4 = smov (!%p137_p2), 120   ;;  %v176_v14 = vld [vmem:[%s1416_s2 + $0x18] sm:$0xff] (!%p137_p2)  ;;  %vm977_vm4 = vcmask (!%p137_p2), 60416  }
   0x9   : > { %s1245_s5 = smov (!%p137_p2), 125   ;;  %s1246_s6 = smov (!%p137_p2), 127  }
   0xa   : > { %191 = vrot.lane.b32.xlu1 (!%p137_p2), %v1292_v1, %s1239_s16  ;;  %s1247_s7 = smov (!%p137_p2), 123   ;;  %s1248_s8 = smov (!%p137_p2), 126  }
   0xb   : > { %s1249_s9 = smov (!%p137_p2), 104   ;;  %s1251_s10 = smov (!%p137_p2), 122  }
   0xd   : > { %s1419_s13 = smov (!%p159_p3, %s1037_s13), 1 }
   0xe   : > { %s1042_s19 = sshll.u32 %s1419_s13, 2  ;;  %193 = vrot.lane.b32.xlu1 %v1303_v3, %s1239_s16  ;;  %s1086_s21 = sshll.u32 %s1419_s13, 4 }
   0xf   : > { %s162_s22 = scalar_lea.vmem %s1414_s0, %s1042_s19  ;;  %s167_s24 = scalar_lea.vmem %s1417_s3, %s1086_s21 }
  0x10   : > { %v168_v2 = vld [vmem:[%s162_s22] sm:$0xf] }
  0x11   : > { %178 = vrot.lane.b32.xlu0 %v168_v2, %s1240_s23 }
  0x12   : > { %612 = vrot.lane.b32.xlu1 %v1292_v1, %s1242_s27 }
  0x15   : > { %501 = vrot.lane.b32.xlu0 %v1283_v0, %s1241_s26 }
  0x16   : > { %616 = vrot.lane.b32.xlu1 %v1315_v4, %s1242_s27 }
  0x19   : > { %503 = vrot.lane.b32.xlu0 %v1292_v1, %s1241_s26 }
  0x1a   : > { %719 = vrot.lane.b32.xlu1 %v1283_v0, %s1243_s30 }
  0x1d   : > { %195 = vrot.lane.b32.xlu0 %v1315_v4, %s1239_s16 }
  0x21   : > { %610 = vrot.lane.b32.xlu0 %v1283_v0, %s1242_s27 }
  0x25   : > { %614 = vrot.lane.b32.xlu0 %v1303_v3, %s1242_s27 }
  0x29   : > { %392 = vrot.lane.b32.xlu0 %v1283_v0, %s1244_s4 }
  0x78   : > { %v190_v5 = vpop.permute.xlu1 %189 }
  0x79   : > { %1128 = vmatprep.mubr.msk.f32.mxu1 %vm200_vm0, %v190_v5 }
  0x7c   : > { %v192_v15 = vpop.permute.xlu1 %191 }
  0x80   : > { %v194_v17 = vpop.permute.xlu1 %193 }
  0x83   : > { %v179_v6 = vpop.permute.xlu0 %178 }
  0x84   : > { %v182_v7 = vsel %vm181_vm1, 0.0, %v179_v6  ;;  %v613_v19 = vpop.permute.xlu1 %612 }
  0x85   : > { %v184_v8 = vsel %vm183_vm2, %v182_v7, 0.0 }
  0x86   : > { %509 = vrot.lane.b32.xlu1 %v184_v8, %s1245_s5  ;;  %198 = vrot.lane.b32.xlu0 %v184_v8, %s1246_s6 }
  0x87   : > { %v502_v9 = vpop.permute.xlu0 %501 }
  0x88   : > { %1152 = vmatprep.mubr.msk.f32.mxu0 %vm200_vm0, %v502_v9  ;;  %v617_v21 = vpop.permute.xlu1 %616 }
  0x8a   : > { %721 = vrot.lane.b32.xlu1 %v1292_v1, %s1243_s30  ;;  %394 = vrot.lane.b32.xlu0 %v1292_v1, %s1244_s4 }
  0x8b   : > { %v504_v16 = vpop.permute.xlu0 %503 }
  0x8c   : > { %v720_v23 = vpop.permute.xlu1 %719 }
  0x8e   : > { %618 = vrot.lane.b32.xlu1 %v184_v8, %s1239_s16  ;;  %396 = vrot.lane.b32.xlu0 %v1303_v3, %s1244_s4 }
  0x8f   : > { %v196_v18 = vpop.permute.xlu0 %195 }
  0x92   : > { %723 = vrot.lane.b32.xlu1 %v1303_v3, %s1243_s30  ;;  %398 = vrot.lane.b32.xlu0 %v1315_v4, %s1244_s4 }
  0x93   : > { %v611_v20 = vpop.permute.xlu0 %610 }
  0x96   : > { %727 = vrot.lane.b32.xlu1 %v184_v8, %s1247_s7  ;;  %400 = vrot.lane.b32.xlu0 %v184_v8, %s1248_s8 }
  0x97   : > { %v615_v22 = vpop.permute.xlu0 %614 }
  0x9a   : > { %725 = vrot.lane.b32.xlu1 %v1315_v4, %s1243_s30  ;;  %830 = vrot.lane.b32.xlu0 %v1292_v1, %s1249_s9 }
  0x9b   : > { %v393_v24 = vpop.permute.xlu0 %392 }
  0x9e   : > { %828 = vrot.lane.b32.xlu1 %v1283_v0, %s1249_s9  ;;  %836 = vrot.lane.b32.xlu0 %v184_v8, %s1251_s10 }
  0xa2   : > { %505 = vrot.lane.b32.xlu1 %v1303_v3, %s1241_s26  ;;  %832 = vrot.lane.b32.xlu0 %v1303_v3, %s1249_s9 }
  0xa6   : > { %507 = vrot.lane.b32.xlu1 %v1315_v4, %s1241_s26  ;;  %834 = vrot.lane.b32.xlu0 %v1315_v4, %s1249_s9 }
  0xaa   : > { %939 = vperm.xlu1 %1229, %v173_v11   ;;  %944 = vperm.xlu0 %1230, %v174_v12  }
  0xae   : > { %949 = vperm.xlu1 %1229, %v175_v13  }
  0xb2   : > { %954 = vperm.xlu1 %1229, %v176_v14  }
  0xf8   : > { %v510_v25 = vpop.permute.xlu1 %509  ;;  %v199_v26 = vpop.permute.xlu0 %198 }
  0xf9   : > { %1126 = vmatprep.subr.msk.mxu1 %vm209_vm3, %v199_v26  ;;  %1150 = vmatprep.subr.msk.mxu0 %vm209_vm3, %v510_v25 }
  0xfa   : > { %1127 = vmatpush3.msk.msra.mxu1 %vm209_vm3, %v199_v26  ;;  %1151 = vmatpush3.msk.msra.mxu0 %vm209_vm3, %v510_v25 }
  0xfb   : > { %1129 = vmatmul.mubr.msk.f32.vlgmr.msra.gmra.mrb[0].mxu1 %vm200_vm0, %v192_v15  ;;  %1134 = vmatprep.subr.msk.mxu1 %vm209_vm3, %v184_v8 }
  0xfc   : > { %1153 = vmatmul.mubr.msk.f32.vlgmr.msra.gmra.mrb[0].mxu0 %vm200_vm0, %v504_v16  ;;  %v722_v27 = vpop.permute.xlu1 %721  ;;  %1131 = vmatprep.mubr.msk.f32.mxu1 %vm200_vm0, %v194_v17  ;;  %v395_v28 = vpop.permute.xlu0 %394 }
  0xfd   : > { %1135 = vmatpush3.msk.msra.mxu1 %vm209_vm3, %v184_v8  ;;  %1160 = vmatprep.mubr.msk.f32.mxu0 %vm200_vm0, %v611_v20 }
  0xff   : > { %1132 = vmatmul.mubr.msk.f32.gmra.mrb[2].mxu1 %vm200_vm0, %v196_v18 }
 0x100   : > { %v619_v29 = vpop.permute.xlu1 %618  ;;  %v397_v30 = vpop.permute.xlu0 %396  ;;  %1136 = vmatprep.mubr.msk.f32.mxu1 %vm200_vm0, %v1283_v0 }
 0x101   : > { %1158 = vmatprep.subr.msk.mxu0 %vm209_vm3, %v619_v29 }
 0x102   : > { %1159 = vmatpush3.msk.msra.mxu0 %vm209_vm3, %v619_v29 }
 0x103   : > { %1137 = vmatmul.mubr.msk.f32.vlgmr.msra.gmra.mrb[0].mxu1 %vm200_vm0, %v1292_v1 }
 0x104   : > { %1161 = vmatmul.mubr.msk.f32.vlgmr.msra.gmra.mrb[0].mxu0 %vm200_vm0, %v613_v19  ;;  %v724_v31 = vpop.permute.xlu1 %723  ;;  %v399_v32 = vpop.permute.xlu0 %398  ;;  %1139 = vmatprep.mubr.msk.f32.mxu1 %vm200_vm0, %v1303_v3 }
 0x105   : > { %1163 = vmatprep.mubr.msk.f32.mxu0 %vm200_vm0, %v615_v22 }
 0x107   : > { %1140 = vmatmul.mubr.msk.f32.gmra.mrb[2].mxu1 %vm200_vm0, %v1315_v4 }
 0x108   : > { %1164 = vmatmul.mubr.msk.f32.gmra.mrb[2].mxu0 %vm200_vm0, %v617_v21  ;;  %v728_v33 = vpop.permute.xlu1 %727  ;;  %1144 = vmatprep.mubr.msk.f32.mxu1 %vm200_vm0, %v393_v24  ;;  %v401_v34 = vpop.permute.xlu0 %400 }
 0x109   : > { %1168 = vmatprep.mubr.msk.f32.mxu0 %vm200_vm0, %v720_v23  ;;  %1142 = vmatprep.subr.msk.mxu1 %vm209_vm3, %v401_v34 }
 0x10a   : > { %1166 = vmatprep.subr.msk.mxu0 %vm209_vm3, %v728_v33  ;;  %1143 = vmatpush3.msk.msra.mxu1 %vm209_vm3, %v401_v34 }
 0x10b   : > { %1167 = vmatpush3.msk.msra.mxu0 %vm209_vm3, %v728_v33  ;;  %1145 = vmatmul.mubr.msk.f32.vlgmr.msra.gmra.mrb[0].mxu1 %vm200_vm0, %v395_v28 }
 0x10c   : > { %1182 = vmatprep.subr.msk.mxu1 %vm209_vm3, %v510_v25  ;;  %1169 = vmatmul.mubr.msk.f32.vlgmr.msra.gmra.mrb[0].mxu0 %vm200_vm0, %v722_v27  ;;  %v726_v35 = vpop.permute.xlu1 %725  ;;  %v831_v36 = vpop.permute.xlu0 %830 }
 0x10d   : > { %1147 = vmatprep.mubr.msk.f32.mxu1 %vm200_vm0, %v397_v30  ;;  %1183 = vmatpush3.msk.msra.mxu1 %vm209_vm3, %v510_v25 }
 0x10e   : > { %1171 = vmatprep.mubr.msk.f32.mxu0 %vm200_vm0, %v724_v31 }
 0x10f   : > { %1148 = vmatmul.mubr.msk.f32.gmra.mrb[2].mxu1 %vm200_vm0, %v399_v32 }
 0x110   : > { %1172 = vmatmul.mubr.msk.f32.gmra.mrb[2].mxu0 %vm200_vm0, %v726_v35  ;;  %v829_v37 = vpop.permute.xlu1 %828  ;;  %v837_v38 = vpop.permute.xlu0 %836 }
 0x111   : > { %1174 = vmatprep.subr.msk.mxu0 %vm209_vm3, %v837_v38  ;;  %1176 = vmatprep.mubr.msk.f32.mxu0 %vm200_vm0, %v829_v37 }
 0x112   : > { %1175 = vmatpush3.msk.msra.mxu0 %vm209_vm3, %v837_v38 }
 0x114   : > { %1177 = vmatmul.mubr.msk.f32.vlgmr.msra.gmra.mrb[0].mxu0 %vm200_vm0, %v831_v36  ;;  %v506_v39 = vpop.permute.xlu1 %505  ;;  %v833_v40 = vpop.permute.xlu0 %832 }
 0x115   : > { %1155 = vmatprep.mubr.msk.f32.mxu1 %vm200_vm0, %v506_v39  ;;  %1179 = vmatprep.mubr.msk.f32.mxu0 %vm200_vm0, %v833_v40 }
 0x118   : > { %v508_v41 = vpop.permute.xlu1 %507  ;;  %v835_v42 = vpop.permute.xlu0 %834 }
 0x119   : > { %1156 = vmatmul.mubr.msk.f32.vlgmr.msra.gmra.mrb[2].mxu1 %vm200_vm0, %v508_v41  ;;  %1180 = vmatmul.mubr.msk.f32.gmra.mrb[2].mxu0 %vm200_vm0, %v835_v42 }
 0x129   : > { %v940_v45 = vpop.permute.xlu1 %939  ;;  %v945_v47 = vpop.permute.xlu0 %944 }
 0x12d   : > { %v950_v50 = vpop.permute.xlu1 %949 }
 0x131   : > { %v955_v61 = vpop.permute.xlu1 %954 }
 0x1de   : > { %v1146_v43 = vpop.f32.mrb[0].mxu1 }
 0x1df   : > { %v478_v44 = vpop.f32.mrb[1].mxu1 }
 0x1e7   : > { %v1178_v46 = vpop.f32.mrb[0].mxu0 }
 0x1e8   : > { %v1184_v48 = vadd.f32 %v1178_v46, %v1146_v43  ;;  %v914_v49 = vpop.f32.mrb[1].mxu0 }
 0x1e9   : > { %v1185_v51 = vadd.f32 %v914_v49, %v478_v44 }
 0x1ea   : > { %v958_v52 = vadd.f32 %v1184_v48, %v945_v47 }
 0x1eb   : > { %v957_v53 = vadd.f32 %v1185_v51, %v940_v45 }
 0x1ec   : > { %v1088_v54 = vpack.c.bf16 %v958_v52, %v958_v52  ;;  %v1157_v55 = vpop.f32.mrb[2].mxu1  ;;  %v1181_v56 = vpop.f32.mrb[2].mxu0 }
 0x1ed   : > { %v1087_v57 = vpack.c.bf16 %v957_v53, %v957_v53  ;;  %v1186_v58 = vadd.f32 %v1181_v56, %v1157_v55  ;;  %v597_v59 = vpop.f32.mrb[3].mxu1  ;;  %v924_v60 = vpop.f32.mrb[3].mxu0 }
 0x1ee   : > { %979 = vst.msk [vmem:[%s167_s24 + $0x4] sm:$0xf] %vm977_vm4, %v1088_v54  ;;  %v1187_v62 = vadd.f32 %v924_v60, %v597_v59 }
 0x1ef   : > { %978 = vst.msk [vmem:[%s167_s24] sm:$0xf] %vm977_vm4, %v1087_v57  ;;  %v960_v63 = vadd.f32 %v1186_v58, %v955_v61 }
 0x1f0   : > { %v959_v0 = vadd.f32 %v1187_v62, %v950_v50 }
 0x1f1   : > { %v1090_v1 = vpack.c.bf16 %v960_v63, %v960_v63 }
 0x1f2   : > { %v1089_v2 = vpack.c.bf16 %v959_v0, %v959_v0 }
 0x1f3   : > { %981 = vst.msk [vmem:[%s167_s24 + $0xc] sm:$0xf] %vm977_vm4, %v1090_v1 }
 0x1f4   : > { %980 = vst.msk [vmem:[%s167_s24 + $0x8] sm:$0xf] %vm977_vm4, %v1089_v2 }
 0x1f5 PF: > { %s13_s12 = sadd.s32 1, %s1237_s12  }
 0x1f6   : > { %p10_p4 = scmp.ge.s32.totalorder %s13_s12, 4  }
 0x1f8   :  { %12 = sbr.rel (!%p10_p4) target bundleno = 1 (0x1), region = 62 }

// kernel: forward.17
= control target key start
LH: loop header
LB: loop body
LE: loop exit
PB: predicated region body
PF: predicated region fallthrough
CT: control target
= control target key end

     0   :  { %s554_s15 = smov 0   ;;  %s590_s0 = inlined_call_operand.vmem [shape: bf16[2,8,32], index: 0, kind: input, shape index: {}]   ;;  %s591_s1 = inlined_call_operand.vmem [shape: f32[2,4,16], index: 1, kind: input, shape index: {}]   ;;  %s592_s2 = inlined_call_operand.vmem [shape: f32[4,1], index: 2, kind: input, shape index: {}]   ;;  %s593_s3 = inlined_call_operand.vmem [shape: f32[8,1], index: 3, kind: input, shape index: {}]   ;;  %s594_s4 = inlined_call_operand.vmem [shape: bf16[2,2,4,32], index: 4, kind: output, shape index: {}]  }
   0x1 LB: > { %s446_s16 = sadd.s32 4294967295, %s520_s15   ;;  %p450_p0 = scmp.ge.s32.totalorder %s520_s15, 1  ;;  %s520_s15 = sphi %s554_s15, %s14_s15  }
   0x2   : > { %p161_p1 = scmp.lt.s32.totalorder %s520_s15, 3 }
   0x4   : > { %p162_p2 = pnand %p450_p0, %p161_p1 }
   0x5   : > { %v197_v0 = vld [vmem:[%s593_s3] sm:$0xff] (!%p162_p2)  ;;  %v522_v1 = vmov (!%p162_p2), 0   ;;  %p186_p3 = scmp.lt.s32.totalorder (!%p162_p2), %s446_s16, 1  ;;  %s523_s23 = smov (!%p162_p2), 1   ;;  %vm210_vm1 = vcmask (!%p162_p2), 7168   ;;  %vm212_vm2 = vcmask (!%p162_p2), 269312  }
   0x6   : > { %165 = sbr.rel (%p162_p2) target bundleno = 711 (0x2c7), region = 36  ;;  %502 = vset.pattern.permute.xlu0 (!%p162_p2), %v522_v1  ;;  %513 = vset.pattern.permute.xlu1 (!%p162_p2), %v522_v1  ;;  %v524_v10 = vmov (!%p162_p2), 0.0|0.0   ;;  %vm525_vm3 = vmmov (!%p162_p2), 0   ;;  %v526_v11 = vmov (!%p162_p2), 0.0   ;;  %s527_s24 = smov (!%p162_p2), 126   ;;  %vm230_vm4 = vcmask (!%p162_p2), 130048  }
   0x7   : > { %201 = vperm.xlu0 (!%p162_p2), %502, %v197_v0   ;;  %481 = vmatprep.subr.bf16.mxu0 (!%p162_p2), %v524_v10  ;;  %s528_s25 = smov (!%p162_p2), 127   ;;  %v214_v14 = vld [vmem:[%s592_s2] sm:$0xf] (!%p162_p2)  ;;  %v455_v24 = vld [vmem:[%s591_s1 + $0x4] sm:$0xf] (!%p162_p2)  ;;  %vm305_vm5 = vcmask (!%p162_p2), 254976  }
   0x8   : > { %484 = vmatprep.subr.bf16.mxu1 (!%p162_p2), %v524_v10  ;;  %471 = vmatprep.mubr.msk.f32.mxu0 (!%p162_p2), %vm525_vm3, %v526_v11  ;;  %v215_v23 = vld [vmem:[%s591_s1] sm:$0xf] (!%p162_p2) }
   0x9   : > { %478 = vmatprep.mubr.msk.f32.mxu1 (!%p162_p2), %vm525_vm3, %v526_v11 }
   0xd   : > { %s596_s16 = smov (!%p186_p3, %s446_s16), 1 }
   0xe   : > { %s451_s19 = sshll.u32 %s596_s16, 2 }
   0xf   : > { %s189_s22 = scalar_lea.vmem %s590_s0, %s451_s19  ;;  %s194_s8 = scalar_lea.vmem %s594_s4, %s451_s19 }
  0x10   : > { %v195_v2 = vld [vmem:[%s189_s22] sm:$0xf] }
  0x11   : > { %v196_v3 = vunpack.c.l.bf16 %v195_v2 }
  0x13   : > { %vm198_vm0 = vcmp.ge.f32.partialorder %v196_v3, 0.0 }
  0x86   : > { %v202_v4 = vpop.permute.xlu0 %201 }
  0x87   : > { %v204_v5 = vmul.f32 %v202_v4, %v196_v3 }
  0x89   : > { %v205_v6 = vsel %vm198_vm0, %v196_v3, %v204_v5 }
  0x8a   : > { %207 = vrot.lane.b32.xlu0 %v205_v6, %s523_s23 }
  0xfc   : > { %v208_v7 = vpop.permute.xlu0 %207 }
  0xfd   : > { %v211_v8 = vsel %vm210_vm1, 0.0, %v208_v7 }
  0xfe   : > { %v213_v9 = vsel %vm212_vm2, %v211_v8, 0.0 }
  0xff   : > { %217 = vrot.lane.b32.xlu1 %v213_v9, %s523_s23 }
 0x171   : > { %v218_v12 = vpop.permute.xlu1 %217 }
 0x172   : > { %v508_v13 = vpack.i.bf16 %v218_v12, %v213_v9 }
 0x174   : > { %509 = vrot.lane.b32.xlu0 %v508_v13, %s527_s24  ;;  %504 = vrot.lane.b32.xlu1 %v508_v13, %s528_s25 }
 0x178   : > { %221 = vperm.xlu1 %513, %v214_v14  }
 0x1e6   : > { %v510_v15 = vpop.permute.xlu0 %509  ;;  %v505_v16 = vpop.permute.xlu1 %504 }
 0x1e7   : > { %v512_v17 = vunpack.i.h.bf16 %v510_v15  ;;  %v511_v18 = vunpack.i.l.bf16 %v510_v15  ;;  %v507_v19 = vunpack.i.h.bf16 %v505_v16  ;;  %v506_v20 = vunpack.i.l.bf16 %v505_v16 }
 0x1e9   : > { %v482_v21 = vpack.c.bf16 %v507_v19, %v506_v20  ;;  %v485_v22 = vpack.c.bf16 %v512_v17, %v511_v18 }
 0x1eb   : > { %483 = vmatpush3.bf16.msra.mxu0 %v482_v21  ;;  %486 = vmatpush3.bf16.msra.mxu1 %v485_v22 }
 0x1ee   : > { %472 = vmatmul.mubr.msk.f32.vlgmr.msra.gmra.mrb[0].mxu0 %vm230_vm4, %v215_v23  ;;  %479 = vmatmul.mubr.msk.f32.vlgmr.msra.gmra.mrb[0].mxu1 %vm230_vm4, %v455_v24 }
 0x1f7   : > { %v222_v25 = vpop.permute.xlu1 %221 }
 0x2c1   : > { %v384_v26 = vpop.f32.mrb[0].mxu1  ;;  %v300_v27 = vpop.f32.mrb[0].mxu0 }
 0x2c2   : > { %v385_v28 = vadd.f32 %v384_v26, %v222_v25  ;;  %v301_v29 = vadd.f32 %v300_v27, %v222_v25  ;;  %v473_v30 = vpop.f32.mrb[1].mxu0  ;;  %v480_v31 = vpop.f32.mrb[1].mxu1 }
 0x2c4   : > { %v388_v32 = vpack.c.bf16 %v385_v28, %v385_v28  ;;  %v304_v33 = vpack.c.bf16 %v301_v29, %v301_v29 }
 0x2c6   : > { %457 = vst.msk [vmem:[%s194_s8 + $0x2] sm:$0x3] %vm305_vm5, %v388_v32  ;;  %306 = vst.msk [vmem:[%s194_s8] sm:$0x3] %vm305_vm5, %v304_v33 }
 0x2c7 PF: > { %s14_s15 = sadd.s32 1, %s520_s15  }
 0x2c8   : > { %p11_p4 = scmp.ge.s32.totalorder %s14_s15, 4  }
 0x2ca   :  { %13 = sbr.rel (!%p11_p4) target bundleno = 1 (0x1), region = 68 }

// kernel: forward.15
= control target key start
LH: loop header
LB: loop body
LE: loop exit
PB: predicated region body
PF: predicated region fallthrough
CT: control target
= control target key end

     0   :  { %s632_s15 = smov 0   ;;  %s671_s0 = inlined_call_operand.vmem [shape: bf16[2,16,16], index: 0, kind: input, shape index: {}]   ;;  %s672_s1 = inlined_call_operand.vmem [shape: f32[2,8,32], index: 1, kind: input, shape index: {}]   ;;  %s673_s2 = inlined_call_operand.vmem [shape: f32[8,1], index: 2, kind: input, shape index: {}]   ;;  %s674_s3 = inlined_call_operand.vmem [shape: f32[16,1], index: 3, kind: input, shape index: {}]   ;;  %s675_s4 = inlined_call_operand.vmem [shape: bf16[2,2,8,16], index: 4, kind: output, shape index: {}]  }
   0x1 LB: > { %s481_s16 = sadd.s32 4294967295, %s598_s15   ;;  %p485_p0 = scmp.ge.s32.totalorder %s598_s15, 1  ;;  %s598_s15 = sphi %s632_s15, %s14_s15  }
   0x2   : > { %p162_p1 = scmp.lt.s32.totalorder %s598_s15, 3 }
   0x4   : > { %p163_p2 = pnand %p485_p0, %p162_p1 }
   0x5   : > { %v202_v0 = vld [vmem:[%s674_s3] sm:$0xff] (!%p163_p2)  ;;  %v600_v1 = vmov (!%p163_p2), 0   ;;  %v203_v2 = vld [vmem:[%s674_s3 + $0x8] sm:$0xff] (!%p163_p2)  ;;  %p188_p3 = scmp.lt.s32.totalorder (!%p163_p2), %s481_s16, 1  ;;  %s601_s25 = smov (!%p163_p2), 1   ;;  %v602_v13 = vmov (!%p163_p2), 0.0|0.0  }
   0x6   : > { %166 = sbr.rel (%p163_p2) target bundleno = 719 (0x2cf), region = 36  ;;  %561 = vset.pattern.permute.xlu0 (!%p163_p2), %v600_v1  ;;  %534 = vmatprep.subr.bf16.mxu0 (!%p163_p2), %v602_v13  ;;  %vm228_vm2 = vcmask (!%p163_p2), 7168   ;;  %vm231_vm3 = vcmask (!%p163_p2), 138240   ;;  %s603_s26 = smov (!%p163_p2), 127   ;;  %vm605_vm4 = vmmov (!%p163_p2), 0   ;;  %v606_v22 = vmov (!%p163_p2), 0.0  }
   0x7   : > { %208 = vperm.xlu0 (!%p163_p2), %561, %v202_v0   ;;  %540 = vmatprep.subr.bf16.mxu1 (!%p163_p2), %v602_v13  ;;  %s604_s27 = smov (!%p163_p2), 126   ;;  %v234_v32 = vld [vmem:[%s673_s2] sm:$0xff] (!%p163_p2)  ;;  %vm259_vm5 = vcmask (!%p163_p2), 261120   ;;  %v491_v41 = vld [vmem:[%s672_s1 + $0x8] sm:$0xff] (!%p163_p2)  ;;  %vm334_vm6 = vcmask (!%p163_p2), 125952  }
   0x8   : > { %520 = vmatprep.mubr.msk.f32.mxu0 (!%p163_p2), %vm605_vm4, %v606_v22  ;;  %531 = vmatprep.mubr.msk.f32.mxu1 (!%p163_p2), %vm605_vm4, %v606_v22  ;;  %v235_v42 = vld [vmem:[%s672_s1] sm:$0xff] (!%p163_p2) }
   0xb   : > { %213 = vperm.xlu0 (!%p163_p2), %561, %v203_v2  }
   0xd   : > { %s677_s16 = smov (!%p188_p3, %s481_s16), 1 }
   0xe   : > { %s496_s21 = sshll.u32 %s677_s16, 3 }
   0xf   : > { %s192_s24 = scalar_lea.vmem %s671_s0, %s496_s21  ;;  %s197_s10 = scalar_lea.vmem %s675_s4, %s496_s21 }
  0x10   : > { %v499_v3 = vld [vmem:[%s192_s24] sm:$0xff]  }
  0x11   : > { %v500_v4 = vunpack.c.l.bf16 %v499_v3  ;;  %v501_v6 = vunpack.c.h.bf16 %v499_v3 }
  0x13   : > { %vm204_vm0 = vcmp.ge.f32.partialorder %v500_v4, 0.0  ;;  %vm205_vm1 = vcmp.ge.f32.partialorder %v501_v6, 0.0 }
  0x86   : > { %v209_v5 = vpop.permute.xlu0 %208 }
  0x87   : > { %v216_v7 = vmul.f32 %v500_v4, %v209_v5 }
  0x89   : > { %v218_v10 = vsel %vm204_vm0, %v500_v4, %v216_v7 }
  0x8a   : > { %v214_v8 = vpop.permute.xlu0 %213 }
  0x8b   : > { %v217_v9 = vmul.f32 %v501_v6, %v214_v8 }
  0x8d   : > { %v219_v11 = vsel %vm205_vm1, %v501_v6, %v217_v9 }
  0x8e   : > { %v562_v12 = vpack.i.bf16 %v219_v11, %v218_v10 }
  0x90   : > { %563 = vrot.lane.b32.xlu1 %v562_v12, %s601_s25 }
 0x102   : > { %v564_v14 = vpop.permute.xlu1 %563 }
 0x103   : > { %v566_v15 = vunpack.i.h.bf16 %v564_v14  ;;  %v565_v16 = vunpack.i.l.bf16 %v564_v14 }
 0x105   : > { %v230_v17 = vsel %vm228_vm2, 0.0, %v566_v15  ;;  %v229_v18 = vsel %vm228_vm2, 0.0, %v565_v16 }
 0x106   : > { %v233_v19 = vsel %vm231_vm3, %v230_v17, 0.0  ;;  %v232_v20 = vsel %vm231_vm3, %v229_v18, 0.0 }
 0x107   : > { %v572_v21 = vpack.i.bf16 %v233_v19, %v232_v20 }
 0x109   : > { %573 = vrot.lane.b32.xlu0 %v572_v21, %s603_s26  ;;  %568 = vrot.lane.b32.xlu1 %v572_v21, %s601_s25 }
 0x10d   : > { %578 = vrot.lane.b32.xlu1 %v572_v21, %s604_s27 }
 0x17b   : > { %v574_v23 = vpop.permute.xlu0 %573  ;;  %v569_v24 = vpop.permute.xlu1 %568 }
 0x17c   : > { %v576_v25 = vunpack.i.h.bf16 %v574_v23  ;;  %v575_v26 = vunpack.i.l.bf16 %v574_v23  ;;  %588 = vrot.lane.b32.xlu1 %v569_v24, %s604_s27  ;;  %583 = vrot.lane.b32.xlu0 %v569_v24, %s603_s26 }
 0x17e   : > { %v535_v27 = vpack.c.bf16 %v576_v25, %v575_v26 }
 0x17f   : > { %v579_v28 = vpop.permute.xlu1 %578 }
 0x180   : > { %v581_v29 = vunpack.i.h.bf16 %v579_v28  ;;  %v580_v30 = vunpack.i.l.bf16 %v579_v28  ;;  %536 = vmatpush3.bf16.msra.mxu0 %v535_v27  ;;  %244 = vperm.xlu0 %561, %v234_v32  }
 0x181   : > { %537 = vmatprep.subr.bf16.mxu0 %v602_v13 }
 0x182   : > { %v541_v31 = vpack.c.bf16 %v581_v29, %v580_v30 }
 0x184   : > { %542 = vmatpush3.bf16.msra.mxu1 %v541_v31 }
 0x185   : > { %543 = vmatprep.subr.bf16.mxu1 %v602_v13 }
 0x1ee   : > { %v589_v33 = vpop.permute.xlu1 %588  ;;  %v584_v36 = vpop.permute.xlu0 %583 }
 0x1ef   : > { %v591_v34 = vunpack.i.h.bf16 %v589_v33  ;;  %v590_v35 = vunpack.i.l.bf16 %v589_v33  ;;  %v586_v37 = vunpack.i.h.bf16 %v584_v36  ;;  %v585_v38 = vunpack.i.l.bf16 %v584_v36 }
 0x1f1   : > { %v544_v39 = vpack.c.bf16 %v591_v34, %v590_v35  ;;  %v538_v40 = vpack.c.bf16 %v586_v37, %v585_v38 }
 0x1f3   : > { %545 = vmatpush3.bf16.msra.mxu1 %v544_v39  ;;  %539 = vmatpush3.bf16.msra.mxu0 %v538_v40 }
 0x1f6   : > { %532 = vmatmul.mubr.msk.f32.vlgmr.msra.gmra.mrb[0].mxu1 %vm259_vm5, %v491_v41  ;;  %521 = vmatmul.mubr.msk.f32.vlgmr.msra.gmra.mrb[0].mxu0 %vm259_vm5, %v235_v42 }
 0x1ff   : > { %v245_v43 = vpop.permute.xlu0 %244 }
 0x2c9   : > { %v419_v44 = vpop.f32.mrb[0].mxu1  ;;  %v329_v45 = vpop.f32.mrb[0].mxu0 }
 0x2ca   : > { %v420_v46 = vadd.f32 %v419_v44, %v245_v43  ;;  %v533_v47 = vpop.f32.mrb[1].mxu1  ;;  %v330_v48 = vadd.f32 %v329_v45, %v245_v43  ;;  %v522_v49 = vpop.f32.mrb[1].mxu0 }
 0x2cc   : > { %v423_v50 = vpack.c.bf16 %v420_v46, %v420_v46  ;;  %v333_v51 = vpack.c.bf16 %v330_v48, %v330_v48 }
 0x2ce   : > { %493 = vst.msk [vmem:[%s197_s10 + $0x4] sm:$0xf] %vm334_vm6, %v423_v50  ;;  %335 = vst.msk [vmem:[%s197_s10] sm:$0xf] %vm334_vm6, %v333_v51 }
 0x2cf PF: > { %s14_s15 = sadd.s32 1, %s598_s15  }
 0x2d0   : > { %p11_p4 = scmp.ge.s32.totalorder %s14_s15, 4  }
 0x2d2   :  { %13 = sbr.rel (!%p11_p4) target bundleno = 1 (0x1), region = 68 }

// kernel: forward.16
= control target key start
LH: loop header
LB: loop body
LE: loop exit
PB: predicated region body
PF: predicated region fallthrough
CT: control target
= control target key end

     0   :  { %s1393_s30 = smov 0   ;;  %s1548_s0 = inlined_call_operand.vmem [shape: bf16[2,11,32], index: 0, kind: input, shape index: {}]   ;;  %s1549_s1 = inlined_call_operand.vmem [shape: f32[8,33], index: 1, kind: input, shape index: {}]   ;;  %s1550_s2 = inlined_call_operand.vmem [shape: f32[8,1], index: 2, kind: input, shape index: {}]   ;;  %s1551_s3 = inlined_call_operand.vmem [shape: f32[2,8,40], index: 3, kind: input, shape index: {}]   ;;  %s1552_s4 = inlined_call_operand.vmem [shape: f32[2,8,1], index: 4, kind: input, shape index: {}]   ;;  %s1553_s5 = inlined_call_operand.vmem [shape: f32[2,8,1], index: 5, kind: input, shape index: {}]   ;;  %s1554_s6 = inlined_call_operand.vmem [shape: f32[2,8,40], index: 6, kind: input, shape index: {}]   ;;  %s1555_s7 = inlined_call_operand.vmem [shape: f32[2,8,1], index: 7, kind: input, shape index: {}]   ;;  %s1556_s8 = inlined_call_operand.vmem [shape: f32[2,8,1], index: 8, kind: input, shape index: {}]   ;;  %s1557_s9 = inlined_call_operand.vmem [shape: bf16[2,8,32], index: 9, kind: output, shape index: {}]  }
   0x1 LB: > { %s1100_s10 = sadd.s32 4294967295, %s1328_s30   ;;  %p1104_p0 = scmp.ge.s32.totalorder %s1328_s30, 1  ;;  %s1328_s30 = sphi %s1393_s30, %s19_s30  }
   0x2   : > { %p287_p1 = scmp.lt.s32.totalorder %s1328_s30, 3 }
   0x4   : > { %p288_p2 = pnand %p1104_p0, %p287_p1 }
   0x5   : > { %p322_p3 = scmp.lt.s32.totalorder (!%p288_p2), %s1100_s10, 1  ;;  %v1330_v0 = vmov (!%p288_p2), 0.0|0.0   ;;  %s1331_s15 = smov (!%p288_p2), 1   ;;  %vm345_vm0 = vcmask (!%p288_p2), 7168   ;;  %vm1332_vm1 = vmmov (!%p288_p2), 0   ;;  %v1333_v7 = vmov (!%p288_p2), 0.0  }
   0x6   : > { %291 = sbr.rel (%p288_p2) target bundleno = 1420 (0x58c), region = 56  ;;  %1242 = vmatprep.subr.bf16.mxu1 (!%p288_p2), %v1330_v0  ;;  %1238 = vmatprep.subr.bf16.mxu0 (!%p288_p2), %v1330_v0  ;;  %vm348_vm2 = vcmask (!%p288_p2), 269312   ;;  %vm364_vm3 = vcmask (!%p288_p2), 1042432   ;;  %s1334_s16 = smov (!%p288_p2), 126   ;;  %vm361_vm5 = vcmask (!%p288_p2), 89088   ;;  %v335_v16 = vld [vmem:[%s1549_s1] sm:$0xff] (!%p288_p2) }
   0x7   : > { %1169 = vmatprep.mubr.msk.f32.mxu0 (!%p288_p2), %vm1332_vm1, %v1333_v7  ;;  %1176 = vmatprep.mubr.msk.f32.mxu1 (!%p288_p2), %vm1332_vm1, %v1333_v7  ;;  %vm1244_vm4 = vmpackc.low (!%p288_p2), %vm364_vm3, %vm348_vm2  ;;  %s1335_s17 = smov (!%p288_p2), 127   ;;  %v1336_v17 = vmov (!%p288_p2), 0   ;;  %s1337_s20 = smov (!%p288_p2), 117   ;;  %v336_v18 = vld [vmem:[%s1550_s2] sm:$0xff] (!%p288_p2)  ;;  %v1119_v20 = vld [vmem:[%s1553_s5 + $0x8] sm:$0xff] (!%p288_p2)  ;;  %vm1339_vm6 = vmmov (!%p288_p2), 1  }
   0x8   : > { %1320 = vset.pattern.permute.xlu1 (!%p288_p2), %v1336_v17  ;;  %1321 = vset.pattern.permute.xlu0 (!%p288_p2), %v1336_v17  ;;  %s1338_s21 = smov (!%p288_p2), 106   ;;  %v599_v19 = vld [vmem:[%s1553_s5] sm:$0xff] (!%p288_p2)  ;;  %vm1240_vm7 = vmpackc.low (!%p288_p2), %vm364_vm3, %vm1339_vm6  ;;  %s1340_s28 = smov (!%p288_p2), 2   ;;  %vm614_vm9 = vcmask (!%p288_p2), 15360   ;;  %vm616_vm10 = vcmask (!%p288_p2), 277504   ;;  %v1124_v55 = vld [vmem:[%s1556_s8 + $0x8] sm:$0xff] (!%p288_p2) }
   0x9   : > { %s1341_s29 = smov (!%p288_p2), 124   ;;  %v710_v53 = vld [vmem:[%s1556_s8] sm:$0xff] (!%p288_p2)  ;;  %v1121_v56 = vld [vmem:[%s1552_s4 + $0x8] sm:$0xff] (!%p288_p2)  ;;  %vm1477_vm11 = vmpackc.low (!%p288_p2), %vm1339_vm6, %vm616_vm10  ;;  %vm636_vm12 = vcmask (!%p288_p2), 326656   ;;  %vm1045_vm15 = vcmask (!%p288_p2), 257024  }
   0xa   : > { %v609_v54 = vld [vmem:[%s1552_s4] sm:$0xff] (!%p288_p2) }
   0xd   : > { %s1561_s10 = smov (!%p322_p3, %s1100_s10), 1 }
   0xe   : > { %s1131_s11 = sshll.u32 %s1561_s10, 3  ;;  %s1107_s13 = sshll.u32 %s1561_s10, 2 }
   0xf   : > { %s326_s14 = scalar_lea.vmem %s1548_s0, %s1131_s11  ;;  %s1342_s11 = smov 125  }
  0x10   : > { %v331_v1 = vld [vmem:[%s326_s14] sm:$0xf]  ;;  %v332_v2 = vld [vmem:[%s326_s14 + $0x4] sm:$0x3]  ;;  %s330_s18 = scalar_lea.vmem %s1557_s9, %s1107_s13 }
  0x11   : > { %v333_v3 = vunpack.c.l.bf16 %v331_v1  ;;  %v334_v4 = vunpack.c.l.bf16 %v332_v2  ;;  %v608_v2 = vld [vmem:[%s1551_s3] sm:$0xff] }
  0x13   : > { %v1305_v5 = vpack.i.bf16 %v334_v4, %v333_v3 }
  0x15   : > { %1306 = vrot.lane.b32.xlu0 %v1305_v5, %s1331_s15 }
  0x87   : > { %v1307_v6 = vpop.permute.xlu0 %1306 }
  0x88   : > { %v1309_v8 = vunpack.i.h.bf16 %v1307_v6  ;;  %v1308_v9 = vunpack.i.l.bf16 %v1307_v6 }
  0x8a   : > { %v347_v10 = vsel %vm345_vm0, 0.0, %v1309_v8  ;;  %v346_v11 = vsel %vm345_vm0, 0.0, %v1308_v9  ;;  %v1120_v8 = vld [vmem:[%s1551_s3 + $0x8] sm:$0xff] }
  0x8b   : > { %v350_v12 = vsel %vm348_vm2, %v347_v10, 0.0  ;;  %v349_v13 = vsel %vm348_vm2, %v346_v11, 0.0 }
  0x8c   : > { %v1243_v14 = vpack.c.bf16 %v350_v12, %v346_v11  ;;  %v1315_v15 = vpack.i.bf16 %v350_v12, %v349_v13 }
  0x8e   : > { %1245 = vmatpush3.bf16.msk.msra.mxu1 %vm1244_vm4, %v1243_v14  ;;  %1316 = vrot.lane.b32.xlu1 %v1315_v15, %s1334_s16 }
  0x8f   : > { %1311 = vrot.lane.b32.xlu0 %v1315_v15, %s1335_s17  ;;  %1250 = vmatprep.subr.bf16.mxu1 %v1330_v0 }
  0x91   : > { %1177 = vmatmul.mubr.msk.f32.vlgmr.msra.gmra.mrb[0].mxu1 %vm361_vm5, %v335_v16 }
  0x92   : > { %352 = vrot.lane.b32.xlu1 %v335_v16, %s1337_s20  ;;  %1196 = vmatprep.mubr.msk.f32.mxu1 %vm1332_vm1, %v1333_v7 }
  0x93   : > { %511 = vrot.lane.b32.xlu0 %v335_v16, %s1338_s21 }
  0x96   : > { %595 = vperm.xlu1 %1320, %v336_v18  }
  0x97   : > { %603 = vperm.xlu0 %1321, %v599_v19  }
  0x9a   : > { %824 = vperm.xlu1 %1320, %v1119_v20  }
 0x100   : > { %v1317_v21 = vpop.permute.xlu1 %1316 }
 0x101   : > { %v1312_v22 = vpop.permute.xlu0 %1311  ;;  %v1319_v25 = vunpack.i.h.bf16 %v1317_v21  ;;  %v1318_v26 = vunpack.i.l.bf16 %v1317_v21 }
 0x102   : > { %v1314_v23 = vunpack.i.h.bf16 %v1312_v22  ;;  %v1313_v24 = vunpack.i.l.bf16 %v1312_v22 }
 0x103   : > { %v1247_v29 = vpack.c.bf16 %v1319_v25, %v1318_v26 }
 0x104   : > { %v1239_v27 = vpack.c.bf16 %v1314_v23, %v1313_v24  ;;  %v353_v28 = vpop.permute.xlu1 %352 }
 0x105   : > { %v512_v30 = vpop.permute.xlu0 %511 }
 0x106   : > { %1241 = vmatpush3.bf16.msk.msra.mxu0 %vm1240_vm7, %v1239_v27 }
 0x107   : > { %1246 = vmatprep.subr.bf16.mxu0 %v1330_v0 }
 0x109   : > { %1170 = vmatmul.mubr.msk.f32.vlgmr.msra.gmra.mrb[0].mxu0 %vm361_vm5, %v353_v28 }
 0x10a   : > { %1249 = vmatpush3.bf16.msk.msra.mxu0 %vm1240_vm7, %v1247_v29  ;;  %1183 = vmatprep.mubr.msk.f32.mxu0 %vm1332_vm1, %v1333_v7 }
 0x10b   : > { %1257 = vmatprep.subr.bf16.mxu0 %v1330_v0 }
 0x10d   : > { %1184 = vmatmul.mubr.msk.f32.vlgmr.msra.gmra.mrb[2].mxu0 %vm361_vm5, %v512_v30  ;;  %v1126_v30 = vld [vmem:[%s1555_s7 + $0x8] sm:$0xff] }
 0x10e   : > { %1209 = vmatprep.mubr.msk.f32.mxu0 %vm1332_vm1, %v1333_v7 }
 0x115   : > { %v596_v36 = vpop.permute.xlu1 %595 }
 0x116   : > { %v604_v40 = vpop.permute.xlu0 %603 }
 0x119   : > { %v825_v42 = vpop.permute.xlu1 %824 }
 0x164   : > { %v507_v31 = vpop.f32.mrb[0].mxu1 }
 0x165   : > { %v1178_v32 = vpop.f32.mrb[1].mxu1 }
 0x1dc   : > { %v433_v33 = vpop.f32.mrb[0].mxu0 }
 0x1dd   : > { %v508_v34 = vadd.f32 %v507_v31, %v433_v33  ;;  %v1171_v35 = vpop.f32.mrb[1].mxu0  ;;  %v720_v31 = vld [vmem:[%s1555_s7] sm:$0xff] }
 0x1e0   : > { %v588_v37 = vpop.f32.mrb[2].mxu0 }
 0x1e1   : > { %v592_v38 = vadd.f32 %v588_v37, %v508_v34  ;;  %v1185_v39 = vpop.f32.mrb[3].mxu0  ;;  %v719_v37 = vld [vmem:[%s1554_s6] sm:$0xff] }
 0x1e3   : > { %v1442_v41 = vadd.f32 %v596_v36, %v592_v38 }
 0x1e5   : > { %v827_v43 = vmul.f32 %v825_v42, %v1442_v41  ;;  %v606_v44 = vmul.f32 %v604_v40, %v1442_v41  ;;  %vm600_vm8 = vcmp.ge.f32.partialorder %v1442_v41, 0.0 }
 0x1e7   : > { %v828_v45 = vsel %vm600_vm8, %v1442_v41, %v827_v43  ;;  %v607_v46 = vsel %vm600_vm8, %v1442_v41, %v606_v44 }
 0x1e8   : > { %834 = vrot.lane.b32.xlu0 %v828_v45, %s1340_s28  ;;  %611 = vrot.lane.b32.xlu1 %v607_v46, %s1340_s28  ;;  %v1125_v45 = vld [vmem:[%s1554_s6 + $0x8] sm:$0xff] }
 0x25a   : > { %v612_v47 = vpop.permute.xlu1 %611  ;;  %v835_v50 = vpop.permute.xlu0 %834 }
 0x25b   : > { %v615_v48 = vsel %vm614_vm9, 0.0, %v612_v47  ;;  %v837_v51 = vsel %vm614_vm9, 0.0, %v835_v50 }
 0x25c   : > { %v617_v49 = vsel %vm616_vm10, %v615_v48, 0.0  ;;  %v838_v52 = vsel %vm616_vm10, %v837_v51, 0.0 }
 0x25d   : > { %622 = vrot.lane.b32.xlu0 %v617_v49, %s1334_s16  ;;  %619 = vrot.lane.b32.xlu1 %v617_v49, %s1335_s17 }
 0x261   : > { %628 = vrot.lane.b32.xlu0 %v617_v49, %s1341_s29  ;;  %625 = vrot.lane.b32.xlu1 %v617_v49, %s1342_s11 }
 0x265   : > { %843 = vrot.lane.b32.xlu0 %v838_v52, %s1334_s16  ;;  %840 = vrot.lane.b32.xlu1 %v838_v52, %s1335_s17 }
 0x269   : > { %849 = vrot.lane.b32.xlu0 %v838_v52, %s1341_s29  ;;  %846 = vrot.lane.b32.xlu1 %v838_v52, %s1342_s11 }
 0x26d   : > { %714 = vperm.xlu0 %1321, %v710_v53   ;;  %633 = vperm.xlu1 %1320, %v609_v54  }
 0x271   : > { %935 = vperm.xlu0 %1321, %v1124_v55   ;;  %854 = vperm.xlu1 %1320, %v1121_v56  }
 0x2cf   : > { %v620_v58 = vpop.permute.xlu1 %619  ;;  %v623_v60 = vpop.permute.xlu0 %622 }
 0x2d0   : > { %v1251_v59 = vpack.c.bf16 %v620_v58, %v615_v48  ;;  %v1278_v48 = vadd.f32 %v1442_v41, %v1442_v41 }
 0x2d2   : > { %1253 = vmatpush3.bf16.msk.msra.mxu1 %vm1477_vm11, %v1251_v59 }
 0x2d3   : > { %v626_v61 = vpop.permute.xlu1 %625  ;;  %1254 = vmatprep.subr.bf16.mxu1 %v1330_v0  ;;  %v629_v63 = vpop.permute.xlu0 %628 }
 0x2d4   : > { %v1255_v62 = vpack.c.bf16 %v626_v61, %v623_v60 }
 0x2d6   : > { %1256 = vmatpush3.bf16.msra.mxu1 %v1255_v62 }
 0x2d7   : > { %v841_v1 = vpop.permute.xlu1 %840  ;;  %1194 = vmatprep.subr.mxu1 %v1333_v7  ;;  %v844_v5 = vpop.permute.xlu0 %843 }
 0x2d8   : > { %v1265_v3 = vpack.c.bf16 %v841_v1, %v837_v51 }
 0x2da   : > { %1195 = vmatpush3.msra.mxu1 %v629_v63 }
 0x2db   : > { %1197 = vmatmul.mubr.msk.f32.vlgmr.msra.gmra.mrb[2].mxu1 %vm636_vm12, %v608_v2  ;;  %1264 = vmatprep.subr.bf16.mxu1 %v1330_v0  ;;  %v847_v4 = vpop.permute.xlu1 %846  ;;  %v850_v9 = vpop.permute.xlu0 %849 }
 0x2dc   : > { %1267 = vmatpush3.bf16.msk.msra.mxu1 %vm1477_vm11, %v1265_v3  ;;  %1222 = vmatprep.mubr.msk.f32.mxu1 %vm1332_vm1, %v1333_v7  ;;  %v1269_v6 = vpack.c.bf16 %v847_v4, %v844_v5 }
 0x2dd   : > { %1268 = vmatprep.subr.bf16.mxu1 %v1330_v0 }
 0x2e0   : > { %1270 = vmatpush3.bf16.msra.mxu1 %v1269_v6 }
 0x2e1   : > { %1220 = vmatprep.subr.mxu1 %v1333_v7 }
 0x2e4   : > { %1221 = vmatpush3.msra.mxu1 %v850_v9 }
 0x2e5   : > { %1223 = vmatmul.mubr.msk.f32.vlgmr.msra.gmra.mrb[4].mxu1 %vm636_vm12, %v1120_v8 }
 0x2ec   : > { %v634_v10 = vpop.permute.xlu1 %633  ;;  %v715_v14 = vpop.permute.xlu0 %714 }
 0x2f0   : > { %v855_v17 = vpop.permute.xlu1 %854  ;;  %v936_v21 = vpop.permute.xlu0 %935 }
 0x3ae   : > { %v706_v11 = vpop.f32.mrb[2].mxu1 }
 0x3af   : > { %v707_v12 = vadd.f32 %v706_v11, %v634_v10  ;;  %v1198_v13 = vpop.f32.mrb[3].mxu1 }
 0x3b1   : > { %v717_v15 = vmul.f32 %v715_v14, %v707_v12  ;;  %vm711_vm13 = vcmp.ge.f32.partialorder %v707_v12, 0.0 }
 0x3b3   : > { %v718_v16 = vsel %vm711_vm13, %v707_v12, %v717_v15 }
 0x3b4   : > { %722 = vrot.lane.b32.xlu1 %v718_v16, %s1340_s28 }
 0x3b8   : > { %v926_v18 = vpop.f32.mrb[4].mxu1 }
 0x3b9   : > { %v927_v19 = vadd.f32 %v926_v18, %v855_v17  ;;  %v1224_v20 = vpop.f32.mrb[5].mxu1 }
 0x3bb   : > { %v938_v22 = vmul.f32 %v936_v21, %v927_v19  ;;  %vm932_vm14 = vcmp.ge.f32.partialorder %v927_v19, 0.0 }
 0x3bd   : > { %v939_v23 = vsel %vm932_vm14, %v927_v19, %v938_v22 }
 0x3be   : > { %945 = vrot.lane.b32.xlu0 %v939_v23, %s1340_s28 }
 0x426   : > { %v723_v24 = vpop.permute.xlu1 %722 }
 0x427   : > { %v725_v25 = vsel %vm614_vm9, 0.0, %v723_v24 }
 0x428   : > { %v726_v26 = vsel %vm616_vm10, %v725_v25, 0.0 }
 0x429   : > { %731 = vrot.lane.b32.xlu0 %v726_v26, %s1334_s16  ;;  %728 = vrot.lane.b32.xlu1 %v726_v26, %s1335_s17 }
 0x42d   : > { %737 = vrot.lane.b32.xlu0 %v726_v26, %s1341_s29  ;;  %734 = vrot.lane.b32.xlu1 %v726_v26, %s1342_s11 }
 0x430   : > { %v946_v27 = vpop.permute.xlu0 %945 }
 0x431   : > { %v948_v28 = vsel %vm614_vm9, 0.0, %v946_v27 }
 0x432   : > { %v949_v29 = vsel %vm616_vm10, %v948_v28, 0.0 }
 0x433   : > { %954 = vrot.lane.b32.xlu0 %v949_v29, %s1334_s16  ;;  %951 = vrot.lane.b32.xlu1 %v949_v29, %s1335_s17 }
 0x437   : > { %960 = vrot.lane.b32.xlu0 %v949_v29, %s1341_s29  ;;  %957 = vrot.lane.b32.xlu1 %v949_v29, %s1342_s11 }
 0x43b   : > { %965 = vperm.xlu0 %1321, %v1126_v30   ;;  %742 = vperm.xlu1 %1320, %v720_v31  }
 0x49b   : > { %v729_v32 = vpop.permute.xlu1 %728  ;;  %v732_v34 = vpop.permute.xlu0 %731 }
 0x49c   : > { %v1258_v33 = vpack.c.bf16 %v729_v32, %v725_v25 }
 0x49e   : > { %1260 = vmatpush3.bf16.msk.msra.mxu0 %vm1477_vm11, %v1258_v33 }
 0x49f   : > { %v735_v35 = vpop.permute.xlu1 %734  ;;  %1261 = vmatprep.subr.bf16.mxu0 %v1330_v0  ;;  %v738_v38 = vpop.permute.xlu0 %737 }
 0x4a0   : > { %v1262_v36 = vpack.c.bf16 %v735_v35, %v732_v34 }
 0x4a2   : > { %1263 = vmatpush3.bf16.msra.mxu0 %v1262_v36 }
 0x4a3   : > { %1207 = vmatprep.subr.mxu0 %v1333_v7 }
 0x4a5   : > { %v952_v39 = vpop.permute.xlu1 %951  ;;  %v955_v42 = vpop.permute.xlu0 %954 }
 0x4a6   : > { %v1272_v40 = vpack.c.bf16 %v952_v39, %v948_v28  ;;  %1208 = vmatpush3.msra.mxu0 %v738_v38 }
 0x4a7   : > { %1271 = vmatprep.subr.bf16.mxu0 %v1330_v0  ;;  %1210 = vmatmul.mubr.msk.f32.vlgmr.msra.gmra.mrb[4].mxu0 %vm636_vm12, %v719_v37 }
 0x4a8   : > { %1274 = vmatpush3.bf16.msk.msra.mxu0 %vm1477_vm11, %v1272_v40  ;;  %1235 = vmatprep.mubr.msk.f32.mxu0 %vm1332_vm1, %v1333_v7 }
 0x4a9   : > { %v958_v43 = vpop.permute.xlu1 %957  ;;  %1275 = vmatprep.subr.bf16.mxu0 %v1330_v0  ;;  %v961_v46 = vpop.permute.xlu0 %960 }
 0x4aa   : > { %v1276_v44 = vpack.c.bf16 %v958_v43, %v955_v42 }
 0x4ac   : > { %1277 = vmatpush3.bf16.msra.mxu0 %v1276_v44 }
 0x4ad   : > { %1233 = vmatprep.subr.mxu0 %v1333_v7 }
 0x4b0   : > { %1234 = vmatpush3.msra.mxu0 %v961_v46 }
 0x4b1   : > { %1236 = vmatmul.mubr.msk.f32.vlgmr.msra.gmra.mrb[4].mxu0 %vm636_vm12, %v1125_v45 }
 0x4ba   : > { %v743_v47 = vpop.permute.xlu1 %742  ;;  %v966_v50 = vpop.permute.xlu0 %965 }
 0x4bb   : > { %v1279_v49 = vadd.f32 %v1278_v48, %v743_v47 }
 0x4bd   : > { %v1280_v51 = vadd.f32 %v1279_v49, %v966_v50 }
 0x584   : > { %v1037_v0 = vpop.f32.mrb[4].mxu0 }
 0x585   : > { %v1281_v52 = vadd.f32 %v1280_v51, %v1037_v0  ;;  %v1237_v53 = vpop.f32.mrb[5].mxu0 }
 0x587   : > { %v1043_v7 = vmul.f32 0.5, %v1281_v52 }
 0x589   : > { %v1044_v54 = vpack.c.bf16 %v1043_v7, %v1043_v7 }
 0x58b   : > { %1046 = vst.msk [vmem:[%s330_s18] sm:$0xf] %vm1045_vm15, %v1044_v54 }
 0x58c PF: > { %s19_s30 = sadd.s32 1, %s1328_s30  }
 0x58d   : > { %p16_p4 = scmp.ge.s32.totalorder %s19_s30, 4  }
 0x58f   :  { %18 = sbr.rel (!%p16_p4) target bundleno = 1 (0x1), region = 92 }

// kernel: forward.18
= control target key start
LH: loop header
LB: loop body
LE: loop exit
PB: predicated region body
PF: predicated region fallthrough
CT: control target
= control target key end

     0   :  { %s2647_s30 = smov 0   ;;  %s2881_s0 = inlined_call_operand.vmem [shape: bf16[2,7,64], index: 0, kind: input, shape index: {}]   ;;  %s2882_s1 = inlined_call_operand.vmem [shape: f32[4,21], index: 1, kind: input, shape index: {}]   ;;  %s2883_s2 = inlined_call_operand.vmem [shape: f32[4,1], index: 2, kind: input, shape index: {}]   ;;  %s2884_s3 = inlined_call_operand.vmem [shape: f32[2,4,20], index: 3, kind: input, shape index: {}]   ;;  %s2885_s4 = inlined_call_operand.vmem [shape: f32[2,4,1], index: 4, kind: input, shape index: {}]   ;;  %s2886_s5 = inlined_call_operand.vmem [shape: f32[2,4,1], index: 5, kind: input, shape index: {}]   ;;  %s2887_s6 = inlined_call_operand.vmem [shape: f32[2,4,20], index: 6, kind: input, shape index: {}]   ;;  %s2888_s7 = inlined_call_operand.vmem [shape: f32[2,4,1], index: 7, kind: input, shape index: {}]   ;;  %s2889_s8 = inlined_call_operand.vmem [shape: f32[2,4,1], index: 8, kind: input, shape index: {}]   ;;  %s2890_s9 = inlined_call_operand.vmem [shape: bf16[2,4,64], index: 9, kind: output, shape index: {}]  }
   0x1 LB: > { %s2307_s10 = sadd.s32 4294967295, %s2581_s30   ;;  %p2311_p0 = scmp.ge.s32.totalorder %s2581_s30, 1  ;;  %s2581_s30 = sphi %s2647_s30, %s19_s30  }
   0x2   : > { %p286_p1 = scmp.lt.s32.totalorder %s2581_s30, 3 }
   0x4   : > { %p287_p2 = pnand %p2311_p0, %p286_p1 }
   0x5   : > { %p320_p3 = scmp.lt.s32.totalorder (!%p287_p2), %s2307_s10, 1  ;;  %v330_v0 = vld [vmem:[%s2882_s1] sm:$0xf] (!%p287_p2)  ;;  %s2583_s13 = smov (!%p287_p2), 121   ;;  %v2584_v1 = vmov (!%p287_p2), 0.0   ;;  %vm2586_vm0 = vmmov (!%p287_p2), 0  }
   0x6   : > { %290 = sbr.rel (%p287_p2) target bundleno = 1469 (0x5bd), region = 56  ;;  %341 = vrot.lane.b32.xlu1 (!%p287_p2), %v330_v0, %s2583_s13  ;;  %2414 = vmatprep.subr.mxu1 (!%p287_p2), %v2584_v1  ;;  %s2585_s18 = smov (!%p287_p2), 1   ;;  %vm336_vm1 = vcmask (!%p287_p2), 7168   ;;  %vm338_vm2 = vcmask (!%p287_p2), 531456   ;;  %v2587_v5 = vmov (!%p287_p2), 0   ;;  %vm349_vm3 = vcmask (!%p287_p2), 1046528  }
   0x7   : > { %2434 = vmatprep.subr.mxu0 (!%p287_p2), %v2584_v1  ;;  %2416 = vmatprep.mubr.msk.f32.mxu1 (!%p287_p2), %vm2586_vm0, %v2584_v1  ;;  %s2588_s19 = smov (!%p287_p2), 126   ;;  %s2589_s20 = smov (!%p287_p2), 127   ;;  %v331_v8 = vld [vmem:[%s2883_s2] sm:$0xf] (!%p287_p2)  ;;  %v2340_v9 = vld [vmem:[%s2886_s5 + $0x4] sm:$0xf] (!%p287_p2) }
   0x8   : > { %2436 = vmatprep.mubr.msk.f32.mxu0 (!%p287_p2), %vm2586_vm0, %v2584_v1  ;;  %2573 = vset.pattern.permute.xlu1 (!%p287_p2), %v2587_v5  ;;  %s2590_s23 = smov (!%p287_p2), 114   ;;  %v581_v10 = vld [vmem:[%s2886_s5] sm:$0xf] (!%p287_p2)  ;;  %vm346_vm4 = vcmask (!%p287_p2), 56320   ;;  %s2591_s28 = smov (!%p287_p2), 2   ;;  %vm596_vm6 = vcmask (!%p287_p2), 15360  }
   0x9   : > { %2574 = vset.pattern.permute.xlu0 (!%p287_p2), %v2587_v5  ;;  %v590_v31 = vld [vmem:[%s2884_s3] sm:$0xf] (!%p287_p2)  ;;  %s2592_s12 = smov (!%p287_p2), 124   ;;  %s2593_s13 = smov (!%p287_p2), 120   ;;  %v2709_v32 = vld [vmem:[%s2884_s3 + $0x4] sm:$0xf] (!%p287_p2) }
   0xa   : > { %s2595_s15 = smov (!%p287_p2), 112   ;;  %v999_v33 = vld [vmem:[%s2889_s8] sm:$0xf] (!%p287_p2)  ;;  %v2353_v34 = vld [vmem:[%s2889_s8 + $0x4] sm:$0xf] (!%p287_p2)  ;;  %vm598_vm7 = vcmask (!%p287_p2), 539648  }
   0xb   : > { %vm609_vm8 = vcmask (!%p287_p2), 1043456   ;;  %vm606_vm9 = vcmask (!%p287_p2), 31744   ;;  %s2596_s24 = smov (!%p287_p2), 125   ;;  %v591_v41 = vld [vmem:[%s2885_s4] sm:$0xf] (!%p287_p2)  ;;  %vm2252_vm12 = vcmask (!%p287_p2), 517120  }
   0xc   : > { %v2342_v42 = vld [vmem:[%s2885_s4 + $0x4] sm:$0xf] (!%p287_p2) }
   0xd   : > { %s2892_s10 = smov (!%p320_p3, %s2307_s10), 1 }
   0xe   : > { %s2312_s14 = sshll.u32 %s2892_s10, 2 }
   0xf   : > { %s323_s17 = scalar_lea.vmem %s2881_s0, %s2312_s14  ;;  %s2594_s14 = smov 116  }
  0x10   : > { %v328_v2 = vld [vmem:[%s323_s17] sm:$0xf] }
  0x11   : > { %v329_v3 = vunpack.c.l.bf16 %v328_v2 }
  0x13   : > { %333 = vrot.lane.b32.xlu0 %v329_v3, %s2585_s18 }
  0x78   : > { %v342_v11 = vpop.permute.xlu1 %341 }
  0x85   : > { %v334_v4 = vpop.permute.xlu0 %333 }
  0x86   : > { %v337_v6 = vsel %vm336_vm1, 0.0, %v334_v4 }
  0x87   : > { %v339_v7 = vsel %vm338_vm2, %v337_v6, 0.0 }
  0x88   : > { %498 = vrot.lane.b32.xlu1 %v339_v7, %s2588_s19  ;;  %344 = vrot.lane.b32.xlu0 %v339_v7, %s2589_s20 }
  0x8c   : > { %496 = vrot.lane.b32.xlu0 %v330_v0, %s2590_s23  ;;  %577 = vperm.xlu1 %2573, %v331_v8  }
  0x90   : > { %1419 = vperm.xlu1 %2573, %v2340_v9   ;;  %585 = vperm.xlu0 %2574, %v581_v10  }
  0xfa   : > { %v345_v12 = vpop.permute.xlu0 %344  ;;  %v499_v13 = vpop.permute.xlu1 %498 }
  0xfb   : > { %2415 = vmatpush3.msk.msra.mxu1 %vm349_vm3, %v345_v12 }
  0xfc   : > { %2417 = vmatmul.mubr.msk.f32.vlgmr.msra.gmra.mrb[0].mxu1 %vm346_vm4, %v342_v11  ;;  %2419 = vmatprep.subr.mxu1 %v2584_v1 }
  0xfd   : > { %2420 = vmatpush3.msk.msra.mxu1 %vm349_vm3, %v339_v7  ;;  %2421 = vmatprep.mubr.msk.f32.mxu1 %vm2586_vm0, %v2584_v1 }
  0xfe   : > { %2424 = vmatprep.subr.mxu1 %v2584_v1  ;;  %v497_v14 = vpop.permute.xlu0 %496 }
 0x100   : > { %2422 = vmatmul.mubr.msk.f32.vlgmr.msra.gmra.mrb[2].mxu1 %vm346_vm4, %v330_v0 }
 0x101   : > { %2425 = vmatpush3.msk.msra.mxu1 %vm349_vm3, %v499_v13  ;;  %2426 = vmatprep.mubr.msk.f32.mxu1 %vm2586_vm0, %v2584_v1 }
 0x102   : > { %2429 = vmatprep.subr.mxu1 %v2584_v1 }
 0x104   : > { %2427 = vmatmul.mubr.msk.f32.vlgmr.msra.gmra.mrb[4].mxu1 %vm346_vm4, %v497_v14 }
 0x105   : > { %2431 = vmatprep.mubr.msk.f32.mxu1 %vm2586_vm0, %v2584_v1 }
 0x10b   : > { %v578_v20 = vpop.permute.xlu1 %577 }
 0x10f   : > { %v586_v24 = vpop.permute.xlu0 %585  ;;  %v1420_v26 = vpop.permute.xlu1 %1419 }
 0x1cf   : > { %v418_v15 = vpop.f32.mrb[0].mxu1 }
 0x1d0   : > { %v2418_v16 = vpop.f32.mrb[1].mxu1 }
 0x1d3   : > { %v492_v17 = vpop.f32.mrb[2].mxu1 }
 0x1d4   : > { %v493_v18 = vadd.f32 %v492_v17, %v418_v15  ;;  %v2423_v19 = vpop.f32.mrb[3].mxu1 }
 0x1d7   : > { %v570_v21 = vpop.f32.mrb[4].mxu1 }
 0x1d8   : > { %v574_v22 = vadd.f32 %v570_v21, %v493_v18  ;;  %v2428_v23 = vpop.f32.mrb[5].mxu1 }
 0x1da   : > { %v2690_v25 = vadd.f32 %v578_v20, %v574_v22 }
 0x1dc   : > { %v1422_v27 = vmul.f32 %v1420_v26, %v2690_v25  ;;  %v588_v28 = vmul.f32 %v586_v24, %v2690_v25  ;;  %vm582_vm5 = vcmp.ge.f32.partialorder %v2690_v25, 0.0 }
 0x1de   : > { %v1423_v29 = vsel %vm582_vm5, %v2690_v25, %v1422_v27  ;;  %v589_v30 = vsel %vm582_vm5, %v2690_v25, %v588_v28 }
 0x1df   : > { %1429 = vrot.lane.b32.xlu0 %v1423_v29, %s2591_s28  ;;  %593 = vrot.lane.b32.xlu1 %v589_v30, %s2591_s28 }
 0x1e3   : > { %601 = vrot.lane.b32.xlu0 %v590_v31, %s2592_s12 }
 0x1e7   : > { %756 = vrot.lane.b32.xlu0 %v590_v31, %s2593_s13 }
 0x1eb   : > { %835 = vrot.lane.b32.xlu0 %v590_v31, %s2594_s14 }
 0x1ef   : > { %914 = vrot.lane.b32.xlu0 %v590_v31, %s2595_s15 }
 0x1f3   : > { %1435 = vrot.lane.b32.xlu0 %v2709_v32, %s2592_s12 }
 0x1f7   : > { %1588 = vrot.lane.b32.xlu0 %v2709_v32, %s2593_s13 }
 0x1fb   : > { %1667 = vrot.lane.b32.xlu0 %v2709_v32, %s2594_s14 }
 0x1ff   : > { %1746 = vrot.lane.b32.xlu0 %v2709_v32, %s2595_s15 }
 0x203   : > { %1003 = vperm.xlu0 %2574, %v999_v33  }
 0x207   : > { %1836 = vperm.xlu0 %2574, %v2353_v34  }
 0x251   : > { %v594_v35 = vpop.permute.xlu1 %593  ;;  %v1430_v38 = vpop.permute.xlu0 %1429 }
 0x252   : > { %v597_v36 = vsel %vm596_vm6, 0.0, %v594_v35  ;;  %v1432_v39 = vsel %vm596_vm6, 0.0, %v1430_v38  ;;  %v1008_v35 = vld [vmem:[%s2887_s6] sm:$0xf] }
 0x253   : > { %v599_v37 = vsel %vm598_vm7, %v597_v36, 0.0  ;;  %v1433_v40 = vsel %vm598_vm7, %v1432_v39, 0.0  ;;  %v2354_v36 = vld [vmem:[%s2887_s6 + $0x4] sm:$0xf] }
 0x254   : > { %604 = vrot.lane.b32.xlu1 %v599_v37, %s2589_s20  ;;  %2435 = vmatpush3.msk.msra.mxu0 %vm609_vm8, %v599_v37 }
 0x255   : > { %2437 = vmatmul.mubr.msk.f32.vlgmr.msra.gmra.mrb[0].mxu0 %vm606_vm9, %v590_v31  ;;  %2444 = vmatprep.subr.mxu0 %v2584_v1  ;;  %v602_v43 = vpop.permute.xlu0 %601 }
 0x256   : > { %2446 = vmatprep.mubr.msk.f32.mxu0 %vm2586_vm0, %v2584_v1 }
 0x258   : > { %758 = vrot.lane.b32.xlu1 %v599_v37, %s2588_s19 }
 0x259   : > { %v757_v44 = vpop.permute.xlu0 %756 }
 0x25c   : > { %837 = vrot.lane.b32.xlu1 %v599_v37, %s2596_s24 }
 0x25d   : > { %v836_v46 = vpop.permute.xlu0 %835 }
 0x260   : > { %916 = vrot.lane.b32.xlu1 %v599_v37, %s2592_s12  ;;  %v2355_v37 = vld [vmem:[%s2888_s7 + $0x4] sm:$0xf] }
 0x261   : > { %v915_v49 = vpop.permute.xlu0 %914 }
 0x264   : > { %1438 = vrot.lane.b32.xlu1 %v1433_v40, %s2589_s20 }
 0x265   : > { %v1436_v51 = vpop.permute.xlu0 %1435 }
 0x268   : > { %1590 = vrot.lane.b32.xlu1 %v1433_v40, %s2588_s19 }
 0x269   : > { %v1589_v54 = vpop.permute.xlu0 %1588 }
 0x26c   : > { %1669 = vrot.lane.b32.xlu1 %v1433_v40, %s2596_s24 }
 0x26d   : > { %v1668_v56 = vpop.permute.xlu0 %1667 }
 0x270   : > { %1748 = vrot.lane.b32.xlu1 %v1433_v40, %s2592_s12 }
 0x271   : > { %v1747_v58 = vpop.permute.xlu0 %1746 }
 0x274   : > { %995 = vperm.xlu1 %2573, %v591_v41  }
 0x278   : > { %1827 = vperm.xlu1 %2573, %v2342_v42  }
 0x282   : > { %v1004_v12 = vpop.permute.xlu0 %1003 }
 0x2c6   : > { %v605_v45 = vpop.permute.xlu1 %604 }
 0x2c7   : > { %2430 = vmatpush3.msk.msra.mxu1 %vm609_vm8, %v605_v45 }
 0x2c8   : > { %2432 = vmatmul.mubr.msk.f32.vlgmr.msra.gmra.mrb[6].mxu1 %vm606_vm9, %v602_v43  ;;  %2439 = vmatprep.subr.mxu1 %v2584_v1 }
 0x2c9   : > { %2441 = vmatprep.mubr.msk.f32.mxu1 %vm2586_vm0, %v2584_v1 }
 0x2ca   : > { %v759_v47 = vpop.permute.xlu1 %758 }
 0x2cb   : > { %2440 = vmatpush3.msk.msra.mxu1 %vm609_vm8, %v759_v47 }
 0x2cc   : > { %2442 = vmatmul.mubr.msk.f32.vlgmr.msra.gmra.mrb[8].mxu1 %vm606_vm9, %v757_v44  ;;  %2449 = vmatprep.subr.mxu1 %v2584_v1  ;;  %v1009_v44 = vld [vmem:[%s2888_s7] sm:$0xf] }
 0x2cd   : > { %2451 = vmatprep.mubr.msk.f32.mxu1 %vm2586_vm0, %v2584_v1 }
 0x2ce   : > { %v838_v48 = vpop.permute.xlu1 %837 }
 0x2cf   : > { %2445 = vmatpush3.msk.msra.mxu0 %vm609_vm8, %v838_v48 }
 0x2d0   : > { %2447 = vmatmul.mubr.msk.f32.vlgmr.msra.gmra.mrb[2].mxu0 %vm606_vm9, %v836_v46  ;;  %2454 = vmatprep.subr.mxu0 %v2584_v1 }
 0x2d1   : > { %2456 = vmatprep.mubr.msk.f32.mxu0 %vm2586_vm0, %v2584_v1 }
 0x2d2   : > { %v917_v50 = vpop.permute.xlu1 %916 }
 0x2d3   : > { %2450 = vmatpush3.msk.msra.mxu1 %vm609_vm8, %v917_v50 }
 0x2d4   : > { %2452 = vmatmul.mubr.msk.f32.vlgmr.msra.gmra.mrb[10].mxu1 %vm606_vm9, %v915_v49  ;;  %2479 = vmatprep.subr.mxu1 %v2584_v1 }
 0x2d5   : > { %2481 = vmatprep.mubr.msk.f32.mxu1 %vm2586_vm0, %v2584_v1 }
 0x2d6   : > { %v1439_v52 = vpop.permute.xlu1 %1438 }
 0x2d7   : > { %2480 = vmatpush3.msk.msra.mxu1 %vm609_vm8, %v1439_v52 }
 0x2d8   : > { %2482 = vmatmul.mubr.msk.f32.vlgmr.msra.gmra.mrb[12].mxu1 %vm606_vm9, %v1436_v51  ;;  %2484 = vmatprep.subr.mxu1 %v2584_v1 }
 0x2d9   : > { %2485 = vmatpush3.msk.msra.mxu1 %vm609_vm8, %v1433_v40  ;;  %2486 = vmatprep.mubr.msk.f32.mxu1 %vm2586_vm0, %v2584_v1 }
 0x2da   : > { %v1591_v53 = vpop.permute.xlu1 %1590  ;;  %2489 = vmatprep.subr.mxu1 %v2584_v1 }
 0x2dc   : > { %2487 = vmatmul.mubr.msk.f32.vlgmr.msra.gmra.mrb[14].mxu1 %vm606_vm9, %v2709_v32  ;;  %v1837_v32 = vpop.permute.xlu0 %1836 }
 0x2dd   : > { %2490 = vmatpush3.msk.msra.mxu1 %vm609_vm8, %v1591_v53  ;;  %2491 = vmatprep.mubr.msk.f32.mxu1 %vm2586_vm0, %v2584_v1 }
 0x2de   : > { %v1670_v55 = vpop.permute.xlu1 %1669  ;;  %2494 = vmatprep.subr.mxu1 %v2584_v1 }
 0x2e0   : > { %2492 = vmatmul.mubr.msk.f32.vlgmr.msra.gmra.mrb[16].mxu1 %vm606_vm9, %v1589_v54 }
 0x2e1   : > { %2495 = vmatpush3.msk.msra.mxu1 %vm609_vm8, %v1670_v55  ;;  %2496 = vmatprep.mubr.msk.f32.mxu1 %vm2586_vm0, %v2584_v1 }
 0x2e2   : > { %v1749_v57 = vpop.permute.xlu1 %1748  ;;  %2499 = vmatprep.subr.mxu1 %v2584_v1 }
 0x2e4   : > { %2497 = vmatmul.mubr.msk.f32.vlgmr.msra.gmra.mrb[18].mxu1 %vm606_vm9, %v1668_v56 }
 0x2e5   : > { %2500 = vmatpush3.msk.msra.mxu1 %vm609_vm8, %v1749_v57  ;;  %2501 = vmatprep.mubr.msk.f32.mxu1 %vm2586_vm0, %v2584_v1 }
 0x2e8   : > { %2502 = vmatmul.mubr.msk.f32.vlgmr.msra.gmra.mrb[20].mxu1 %vm606_vm9, %v1747_v58 }
 0x2f3   : > { %v996_v10 = vpop.permute.xlu1 %995 }
 0x2f7   : > { %v1828_v30 = vpop.permute.xlu1 %1827 }
 0x328   : > { %v752_v59 = vpop.f32.mrb[0].mxu0 }
 0x329   : > { %v2438_v60 = vpop.f32.mrb[1].mxu0 }
 0x39b   : > { %v678_v61 = vpop.f32.mrb[6].mxu1 }
 0x39c   : > { %v753_v62 = vadd.f32 %v752_v59, %v678_v61  ;;  %v2433_v63 = vpop.f32.mrb[7].mxu1 }
 0x39f   : > { %v830_v0 = vpop.f32.mrb[8].mxu1 }
 0x3a0   : > { %v834_v2 = vadd.f32 %v830_v0, %v753_v62  ;;  %v2443_v3 = vpop.f32.mrb[9].mxu1  ;;  %v2529_v62 = vadd.f32 %v2690_v25, %v2690_v25 }
 0x3a3   : > { %v909_v4 = vpop.f32.mrb[2].mxu0 }
 0x3a4   : > { %v913_v5 = vadd.f32 %v909_v4, %v834_v2  ;;  %v2448_v6 = vpop.f32.mrb[3].mxu0 }
 0x3a7   : > { %v988_v7 = vpop.f32.mrb[10].mxu1 }
 0x3a8   : > { %v992_v8 = vadd.f32 %v988_v7, %v913_v5  ;;  %v2453_v9 = vpop.f32.mrb[11].mxu1 }
 0x3aa   : > { %v998_v11 = vadd.f32 %v996_v10, %v992_v8 }
 0x3ab   : > { %v1510_v13 = vpop.f32.mrb[12].mxu1 }
 0x3ac   : > { %vm1000_vm10 = vcmp.ge.f32.partialorder %v998_v11, 0.0  ;;  %v1006_v14 = vmul.f32 %v1004_v12, %v998_v11  ;;  %v2483_v15 = vpop.f32.mrb[13].mxu1 }
 0x3ae   : > { %v1007_v16 = vsel %vm1000_vm10, %v998_v11, %v1006_v14 }
 0x3af   : > { %1011 = vrot.lane.b32.xlu1 %v1007_v16, %s2591_s28  ;;  %v1584_v17 = vpop.f32.mrb[14].mxu1 }
 0x3b0   : > { %v1585_v18 = vadd.f32 %v1584_v17, %v1510_v13  ;;  %v2488_v19 = vpop.f32.mrb[15].mxu1 }
 0x3b3   : > { %v1662_v20 = vpop.f32.mrb[16].mxu1 }
 0x3b4   : > { %v1666_v21 = vadd.f32 %v1662_v20, %v1585_v18  ;;  %v2493_v22 = vpop.f32.mrb[17].mxu1 }
 0x3b7   : > { %v1741_v23 = vpop.f32.mrb[18].mxu1 }
 0x3b8   : > { %v1745_v24 = vadd.f32 %v1741_v23, %v1666_v21  ;;  %v2498_v26 = vpop.f32.mrb[19].mxu1 }
 0x3bb   : > { %v1820_v27 = vpop.f32.mrb[20].mxu1 }
 0x3bc   : > { %v1824_v28 = vadd.f32 %v1820_v27, %v1745_v24  ;;  %v2503_v29 = vpop.f32.mrb[21].mxu1 }
 0x3be   : > { %v1830_v31 = vadd.f32 %v1828_v30, %v1824_v28 }
 0x3c0   : > { %vm1833_vm11 = vcmp.ge.f32.partialorder %v1830_v31, 0.0  ;;  %v1839_v33 = vmul.f32 %v1837_v32, %v1830_v31 }
 0x3c2   : > { %v1840_v34 = vsel %vm1833_vm11, %v1830_v31, %v1839_v33 }
 0x3c3   : > { %1846 = vrot.lane.b32.xlu0 %v1840_v34, %s2591_s28 }
 0x3c7   : > { %1017 = vrot.lane.b32.xlu0 %v1008_v35, %s2592_s12 }
 0x3cb   : > { %1170 = vrot.lane.b32.xlu0 %v1008_v35, %s2593_s13 }
 0x3cf   : > { %1249 = vrot.lane.b32.xlu0 %v1008_v35, %s2594_s14 }
 0x3d3   : > { %1328 = vrot.lane.b32.xlu0 %v1008_v35, %s2595_s15 }
 0x3d7   : > { %1852 = vrot.lane.b32.xlu0 %v2354_v36, %s2592_s12 }
 0x3db   : > { %2005 = vrot.lane.b32.xlu0 %v2354_v36, %s2593_s13 }
 0x3df   : > { %2084 = vrot.lane.b32.xlu0 %v2354_v36, %s2594_s14 }
 0x3e3   : > { %2163 = vrot.lane.b32.xlu0 %v2354_v36, %s2595_s15 }
 0x3e7   : > { %2244 = vperm.xlu0 %2574, %v2355_v37  }
 0x421   : > { %v1012_v38 = vpop.permute.xlu1 %1011 }
 0x422   : > { %v1014_v39 = vsel %vm596_vm6, 0.0, %v1012_v38 }
 0x423   : > { %v1015_v40 = vsel %vm598_vm7, %v1014_v39, 0.0 }
 0x424   : > { %1020 = vrot.lane.b32.xlu1 %v1015_v40, %s2589_s20 }
 0x428   : > { %1172 = vrot.lane.b32.xlu1 %v1015_v40, %s2588_s19 }
 0x42c   : > { %1251 = vrot.lane.b32.xlu1 %v1015_v40, %s2596_s24 }
 0x430   : > { %1330 = vrot.lane.b32.xlu1 %v1015_v40, %s2592_s12 }
 0x435   : > { %v1847_v41 = vpop.permute.xlu0 %1846 }
 0x436   : > { %v1849_v42 = vsel %vm596_vm6, 0.0, %v1847_v41 }
 0x437   : > { %v1850_v43 = vsel %vm598_vm7, %v1849_v42, 0.0 }
 0x438   : > { %1855 = vrot.lane.b32.xlu1 %v1850_v43, %s2589_s20 }
 0x439   : > { %v1018_v46 = vpop.permute.xlu0 %1017 }
 0x43c   : > { %2007 = vrot.lane.b32.xlu1 %v1850_v43, %s2588_s19  ;;  %s2313_s19 = sshll.u32 %s2892_s10, 1 }
 0x43d   : > { %v1171_v48 = vpop.permute.xlu0 %1170  ;;  %s327_s15 = scalar_lea.vmem %s2890_s9, %s2313_s19 }
 0x440   : > { %2086 = vrot.lane.b32.xlu1 %v1850_v43, %s2596_s24 }
 0x441   : > { %v1250_v50 = vpop.permute.xlu0 %1249 }
 0x444   : > { %2165 = vrot.lane.b32.xlu1 %v1850_v43, %s2592_s12 }
 0x445   : > { %v1329_v52 = vpop.permute.xlu0 %1328 }
 0x448   : > { %1409 = vperm.xlu1 %2573, %v1009_v44  }
 0x449   : > { %v1853_v54 = vpop.permute.xlu0 %1852 }
 0x44d   : > { %v2006_v56 = vpop.permute.xlu0 %2005 }
 0x451   : > { %v2085_v58 = vpop.permute.xlu0 %2084 }
 0x455   : > { %v2164_v60 = vpop.permute.xlu0 %2163 }
 0x466   : > { %v2245_v4 = vpop.permute.xlu0 %2244 }
 0x496   : > { %v1021_v45 = vpop.permute.xlu1 %1020 }
 0x497   : > { %2455 = vmatpush3.msk.msra.mxu0 %vm609_vm8, %v1021_v45 }
 0x498   : > { %2457 = vmatmul.mubr.msk.f32.vlgmr.msra.gmra.mrb[4].mxu0 %vm606_vm9, %v1018_v46  ;;  %2459 = vmatprep.subr.mxu0 %v2584_v1 }
 0x499   : > { %2460 = vmatpush3.msk.msra.mxu0 %vm609_vm8, %v1015_v40  ;;  %2461 = vmatprep.mubr.msk.f32.mxu0 %vm2586_vm0, %v2584_v1 }
 0x49a   : > { %2464 = vmatprep.subr.mxu0 %v2584_v1  ;;  %v1173_v47 = vpop.permute.xlu1 %1172 }
 0x49e   : > { %v1252_v49 = vpop.permute.xlu1 %1251 }
 0x4a0   : > { %2462 = vmatmul.mubr.msk.f32.vlgmr.msra.gmra.mrb[4].mxu0 %vm606_vm9, %v1008_v35 }
 0x4a1   : > { %2465 = vmatpush3.msk.msra.mxu0 %vm609_vm8, %v1173_v47  ;;  %2466 = vmatprep.mubr.msk.f32.mxu0 %vm2586_vm0, %v2584_v1 }
 0x4a2   : > { %2469 = vmatprep.subr.mxu0 %v2584_v1  ;;  %v1331_v51 = vpop.permute.xlu1 %1330 }
 0x4a8   : > { %2467 = vmatmul.mubr.msk.f32.vlgmr.msra.gmra.mrb[4].mxu0 %vm606_vm9, %v1171_v48 }
 0x4a9   : > { %2470 = vmatpush3.msk.msra.mxu0 %vm609_vm8, %v1252_v49  ;;  %2471 = vmatprep.mubr.msk.f32.mxu0 %vm2586_vm0, %v2584_v1 }
 0x4aa   : > { %2474 = vmatprep.subr.mxu0 %v2584_v1  ;;  %v1856_v53 = vpop.permute.xlu1 %1855 }
 0x4ae   : > { %v2008_v55 = vpop.permute.xlu1 %2007 }
 0x4b0   : > { %2472 = vmatmul.mubr.msk.f32.vlgmr.msra.gmra.mrb[4].mxu0 %vm606_vm9, %v1250_v50 }
 0x4b1   : > { %2475 = vmatpush3.msk.msra.mxu0 %vm609_vm8, %v1331_v51  ;;  %2476 = vmatprep.mubr.msk.f32.mxu0 %vm2586_vm0, %v2584_v1 }
 0x4b2   : > { %2504 = vmatprep.subr.mxu0 %v2584_v1  ;;  %v2087_v57 = vpop.permute.xlu1 %2086 }
 0x4b6   : > { %v2166_v59 = vpop.permute.xlu1 %2165 }
 0x4b8   : > { %2477 = vmatmul.mubr.msk.f32.vlgmr.msra.gmra.mrb[4].mxu0 %vm606_vm9, %v1329_v52 }
 0x4b9   : > { %2505 = vmatpush3.msk.msra.mxu0 %vm609_vm8, %v1856_v53  ;;  %2506 = vmatprep.mubr.msk.f32.mxu0 %vm2586_vm0, %v2584_v1 }
 0x4ba   : > { %2509 = vmatprep.subr.mxu0 %v2584_v1 }
 0x4c0   : > { %2507 = vmatmul.mubr.msk.f32.vlgmr.msra.gmra.mrb[4].mxu0 %vm606_vm9, %v1853_v54 }
 0x4c1   : > { %2510 = vmatpush3.msk.msra.mxu0 %vm609_vm8, %v1850_v43  ;;  %2511 = vmatprep.mubr.msk.f32.mxu0 %vm2586_vm0, %v2584_v1 }
 0x4c2   : > { %2514 = vmatprep.subr.mxu0 %v2584_v1 }
 0x4c7   : > { %v1410_v61 = vpop.permute.xlu1 %1409 }
 0x4c8   : > { %2512 = vmatmul.mubr.msk.f32.vlgmr.msra.gmra.mrb[4].mxu0 %vm606_vm9, %v2354_v36  ;;  %v2530_v63 = vadd.f32 %v2529_v62, %v1410_v61 }
 0x4c9   : > { %2515 = vmatpush3.msk.msra.mxu0 %vm609_vm8, %v2008_v55  ;;  %2516 = vmatprep.mubr.msk.f32.mxu0 %vm2586_vm0, %v2584_v1 }
 0x4ca   : > { %2519 = vmatprep.subr.mxu0 %v2584_v1 }
 0x4d0   : > { %2517 = vmatmul.mubr.msk.f32.vlgmr.msra.gmra.mrb[4].mxu0 %vm606_vm9, %v2006_v56 }
 0x4d1   : > { %2520 = vmatpush3.msk.msra.mxu0 %vm609_vm8, %v2087_v57  ;;  %2521 = vmatprep.mubr.msk.f32.mxu0 %vm2586_vm0, %v2584_v1 }
 0x4d2   : > { %2524 = vmatprep.subr.mxu0 %v2584_v1 }
 0x4d8   : > { %2522 = vmatmul.mubr.msk.f32.vlgmr.msra.gmra.mrb[4].mxu0 %vm606_vm9, %v2085_v58 }
 0x4d9   : > { %2525 = vmatpush3.msk.msra.mxu0 %vm609_vm8, %v2166_v59  ;;  %2526 = vmatprep.mubr.msk.f32.mxu0 %vm2586_vm0, %v2584_v1 }
 0x4e0   : > { %2527 = vmatmul.mubr.msk.f32.vlgmr.msra.gmra.mrb[4].mxu0 %vm606_vm9, %v2164_v60 }
 0x5b3   : > { %v2237_v0 = vpop.f32.mrb[4].mxu0 }
 0x5b4   : > { %v2531_v2 = vadd.f32 %v2530_v63, %v2237_v0  ;;  %v2528_v3 = vpop.f32.mrb[5].mxu0 }
 0x5b6   : > { %v2532_v5 = vadd.f32 %v2531_v2, %v2245_v4 }
 0x5b8   : > { %v2250_v6 = vmul.f32 0.5, %v2532_v5 }
 0x5ba   : > { %v2251_v1 = vpack.c.bf16 %v2250_v6, %v2250_v6 }
 0x5bc   : > { %2253 = vst.msk [vmem:[%s327_s15] sm:$0x3] %vm2252_vm12, %v2251_v1 }
 0x5bd PF: > { %s19_s30 = sadd.s32 1, %s2581_s30  }
 0x5be   : > { %p16_p4 = scmp.ge.s32.totalorder %s19_s30, 4  }
 0x5c0   :  { %18 = sbr.rel (!%p16_p4) target bundleno = 1 (0x1), region = 92 }

// kernel: forward.19
= control target key start
LH: loop header
LB: loop body
LE: loop exit
PB: predicated region body
PF: predicated region fallthrough
CT: control target
= control target key end

     0   :  { %s692_s15 = smov 0   ;;  %s736_s0 = inlined_call_operand.vmem [shape: bf16[2,4,64], index: 0, kind: input, shape index: {}]   ;;  %s737_s1 = inlined_call_operand.vmem [shape: f32[2,2,8], index: 1, kind: input, shape index: {}]   ;;  %s738_s2 = inlined_call_operand.vmem [shape: f32[2,1], index: 2, kind: input, shape index: {}]   ;;  %s739_s3 = inlined_call_operand.vmem [shape: f32[4,1], index: 3, kind: input, shape index: {}]   ;;  %s740_s4 = inlined_call_operand.vmem [shape: bf16[2,2,2,64], index: 4, kind: output, shape index: {}]  }
   0x1 LB: > { %s589_s16 = sadd.s32 4294967295, %s658_s15   ;;  %p593_p0 = scmp.ge.s32.totalorder %s658_s15, 1  ;;  %s658_s15 = sphi %s692_s15, %s14_s15  }
   0x2   : > { %p161_p1 = scmp.lt.s32.totalorder %s658_s15, 3 }
   0x4   : > { %p162_p2 = pnand %p593_p0, %p161_p1 }
   0x5   : > { %v195_v0 = vld [vmem:[%s739_s3] sm:$0xf] (!%p162_p2)  ;;  %v660_v1 = vmov (!%p162_p2), 0   ;;  %p185_p3 = scmp.lt.s32.totalorder (!%p162_p2), %s589_s16, 1  ;;  %v661_v2 = vmov (!%p162_p2), 0.0   ;;  %s662_s23 = smov (!%p162_p2), 1  }
   0x6   : > { %165 = sbr.rel (%p162_p2) target bundleno = 597 (0x255), region = 36  ;;  %651 = vset.pattern.permute.xlu0 (!%p162_p2), %v660_v1  ;;  %616 = vmatprep.subr.mxu0 (!%p162_p2), %v661_v2  ;;  %vm663_vm1 = vmmov (!%p162_p2), 0   ;;  %vm208_vm2 = vcmask (!%p162_p2), 7168   ;;  %vm210_vm3 = vcmask (!%p162_p2), 531456   ;;  %vm220_vm4 = vcmask (!%p162_p2), 1043456   ;;  %s664_s24 = smov (!%p162_p2), 126  }
   0x7   : > { %199 = vperm.xlu0 (!%p162_p2), %651, %v195_v0   ;;  %621 = vmatprep.subr.mxu1 (!%p162_p2), %v661_v2  ;;  %s665_s25 = smov (!%p162_p2), 127   ;;  %v212_v11 = vld [vmem:[%s738_s2] sm:$0x3] (!%p162_p2)  ;;  %s666_s30 = smov (!%p162_p2), 124   ;;  %v600_v13 = vld [vmem:[%s737_s1 + $0x2] sm:$0x3] (!%p162_p2) }
   0x8   : > { %623 = vmatprep.mubr.msk.f32.mxu1 (!%p162_p2), %vm663_vm1, %v661_v2  ;;  %618 = vmatprep.mubr.msk.f32.mxu0 (!%p162_p2), %vm663_vm1, %v661_v2  ;;  %v213_v12 = vld [vmem:[%s737_s1] sm:$0x3] (!%p162_p2)  ;;  %vm217_vm5 = vcmask (!%p162_p2), 31744   ;;  %vm377_vm6 = vcmask (!%p162_p2), 516096  }
   0xd   : > { %s742_s16 = smov (!%p185_p3, %s589_s16), 1 }
   0xe   : > { %s594_s19 = sshll.u32 %s742_s16, 1 }
   0xf   : > { %s188_s22 = scalar_lea.vmem %s736_s0, %s594_s19  ;;  %s192_s9 = scalar_lea.vmem %s740_s4, %s594_s19 }
  0x10   : > { %v193_v3 = vld [vmem:[%s188_s22] sm:$0x3] }
  0x11   : > { %v194_v4 = vunpack.c.l.bf16 %v193_v3 }
  0x13   : > { %vm196_vm0 = vcmp.ge.f32.partialorder %v194_v4, 0.0 }
  0x86   : > { %v200_v5 = vpop.permute.xlu0 %199 }
  0x87   : > { %v202_v6 = vmul.f32 %v200_v5, %v194_v4 }
  0x89   : > { %v203_v7 = vsel %vm196_vm0, %v194_v4, %v202_v6 }
  0x8a   : > { %205 = vrot.lane.b32.xlu0 %v203_v7, %s662_s23 }
  0xfc   : > { %v206_v8 = vpop.permute.xlu0 %205 }
  0xfd   : > { %v209_v9 = vsel %vm208_vm2, 0.0, %v206_v8 }
  0xfe   : > { %v211_v10 = vsel %vm210_vm3, %v209_v9, 0.0 }
  0xff   : > { %456 = vrot.lane.b32.xlu0 %v211_v10, %s664_s24  ;;  %294 = vrot.lane.b32.xlu1 %v211_v10, %s665_s25 }
 0x100   : > { %617 = vmatpush3.msk.msra.mxu0 %vm220_vm4, %v211_v10 }
 0x101   : > { %626 = vmatprep.subr.mxu0 %v661_v2 }
 0x103   : > { %372 = vperm.xlu0 %651, %v212_v11   ;;  %215 = vrot.lane.b32.xlu1 %v213_v12, %s666_s30 }
 0x107   : > { %382 = vrot.lane.b32.xlu1 %v600_v13, %s666_s30 }
 0x171   : > { %v295_v14 = vpop.permute.xlu1 %294  ;;  %v457_v15 = vpop.permute.xlu0 %456 }
 0x172   : > { %622 = vmatpush3.msk.msra.mxu1 %vm220_vm4, %v295_v14 }
 0x173   : > { %631 = vmatprep.subr.mxu1 %v661_v2  ;;  %624 = vmatmul.mubr.msk.f32.vlgmr.msra.gmra.mrb[0].mxu1 %vm217_vm5, %v213_v12 }
 0x174   : > { %632 = vmatpush3.msk.msra.mxu1 %vm220_vm4, %v457_v15  ;;  %633 = vmatprep.mubr.msk.f32.mxu1 %vm663_vm1, %v661_v2 }
 0x175   : > { %v216_v16 = vpop.permute.xlu1 %215 }
 0x176   : > { %619 = vmatmul.mubr.msk.f32.vlgmr.msra.gmra.mrb[0].mxu0 %vm217_vm5, %v216_v16 }
 0x177   : > { %627 = vmatpush3.msk.msra.mxu0 %vm220_vm4, %v295_v14  ;;  %634 = vmatmul.mubr.msk.f32.vlgmr.msra.gmra.mrb[2].mxu1 %vm217_vm5, %v600_v13 }
 0x178   : > { %628 = vmatprep.mubr.msk.f32.mxu0 %vm663_vm1, %v661_v2 }
 0x179   : > { %v383_v17 = vpop.permute.xlu1 %382 }
 0x17a   : > { %629 = vmatmul.mubr.msk.f32.vlgmr.msra.gmra.mrb[2].mxu0 %vm217_vm5, %v383_v17 }
 0x182   : > { %v373_v24 = vpop.permute.xlu0 %372 }
 0x246   : > { %v366_v18 = vpop.f32.mrb[0].mxu1 }
 0x247   : > { %v625_v19 = vpop.f32.mrb[1].mxu1 }
 0x249   : > { %v290_v20 = vpop.f32.mrb[0].mxu0 }
 0x24a   : > { %v367_v21 = vadd.f32 %v366_v18, %v290_v20  ;;  %v620_v22 = vpop.f32.mrb[1].mxu0  ;;  %v528_v23 = vpop.f32.mrb[2].mxu1 }
 0x24b   : > { %v635_v25 = vpop.f32.mrb[3].mxu1 }
 0x24c   : > { %v375_v26 = vadd.f32 %v373_v24, %v367_v21 }
 0x24d   : > { %v452_v27 = vpop.f32.mrb[2].mxu0 }
 0x24e   : > { %v376_v28 = vpack.c.bf16 %v375_v26, %v375_v26  ;;  %v529_v29 = vadd.f32 %v528_v23, %v452_v27  ;;  %v630_v30 = vpop.f32.mrb[3].mxu0 }
 0x250   : > { %378 = vst.msk [vmem:[%s192_s9] sm:$0x1] %vm377_vm6, %v376_v28  ;;  %v532_v31 = vadd.f32 %v529_v29, %v373_v24 }
 0x252   : > { %v533_v32 = vpack.c.bf16 %v532_v31, %v532_v31 }
 0x254   : > { %605 = vst.msk [vmem:[%s192_s9 + $0x1] sm:$0x1] %vm377_vm6, %v533_v32 }
 0x255 PF: > { %s14_s15 = sadd.s32 1, %s658_s15  }
 0x256   : > { %p11_p4 = scmp.ge.s32.totalorder %s14_s15, 4  }
 0x258   :  { %13 = sbr.rel (!%p11_p4) target bundleno = 1 (0x1), region = 68 }

// kernel: forward.21
= control target key start
LH: loop header
LB: loop body
LE: loop exit
PB: predicated region body
PF: predicated region fallthrough
CT: control target
= control target key end

     0   :  { %s1263_s0 = inlined_call_operand.vmem [shape: bf16[2,2,128], index: 0, kind: input, shape index: {}]   ;;  %s1264_s1 = inlined_call_operand.vmem [shape: f32[1,14], index: 1, kind: input, shape index: {}]   ;;  %s1265_s2 = inlined_call_operand.<no memory space> [shape: f32[1,1], index: 2, kind: input, shape index: {}]   ;;  %s1266_s3 = inlined_call_operand.vmem [shape: f32[2,1], index: 3, kind: input, shape index: {}]   ;;  %s1267_s4 = inlined_call_operand.hbm [shape: f32[2,1,128], index: 4, kind: output, shape index: {}]  }
   0x1   :  { %v9_v0 = vstv %s1265_s2 }
   0x2   :  { %10 = vst [vmem:[#allocation2] sm:$0x1] %v9_v0 }
   0x3   :  { %11 = vsyncpa [#allocation4], 0 }
   0x4   :  { %13 = vsyncpa [#allocation4 + $0x1], 0  ;;  %s1108_s17 = smov 0   ;;  %s1110_s18 = smov 0  }
   0x5   :  { %s1112_s19 = smov 0   ;;  %s1114_s20 = smov 0  }
   0x6 LB: > { %s1129_s2 = sadd.s32 4294967295, %s1063_s20   ;;  %s875_s21 = sadd.s32 4294967294, %s1063_s20   ;;  %s1063_s20 = sphi %s1114_s20, %s1273_s20   ;;  %s1059_s19 = sphi %s1112_s19, %s1272_s19   ;;  %s1055_s18 = sphi %s1110_s18, %s1271_s18   ;;  %s1051_s17 = sphi %s1108_s17, %s1270_s17  }
   0x7   : > { %s1133_s22 = sadd.s32 1, %s1063_s20   ;;  %s115_s23 = sadd.s32 1, %s1059_s19 }
   0x8   : > { %s112_s24 = ssub.s32 %s1063_s20, %s1133_s22  ;;  %p125_p0 = scmp.ne.s32.totalorder %s1059_s19, %s1055_s18 }
   0x9   : > { %p113_p1 = scmp.eq.s32.totalorder %s112_s24, 0  ;;  %p126_p2 = scmp.eq.s32.totalorder %s1129_s2, 1 }
   0xa   : > { %p131_p3 = scmp.ne.s32.totalorder %s1055_s18, %s1051_s17  ;;  %p132_p4 = scmp.eq.s32.totalorder %s875_s21, 1 }
   0xb   : > { %s1144_s25 = scalar_select %p113_p1, %s1059_s19, %s115_s23  }
   0xc   : > { %p1146_p5 = por %p126_p2, %p125_p0  ;;  %p1150_p6 = por %p132_p4, %p131_p3 }
   0xd   : > { %p878_p7 = scmp.ge.s32.totalorder %s1063_s20, 1  ;;  %p165_p8 = scmp.lt.s32.totalorder %s1063_s20, 3 }
   0xf   : > { %p166_p9 = pnand %p878_p7, %p165_p8 }
  0x10   : > { %v193_v1 = vld [vmem:[%s1266_s3] sm:$0x3] (!%p166_p9)  ;;  %v208_v2 = vlaneseq (!%p166_p9)  ;;  %v1065_v3 = vmov (!%p166_p9), 0   ;;  %s1066_s6 = smov (!%p166_p9), 124   ;;  %s1067_s7 = smov (!%p166_p9), 120   ;;  %v1069_v11 = vmov (!%p166_p9), 0.0  }
  0x11   : > { %169 = sbr.rel (%p166_p9) target bundleno = 651 (0x28b), region = 36  ;;  %998 = vset.pattern.permute.xlu0 (!%p166_p9), %v1065_v3  ;;  %v202_v6 = vld [vmem:[%s1264_s1] sm:$0x1] (!%p166_p9)  ;;  %p188_p10 = scmp.lt.s32.totalorder (!%p166_p9), %s1129_s2, 1  ;;  %v1068_v8 = vmov (!%p166_p9), 1983009808   ;;  %915 = vmatprep.subr.mxu1 (!%p166_p9), %v1069_v11 }
  0x12   : > { %197 = vperm.xlu0 (!%p166_p9), %998, %v193_v1   ;;  %v1159_v4 = vshrl.u32 (!%p166_p9), %v208_v2, 7  ;;  %v206_v9 = vunpack.c.l.s4 (!%p166_p9), %v1068_v8  ;;  %910 = vmatprep.subr.mxu0 (!%p166_p9), %v1069_v11  ;;  %s1070_s12 = smov (!%p166_p9), 3   ;;  %s1071_s13 = smov (!%p166_p9), 126   ;;  %vm1074_vm1 = vmmov (!%p166_p9), 0   ;;  %vm215_vm2 = vcmask (!%p166_p9), 23552  }
  0x13   : > { %s1072_s14 = smov (!%p166_p9), 122   ;;  %s1073_s15 = smov (!%p166_p9), 118   ;;  %912 = vmatprep.mubr.msk.f32.mxu0 (!%p166_p9), %vm1074_vm1, %v1069_v11  ;;  %917 = vmatprep.mubr.msk.f32.mxu1 (!%p166_p9), %vm1074_vm1, %v1069_v11  ;;  %vm236_vm3 = vcmask (!%p166_p9), 1041408   ;;  %vm233_vm4 = vcmask (!%p166_p9), 15360   ;;  %v203_v22 = vld [vmem:[#allocation2] sm:$0x1] (!%p166_p9) }
  0x14   : > { %v221_v5 = vsub.s32 (!%p166_p9), 0, %v1159_v4  ;;  %v207_v13 = vunpack.c.0.s8 (!%p166_p9), %v206_v9  ;;  %s1075_s16 = smov (!%p166_p9), 127   ;;  %s1076_s21 = smov (!%p166_p9), 125   ;;  %vm231_vm5 = vcmask (!%p166_p9), 1039360   ;;  %vm389_vm6 = vcmask (!%p166_p9), 1031168  }
  0x15   : > { %s1077_s23 = smov (!%p166_p9), 123   ;;  %s1078_s24 = smov (!%p166_p9), 116   ;;  %vm472_vm7 = vcmask (!%p166_p9), 1022976   ;;  %vm555_vm8 = vcmask (!%p166_p9), 1014784   ;;  %vm638_vm9 = vcmask (!%p166_p9), 1006592   ;;  %vm721_vm10 = vcmask (!%p166_p9), 998400  }
  0x16   : > { %v222_v7 = vrot.slane (!%p166_p9), %v202_v6, %v221_v5  ;;  %v210_v15 = vsub.s32 (!%p166_p9), %v207_v13, %v1159_v4  ;;  %s186_s28 = sand.u32 (!%p166_p9), 1, %s1055_s18   ;;  %s893_s29 = sshll.u32 (!%p166_p9), %s1129_s2, 4 }
  0x17   : > { %s187_s30 = scalar_lea.vmem (!%p166_p9), [#allocation3], %s186_s28  ;;  %s811_s9 = scalar_lea.sflag (!%p166_p9), [#allocation4], %s186_s28 }
  0x18   : > { %383 = vrot.lane.b32.xlu1 %v222_v7, %s1066_s6  ;;  %s189_s8 = scalar_select %p188_p10, %s1129_s2, 1 }
  0x19   : > { %s823_s5 = sshll.u32 %s187_s30, 4  ;;  %s1079_s2 = smov [#allocation3]   ;;  %s1223_s5 = int_to_ptr.vmem [resolvable:$true] %s823_s5 }
  0x1a   : > { %s190_s11 = scalar_lea.vmem %s1263_s0, %s189_s8  ;;  %s1221_s8 = scalar_lea.hbm %s1267_s4, %s893_s29 }
  0x1b   : > { %v191_v10 = vld [vmem:[%s190_s11] sm:$0x1]  ;;  %s1001_s10 = scalar_lea.vmem %s1223_s5, 16  ;;  %s1005_s11 = sshll.u32 %s1079_s2, 4  ;;  %s1006_s11 = int_to_ptr.vmem [resolvable:$false] %s1005_s11 }
  0x1c   : > { %549 = vrot.lane.b32.xlu1 %v222_v7, %s1067_s7  ;;  %v192_v12 = vunpack.c.l.bf16 %v191_v10  ;;  %p1002_p11 = scmp.ne.s32.totalorder %s1223_s5, %s1001_s10  ;;  %p1008_p0 = scmp.lt.s32.totalorder %s1223_s5, %s1006_s11 }
  0x1e   : > { %vm194_vm0 = vcmp.ge.f32.partialorder %v192_v12, 0.0  ;;  %p1003_p12 = pnand %p1002_p11, %p1146_p5 }
  0x20   : > { %p1004_p13 = pneg %p1003_p12 }
  0x8a   : > { %v384_v24 = vpop.permute.xlu1 %383 }
  0x8e   : > { %v550_v26 = vpop.permute.xlu1 %549 }
  0x91   : > { %v198_v14 = vpop.permute.xlu0 %197 }
  0x92   : > { %v200_v16 = vmul.f32 %v198_v14, %v192_v12 }
  0x94   : > { %v201_v17 = vsel %vm194_vm0, %v192_v12, %v200_v16 }
  0x95   : > { %v211_v18 = vrot.slane %v201_v17, %v210_v15 }
  0x97   : > { %212 = vrot.lane.b32.xlu0 %v211_v18, %s1070_s12  ;;  %s1007_s12 = scalar_lea.vmem %s1006_s11, 32 }
  0x98   : > { %p1009_p1 = scmp.lt.s32.totalorder %s1007_s12, %s1001_s10 }
  0x9a   : > { %p1010_p2 = por %p1009_p1, %p1008_p0 }
  0x9b   : > { %223 = vrot.lane.b32.xlu0 %v222_v7, %s1071_s13 }
  0x9c   : > { %p1011_p3 = pnand %p1010_p2, %p1004_p13 }
  0x9f   : > { %466 = vrot.lane.b32.xlu0 %v222_v7, %s1072_s14 }
  0xa3   : > { %632 = vrot.lane.b32.xlu0 %v222_v7, %s1073_s15 }
 0x109   : > { %v213_v19 = vpop.permute.xlu0 %212 }
 0x10a   : > { %v216_v20 = vsel %vm215_vm2, 0.0, %v213_v19  ;;  %v217_v21 = vsel %vm215_vm2, %v213_v19, 0.0 }
 0x10b   : > { %387 = vrot.lane.b32.xlu0 %v217_v21, %s1071_s13  ;;  %227 = vrot.lane.b32.xlu1 %v216_v20, %s1075_s16 }
 0x10c   : > { %916 = vmatpush3.msk.msra.mxu1 %vm236_vm3, %v216_v20 }
 0x10d   : > { %918 = vmatmul.mubr.msk.f32.vlgmr.msra.gmra.mrb[0].mxu1 %vm233_vm4, %v202_v6  ;;  %925 = vmatprep.subr.mxu1 %v1069_v11  ;;  %v224_v23 = vpop.permute.xlu0 %223 }
 0x10e   : > { %927 = vmatprep.mubr.msk.f32.mxu1 %vm1074_vm1, %v1069_v11 }
 0x10f   : > { %468 = vrot.lane.b32.xlu0 %v216_v20, %s1076_s21  ;;  %229 = vrot.lane.b32.xlu1 %v217_v21, %s1075_s16 }
 0x111   : > { %v467_v25 = vpop.permute.xlu0 %466 }
 0x113   : > { %553 = vrot.lane.b32.xlu0 %v217_v21, %s1066_s6  ;;  %385 = vrot.lane.b32.xlu1 %v216_v20, %s1071_s13 }
 0x115   : > { %v633_v27 = vpop.permute.xlu0 %632 }
 0x117   : > { %634 = vrot.lane.b32.xlu0 %v216_v20, %s1077_s23  ;;  %470 = vrot.lane.b32.xlu1 %v217_v21, %s1076_s21 }
 0x11b   : > { %719 = vrot.lane.b32.xlu0 %v217_v21, %s1072_s14  ;;  %551 = vrot.lane.b32.xlu1 %v216_v20, %s1066_s6 }
 0x11f   : > { %800 = vperm.xlu0 %998, %v203_v22   ;;  %636 = vrot.lane.b32.xlu1 %v217_v21, %s1077_s23 }
 0x123   : > { %717 = vrot.lane.b32.xlu1 %v216_v20, %s1072_s14 }
 0x127   : > { %715 = vrot.lane.b32.xlu1 %v222_v7, %s1078_s24 }
 0x17d   : > { %v228_v28 = vpop.permute.xlu1 %227  ;;  %v388_v29 = vpop.permute.xlu0 %387 }
 0x181   : > { %v230_v30 = vpop.permute.xlu1 %229  ;;  %v469_v32 = vpop.permute.xlu0 %468 }
 0x182   : > { %v232_v31 = vsel %vm231_vm5, %v228_v28, %v230_v30 }
 0x183   : > { %911 = vmatpush3.msk.msra.mxu0 %vm236_vm3, %v232_v31 }
 0x184   : > { %913 = vmatmul.mubr.msk.f32.vlgmr.msra.gmra.mrb[0].mxu0 %vm233_vm4, %v224_v23  ;;  %920 = vmatprep.subr.mxu0 %v1069_v11 }
 0x185   : > { %v386_v33 = vpop.permute.xlu1 %385  ;;  %922 = vmatprep.mubr.msk.f32.mxu0 %vm1074_vm1, %v1069_v11  ;;  %v554_v35 = vpop.permute.xlu0 %553 }
 0x186   : > { %v390_v34 = vsel %vm389_vm6, %v386_v33, %v388_v29 }
 0x187   : > { %921 = vmatpush3.msk.msra.mxu0 %vm236_vm3, %v390_v34 }
 0x188   : > { %923 = vmatmul.mubr.msk.f32.vlgmr.msra.gmra.mrb[2].mxu0 %vm233_vm4, %v384_v24  ;;  %930 = vmatprep.subr.mxu0 %v1069_v11 }
 0x189   : > { %v471_v36 = vpop.permute.xlu1 %470  ;;  %932 = vmatprep.mubr.msk.f32.mxu0 %vm1074_vm1, %v1069_v11  ;;  %v635_v40 = vpop.permute.xlu0 %634 }
 0x18a   : > { %v473_v37 = vsel %vm472_vm7, %v469_v32, %v471_v36 }
 0x18b   : > { %926 = vmatpush3.msk.msra.mxu1 %vm236_vm3, %v473_v37 }
 0x18c   : > { %928 = vmatmul.mubr.msk.f32.vlgmr.msra.gmra.mrb[2].mxu1 %vm233_vm4, %v467_v25  ;;  %935 = vmatprep.subr.mxu1 %v1069_v11 }
 0x18d   : > { %v552_v38 = vpop.permute.xlu1 %551  ;;  %937 = vmatprep.mubr.msk.f32.mxu1 %vm1074_vm1, %v1069_v11  ;;  %v720_v43 = vpop.permute.xlu0 %719 }
 0x18e   : > { %v556_v39 = vsel %vm555_vm8, %v552_v38, %v554_v35 }
 0x18f   : > { %931 = vmatpush3.msk.msra.mxu0 %vm236_vm3, %v556_v39 }
 0x190   : > { %933 = vmatmul.mubr.msk.f32.vlgmr.msra.gmra.mrb[4].mxu0 %vm233_vm4, %v550_v26  ;;  %940 = vmatprep.subr.mxu0 %v1069_v11 }
 0x191   : > { %v637_v41 = vpop.permute.xlu1 %636  ;;  %942 = vmatprep.mubr.msk.f32.mxu0 %vm1074_vm1, %v1069_v11 }
 0x192   : > { %v639_v42 = vsel %vm638_vm9, %v635_v40, %v637_v41 }
 0x193   : > { %936 = vmatpush3.msk.msra.mxu1 %vm236_vm3, %v639_v42 }
 0x194   : > { %938 = vmatmul.mubr.msk.f32.vlgmr.msra.gmra.mrb[4].mxu1 %vm233_vm4, %v633_v27 }
 0x195   : > { %v718_v44 = vpop.permute.xlu1 %717 }
 0x196   : > { %v722_v45 = vsel %vm721_vm10, %v718_v44, %v720_v43 }
 0x197   : > { %941 = vmatpush3.msk.msra.mxu0 %vm236_vm3, %v722_v45 }
 0x199   : > { %v716_v46 = vpop.permute.xlu1 %715 }
 0x19a   : > { %943 = vmatmul.mubr.msk.f32.vlgmr.msra.gmra.mrb[6].mxu0 %vm233_vm4, %v716_v46 }
 0x19e   : > { %v801_v0 = vpop.permute.xlu0 %800 }
 0x19f   : > { %v806_v2 = vrot.slane %v801_v0, %v221_v5 }
 0x1e0   : > { %v379_v47 = vpop.f32.mrb[0].mxu1 }
 0x1e1   : > { %v919_v48 = vpop.f32.mrb[1].mxu1 }
 0x257   : > { %v305_v49 = vpop.f32.mrb[0].mxu0 }
 0x258   : > { %v380_v50 = vadd.f32 %v379_v47, %v305_v49  ;;  %v914_v51 = vpop.f32.mrb[1].mxu0 }
 0x25b   : > { %v461_v52 = vpop.f32.mrb[2].mxu0 }
 0x25c   : > { %v465_v53 = vadd.f32 %v461_v52, %v380_v50  ;;  %v924_v54 = vpop.f32.mrb[3].mxu0 }
 0x25f   : > { %v544_v55 = vpop.f32.mrb[2].mxu1 }
 0x260   : > { %v548_v56 = vadd.f32 %v544_v55, %v465_v53  ;;  %v929_v57 = vpop.f32.mrb[3].mxu1 }
 0x263   : > { %v627_v58 = vpop.f32.mrb[4].mxu0 }
 0x264   : > { %v631_v59 = vadd.f32 %v627_v58, %v548_v56  ;;  %v934_v60 = vpop.f32.mrb[5].mxu0 }
 0x267   : > { %v710_v61 = vpop.f32.mrb[4].mxu1 }
 0x268   : > { %v714_v62 = vadd.f32 %v710_v61, %v631_v59  ;;  %v939_v63 = vpop.f32.mrb[5].mxu1 }
 0x26d   : > { %v793_v1 = vpop.f32.mrb[6].mxu0 }
 0x26e   : > { %v797_v3 = vadd.f32 %v793_v1, %v714_v62  ;;  %v944_v6 = vpop.f32.mrb[7].mxu0 }
 0x270   : > { %v807_v7 = vadd.f32 %v806_v2, %v797_v3 }
 0x272   : > { %999 = vtanh.f32 %v807_v7 }
 0x27c   : > { %v1000_v4 = vpop.eup %999 }
 0x27d   : > { %809 = vst [vmem:[%s187_s30] sm:$0x1] %v1000_v4 }
 0x27e   : > { %1014 = shalt.err (!%p1011_p3)
}
 0x27f   : > { %s1015_s13 = scalar_lea.hbm %s1221_s8, 16  ;;  %s1019_s16 = scalar_lea.hbm %s1267_s4, 32 }
 0x280   : > { %p1016_p4 = scmp.ne.s32.totalorder %s1221_s8, %s1015_s13  ;;  %p1020_p9 = scmp.lt.u32.totalorder %s1221_s8, %s1267_s4 }
 0x281   : > { %p1021_p10 = scmp.lt.u32.totalorder %s1019_s16, %s1015_s13  ;;  %p1023_p12 = scmp.lt.u32.totalorder %s1015_s13, %s1221_s8 }
 0x282   : > { %p1017_p7 = pnand %p1016_p4, %p1146_p5 }
 0x283   : > { %p1022_p11 = por %p1021_p10, %p1020_p9 }
 0x284   : > { %p1018_p8 = pneg %p1017_p7 }
 0x285   : > { %p1024_p13 = por %p1023_p12, %p1022_p11 }
 0x287   : > { %p1025_p0 = pnand %p1024_p13, %p1018_p8 }
 0x289   : > { %1028 = shalt.err (!%p1025_p0)
}
 0x28a   : > { %945 = dma.vmem_to_hbm [thread:$0]  (%p1146_p5), %s1223_s5, 16, %s1221_s8, %s811_s9  }
 0x28b PF: > { %p951_p1 = scmp.ge.s32.totalorder %s1063_s20, 2  ;;  %s835_s24 = sand.u32 1, %s1051_s17  }
 0x28c   : > { %s836_s28 = scalar_lea.sflag [#allocation4], %s835_s24 }
 0x28d   : > { %p948_p2 = pnand %p951_p1, %p1150_p6 }
 0x28f   : > { %1046 = dma.done.wait (!%p948_p2), %s836_s28, 16  }
 0x290   : > { %1048 = vsyncadd (!%p948_p2), %s836_s28, 4294967280  ;;  %p16_p3 = scmp.ge.s32.totalorder %s1133_s22, 4   ;;  %s1270_s17 = smov %s1055_s18 }
 0x291   : > { %s1271_s18 = smov %s1059_s19  ;;  %s1272_s19 = smov %s1144_s25 }
 0x292   : > { %s1273_s20 = smov %s1133_s22  ;;  %18 = sbr.rel (!%p16_p3) target bundleno = 6 (0x6), region = 71 }
 0x299   :  { %840 = vsyncpa [#allocation4], 1 }
 0x29a   :  { %842 = vsyncpa [#allocation4 + $0x1], 1 }

// kernel: forward.20
= control target key start
LH: loop header
LB: loop body
LE: loop exit
PB: predicated region body
PF: predicated region fallthrough
CT: control target
= control target key end

     0   :  { %s2350_s24 = smov 0   ;;  %s2627_s0 = inlined_call_operand.vmem [shape: bf16[2,2,128], index: 0, kind: input, shape index: {}]   ;;  %s2628_s1 = inlined_call_operand.vmem [shape: f32[2,2,10], index: 1, kind: input, shape index: {}]   ;;  %s2629_s2 = inlined_call_operand.vmem [shape: f32[2,2,1], index: 2, kind: input, shape index: {}]   ;;  %s2630_s3 = inlined_call_operand.vmem [shape: f32[2,2,1], index: 3, kind: input, shape index: {}]   ;;  %s2631_s4 = inlined_call_operand.vmem [shape: f32[2,2,10], index: 4, kind: input, shape index: {}]   ;;  %s2632_s5 = inlined_call_operand.vmem [shape: f32[2,2,1], index: 5, kind: input, shape index: {}]   ;;  %s2633_s6 = inlined_call_operand.vmem [shape: f32[2,2,1], index: 6, kind: input, shape index: {}]   ;;  %s2634_s7 = inlined_call_operand.vmem [shape: bf16[2,2,128], index: 7, kind: output, shape index: {}]  }
   0x1 LB: > { %s2055_s25 = sadd.s32 4294967295, %s2297_s24   ;;  %p2059_p0 = scmp.ge.s32.totalorder %s2297_s24, 1  ;;  %s2297_s24 = sphi %s2350_s24, %s17_s24  }
   0x2   : > { %p235_p1 = scmp.lt.s32.totalorder %s2297_s24, 3 }
   0x4   : > { %p236_p2 = pnand %p2059_p0, %p235_p1 }
   0x5   : > { %v271_v0 = vld [vmem:[%s2630_s3] sm:$0x3] (!%p236_p2)  ;;  %v2299_v1 = vmov (!%p236_p2), 0   ;;  %v2080_v2 = vld [vmem:[%s2630_s3 + $0x2] sm:$0x3] (!%p236_p2)  ;;  %s2300_s9 = smov (!%p236_p2), 126   ;;  %v286_v6 = vlaneseq (!%p236_p2) }
   0x6   : > { %239 = sbr.rel (%p236_p2) target bundleno = 1138 (0x472), region = 48  ;;  %2289 = vset.pattern.permute.xlu0 (!%p236_p2), %v2299_v1  ;;  %2290 = vset.pattern.permute.xlu1 (!%p236_p2), %v2299_v1  ;;  %v2367_v3 = vld [vmem:[%s2628_s1] sm:$0x3] (!%p236_p2)  ;;  %p263_p3 = scmp.lt.s32.totalorder (!%p236_p2), %s2055_s25, 1  ;;  %v2301_v4 = vmov (!%p236_p2), 1983009808  }
   0x7   : > { %275 = vperm.xlu0 (!%p236_p2), %2289, %v271_v0   ;;  %v284_v5 = vunpack.c.l.s4 (!%p236_p2), %v2301_v4  ;;  %v287_v10 = vshrl.u32 (!%p236_p2), %v286_v6, 7  ;;  %s2302_s13 = smov (!%p236_p2), 2   ;;  %v2303_v20 = vmov (!%p236_p2), 0.0   ;;  %vm2304_vm1 = vmmov (!%p236_p2), 0   ;;  %s2305_s14 = smov (!%p236_p2), 127  }
   0x8   : > { %2148 = vmatprep.subr.mxu0 (!%p236_p2), %v2303_v20  ;;  %2173 = vmatprep.subr.mxu1 (!%p236_p2), %v2303_v20  ;;  %vm293_vm2 = vcmask (!%p236_p2), 15360   ;;  %s2306_s15 = smov (!%p236_p2), 124   ;;  %s2307_s16 = smov (!%p236_p2), 122   ;;  %v2409_v24 = vld [vmem:[%s2628_s1 + $0x2] sm:$0x3] (!%p236_p2)  ;;  %vm305_vm3 = vcmask (!%p236_p2), 1039360  }
   0x9   : > { %v285_v9 = vunpack.c.0.s8 (!%p236_p2), %v284_v5  ;;  %2150 = vmatprep.mubr.msk.f32.mxu0 (!%p236_p2), %vm2304_vm1, %v2303_v20  ;;  %2175 = vmatprep.mubr.msk.f32.mxu1 (!%p236_p2), %vm2304_vm1, %v2303_v20  ;;  %s2308_s17 = smov (!%p236_p2), 125   ;;  %s2309_s20 = smov (!%p236_p2), 120   ;;  %v281_v28 = vld [vmem:[%s2629_s2] sm:$0x3] (!%p236_p2)  ;;  %v2082_v29 = vld [vmem:[%s2629_s2 + $0x2] sm:$0x3] (!%p236_p2) }
   0xa   : > { %v711_v30 = vld [vmem:[%s2633_s6] sm:$0x3] (!%p236_p2)  ;;  %v2093_v31 = vld [vmem:[%s2633_s6 + $0x2] sm:$0x3] (!%p236_p2)  ;;  %vm309_vm4 = vcmask (!%p236_p2), 1041408   ;;  %vm462_vm5 = vcmask (!%p236_p2), 1031168  }
   0xb   : > { %1144 = vperm.xlu0 (!%p236_p2), %2289, %v2080_v2   ;;  %v288_v12 = vsub.s32 (!%p236_p2), %v285_v9, %v287_v10  ;;  %vm545_vm6 = vcmask (!%p236_p2), 1022976   ;;  %vm628_vm7 = vcmask (!%p236_p2), 1014784  }
   0xd   : > { %s2636_s25 = smov (!%p263_p3, %s2055_s25), 1 }
   0xe   : > { %s265_s12 = scalar_lea.vmem %s2627_s0, %s2636_s25 }
   0xf   : > { %297 = vrot.lane.b32.xlu0 %v2367_v3, %s2300_s9  ;;  %v269_v7 = vld [vmem:[%s265_s12] sm:$0x1] }
  0x10   : > { %v2377_v8 = vunpack.c.l.bf16 %v269_v7 }
  0x12   : > { %vm272_vm0 = vcmp.ge.f32.partialorder %v2377_v8, 0.0 }
  0x86   : > { %v276_v11 = vpop.permute.xlu0 %275 }
  0x87   : > { %v278_v13 = vmul.f32 %v276_v11, %v2377_v8 }
  0x89   : > { %v279_v14 = vsel %vm272_vm0, %v2377_v8, %v278_v13 }
  0x8a   : > { %v1145_v15 = vpop.permute.xlu0 %1144  ;;  %v289_v16 = vrot.slane %v279_v14, %v288_v12 }
  0x8b   : > { %v1147_v17 = vmul.f32 %v1145_v15, %v2377_v8 }
  0x8c   : > { %290 = vrot.lane.b32.xlu1 %v289_v16, %s2302_s13 }
  0x8d   : > { %v1148_v18 = vsel %vm272_vm0, %v2377_v8, %v1147_v17 }
  0x8e   : > { %v1160_v19 = vrot.slane %v1148_v18, %v288_v12  ;;  %v298_v32 = vpop.permute.xlu0 %297 }
  0x90   : > { %1161 = vrot.lane.b32.xlu1 %v1160_v19, %s2302_s13 }
  0xfe   : > { %v291_v21 = vpop.permute.xlu1 %290 }
  0xff   : > { %v294_v22 = vsel %vm293_vm2, 0.0, %v291_v21  ;;  %v295_v23 = vsel %vm293_vm2, %v291_v21, 0.0 }
 0x100   : > { %303 = vrot.lane.b32.xlu1 %v295_v23, %s2305_s14  ;;  %301 = vrot.lane.b32.xlu0 %v294_v22, %s2305_s14 }
 0x102   : > { %v1162_v25 = vpop.permute.xlu1 %1161 }
 0x103   : > { %v2416_v26 = vsel %vm293_vm2, 0.0, %v1162_v25  ;;  %v1165_v27 = vsel %vm293_vm2, %v1162_v25, 0.0 }
 0x104   : > { %456 = vrot.lane.b32.xlu1 %v2367_v3, %s2306_s15  ;;  %539 = vrot.lane.b32.xlu0 %v2367_v3, %s2307_s16 }
 0x108   : > { %458 = vrot.lane.b32.xlu1 %v294_v22, %s2300_s9  ;;  %460 = vrot.lane.b32.xlu0 %v295_v23, %s2300_s9 }
 0x10c   : > { %543 = vrot.lane.b32.xlu1 %v295_v23, %s2308_s17  ;;  %541 = vrot.lane.b32.xlu0 %v294_v22, %s2308_s17 }
 0x110   : > { %624 = vrot.lane.b32.xlu1 %v294_v22, %s2306_s15  ;;  %626 = vrot.lane.b32.xlu0 %v295_v23, %s2306_s15 }
 0x114   : > { %622 = vrot.lane.b32.xlu1 %v2367_v3, %s2309_s20  ;;  %1167 = vrot.lane.b32.xlu0 %v2409_v24, %s2300_s9 }
 0x118   : > { %1173 = vrot.lane.b32.xlu1 %v1165_v27, %s2305_s14  ;;  %1171 = vrot.lane.b32.xlu0 %v2416_v26, %s2305_s14 }
 0x11c   : > { %1324 = vrot.lane.b32.xlu1 %v2409_v24, %s2306_s15  ;;  %1406 = vrot.lane.b32.xlu0 %v2409_v24, %s2307_s16 }
 0x120   : > { %1326 = vrot.lane.b32.xlu1 %v2416_v26, %s2300_s9  ;;  %1328 = vrot.lane.b32.xlu0 %v1165_v27, %s2300_s9 }
 0x124   : > { %1410 = vrot.lane.b32.xlu1 %v1165_v27, %s2308_s17  ;;  %1408 = vrot.lane.b32.xlu0 %v2416_v26, %s2308_s17 }
 0x128   : > { %1490 = vrot.lane.b32.xlu1 %v2416_v26, %s2306_s15  ;;  %1492 = vrot.lane.b32.xlu0 %v1165_v27, %s2306_s15 }
 0x12c   : > { %1488 = vrot.lane.b32.xlu1 %v2409_v24, %s2309_s20  ;;  %707 = vperm.xlu0 %2289, %v281_v28  }
 0x130   : > { %1572 = vperm.xlu0 %2289, %v2082_v29   ;;  %715 = vperm.xlu1 %2290, %v711_v30  }
 0x134   : > { %1581 = vperm.xlu1 %2290, %v2093_v31  }
 0x172   : > { %v302_v33 = vpop.permute.xlu0 %301  ;;  %v304_v34 = vpop.permute.xlu1 %303 }
 0x173   : > { %v306_v35 = vsel %vm305_vm3, %v302_v33, %v304_v34 }
 0x174   : > { %2149 = vmatpush3.msk.msra.mxu0 %vm309_vm4, %v306_v35 }
 0x175   : > { %2151 = vmatmul.mubr.msk.f32.vlgmr.msra.gmra.mrb[0].mxu0 %vm293_vm2, %v298_v32  ;;  %2153 = vmatprep.subr.mxu0 %v2303_v20 }
 0x176   : > { %v540_v36 = vpop.permute.xlu0 %539  ;;  %2154 = vmatpush3.msk.msra.mxu0 %vm309_vm4, %v294_v22  ;;  %v457_v37 = vpop.permute.xlu1 %456  ;;  %2155 = vmatprep.mubr.msk.f32.mxu0 %vm2304_vm1, %v2303_v20 }
 0x177   : > { %2158 = vmatprep.subr.mxu0 %v2303_v20 }
 0x179   : > { %2156 = vmatmul.mubr.msk.f32.vlgmr.msra.gmra.mrb[2].mxu0 %vm293_vm2, %v2367_v3 }
 0x17a   : > { %v461_v38 = vpop.permute.xlu0 %460  ;;  %v459_v39 = vpop.permute.xlu1 %458  ;;  %2160 = vmatprep.mubr.msk.f32.mxu0 %vm2304_vm1, %v2303_v20 }
 0x17b   : > { %v463_v40 = vsel %vm462_vm5, %v459_v39, %v461_v38 }
 0x17c   : > { %2159 = vmatpush3.msk.msra.mxu0 %vm309_vm4, %v463_v40 }
 0x17d   : > { %2161 = vmatmul.mubr.msk.f32.vlgmr.msra.gmra.mrb[4].mxu0 %vm293_vm2, %v457_v37  ;;  %2163 = vmatprep.subr.mxu0 %v2303_v20 }
 0x17e   : > { %v542_v41 = vpop.permute.xlu0 %541  ;;  %v544_v42 = vpop.permute.xlu1 %543  ;;  %2165 = vmatprep.mubr.msk.f32.mxu0 %vm2304_vm1, %v2303_v20 }
 0x17f   : > { %v546_v43 = vsel %vm545_vm6, %v542_v41, %v544_v42 }
 0x180   : > { %2164 = vmatpush3.msk.msra.mxu0 %vm309_vm4, %v546_v43  ;;  %v720_v43 = vld [vmem:[%s2631_s4] sm:$0x3] }
 0x181   : > { %2166 = vmatmul.mubr.msk.f32.vlgmr.msra.gmra.mrb[6].mxu0 %vm293_vm2, %v540_v36  ;;  %2168 = vmatprep.subr.mxu0 %v2303_v20 }
 0x182   : > { %v627_v44 = vpop.permute.xlu0 %626  ;;  %v625_v45 = vpop.permute.xlu1 %624  ;;  %2170 = vmatprep.mubr.msk.f32.mxu0 %vm2304_vm1, %v2303_v20 }
 0x183   : > { %v629_v46 = vsel %vm628_vm7, %v625_v45, %v627_v44 }
 0x184   : > { %2169 = vmatpush3.msk.msra.mxu0 %vm309_vm4, %v629_v46 }
 0x185   : > { %2198 = vmatprep.subr.mxu0 %v2303_v20 }
 0x186   : > { %v1168_v47 = vpop.permute.xlu0 %1167  ;;  %v623_v48 = vpop.permute.xlu1 %622 }
 0x187   : > { %2171 = vmatmul.mubr.msk.f32.vlgmr.msra.gmra.mrb[8].mxu0 %vm293_vm2, %v623_v48  ;;  %v2095_v48 = vld [vmem:[%s2632_s5 + $0x2] sm:$0x3] }
 0x188   : > { %2200 = vmatprep.mubr.msk.f32.mxu0 %vm2304_vm1, %v2303_v20 }
 0x18a   : > { %v1172_v49 = vpop.permute.xlu0 %1171  ;;  %v1174_v50 = vpop.permute.xlu1 %1173 }
 0x18b   : > { %v1175_v51 = vsel %vm305_vm3, %v1172_v49, %v1174_v50  ;;  %v721_v49 = vld [vmem:[%s2632_s5] sm:$0x3] }
 0x18c   : > { %2199 = vmatpush3.msk.msra.mxu0 %vm309_vm4, %v1175_v51 }
 0x18d   : > { %2201 = vmatmul.mubr.msk.f32.vlgmr.msra.gmra.mrb[10].mxu0 %vm293_vm2, %v1168_v47  ;;  %2203 = vmatprep.subr.mxu0 %v2303_v20  ;;  %v2536_v47 = vld [vmem:[%s2631_s4 + $0x2] sm:$0x3] }
 0x18e   : > { %v1407_v52 = vpop.permute.xlu0 %1406  ;;  %2204 = vmatpush3.msk.msra.mxu0 %vm309_vm4, %v2416_v26  ;;  %v1325_v53 = vpop.permute.xlu1 %1324  ;;  %2205 = vmatprep.mubr.msk.f32.mxu0 %vm2304_vm1, %v2303_v20 }
 0x18f   : > { %2208 = vmatprep.subr.mxu0 %v2303_v20 }
 0x191   : > { %2206 = vmatmul.mubr.msk.f32.vlgmr.msra.gmra.mrb[12].mxu0 %vm293_vm2, %v2409_v24 }
 0x192   : > { %v1329_v54 = vpop.permute.xlu0 %1328  ;;  %v1327_v55 = vpop.permute.xlu1 %1326  ;;  %2210 = vmatprep.mubr.msk.f32.mxu0 %vm2304_vm1, %v2303_v20 }
 0x193   : > { %v1330_v56 = vsel %vm462_vm5, %v1327_v55, %v1329_v54 }
 0x194   : > { %2209 = vmatpush3.msk.msra.mxu0 %vm309_vm4, %v1330_v56 }
 0x195   : > { %2211 = vmatmul.mubr.msk.f32.vlgmr.msra.gmra.mrb[14].mxu0 %vm293_vm2, %v1325_v53  ;;  %2213 = vmatprep.subr.mxu0 %v2303_v20 }
 0x196   : > { %v1409_v57 = vpop.permute.xlu0 %1408  ;;  %v1411_v58 = vpop.permute.xlu1 %1410  ;;  %2215 = vmatprep.mubr.msk.f32.mxu0 %vm2304_vm1, %v2303_v20 }
 0x197   : > { %v1412_v59 = vsel %vm545_vm6, %v1409_v57, %v1411_v58 }
 0x198   : > { %2214 = vmatpush3.msk.msra.mxu0 %vm309_vm4, %v1412_v59 }
 0x199   : > { %2216 = vmatmul.mubr.msk.f32.vlgmr.msra.gmra.mrb[16].mxu0 %vm293_vm2, %v1407_v52  ;;  %2218 = vmatprep.subr.mxu0 %v2303_v20 }
 0x19a   : > { %v1493_v60 = vpop.permute.xlu0 %1492  ;;  %v1491_v61 = vpop.permute.xlu1 %1490  ;;  %2220 = vmatprep.mubr.msk.f32.mxu0 %vm2304_vm1, %v2303_v20 }
 0x19b   : > { %v1494_v62 = vsel %vm628_vm7, %v1491_v61, %v1493_v60 }
 0x19c   : > { %2219 = vmatpush3.msk.msra.mxu0 %vm309_vm4, %v1494_v62 }
 0x19e   : > { %v1489_v63 = vpop.permute.xlu1 %1488 }
 0x19f   : > { %2221 = vmatmul.mubr.msk.f32.vlgmr.msra.gmra.mrb[18].mxu0 %vm293_vm2, %v1489_v63 }
 0x1ab   : > { %v708_v15 = vpop.permute.xlu0 %707 }
 0x1af   : > { %v716_v17 = vpop.permute.xlu1 %715  ;;  %v1573_v35 = vpop.permute.xlu0 %1572 }
 0x1b3   : > { %v1582_v37 = vpop.permute.xlu1 %1581 }
 0x248   : > { %v378_v0 = vpop.f32.mrb[0].mxu0 }
 0x249   : > { %v2152_v1 = vpop.f32.mrb[1].mxu0 }
 0x24c   : > { %v452_v2 = vpop.f32.mrb[2].mxu0 }
 0x24d   : > { %v453_v3 = vadd.f32 %v452_v2, %v378_v0  ;;  %v2157_v4 = vpop.f32.mrb[3].mxu0 }
 0x250   : > { %v534_v5 = vpop.f32.mrb[4].mxu0 }
 0x251   : > { %v538_v6 = vadd.f32 %v534_v5, %v453_v3  ;;  %v2162_v7 = vpop.f32.mrb[5].mxu0 }
 0x254   : > { %v617_v9 = vpop.f32.mrb[6].mxu0 }
 0x255   : > { %v621_v10 = vadd.f32 %v617_v9, %v538_v6  ;;  %v2167_v11 = vpop.f32.mrb[7].mxu0 }
 0x25a   : > { %v700_v12 = vpop.f32.mrb[8].mxu0 }
 0x25b   : > { %v704_v13 = vadd.f32 %v700_v12, %v621_v10  ;;  %v2172_v14 = vpop.f32.mrb[9].mxu0 }
 0x25d   : > { %v710_v16 = vadd.f32 %v708_v15, %v704_v13 }
 0x25f   : > { %v718_v18 = vmul.f32 %v716_v17, %v710_v16  ;;  %vm712_vm8 = vcmp.ge.f32.partialorder %v710_v16, 0.0 }
 0x260   : > { %v1246_v19 = vpop.f32.mrb[10].mxu0 }
 0x261   : > { %v719_v21 = vsel %vm712_vm8, %v710_v16, %v718_v18  ;;  %v2202_v22 = vpop.f32.mrb[11].mxu0 }
 0x262   : > { %723 = vrot.lane.b32.xlu0 %v719_v21, %s2302_s13 }
 0x264   : > { %v1320_v23 = vpop.f32.mrb[12].mxu0 }
 0x265   : > { %v1321_v24 = vadd.f32 %v1320_v23, %v1246_v19  ;;  %v2207_v25 = vpop.f32.mrb[13].mxu0  ;;  %v2248_v19 = vadd.f32 %v2377_v8, %v2377_v8 }
 0x268   : > { %v1401_v26 = vpop.f32.mrb[14].mxu0 }
 0x269   : > { %v1405_v27 = vadd.f32 %v1401_v26, %v1321_v24  ;;  %v2212_v28 = vpop.f32.mrb[15].mxu0 }
 0x26c   : > { %v1483_v29 = vpop.f32.mrb[16].mxu0 }
 0x26d   : > { %v1487_v30 = vadd.f32 %v1483_v29, %v1405_v27  ;;  %v2217_v31 = vpop.f32.mrb[17].mxu0 }
 0x272   : > { %v1565_v32 = vpop.f32.mrb[18].mxu0 }
 0x273   : > { %v1569_v33 = vadd.f32 %v1565_v32, %v1487_v30  ;;  %v2222_v34 = vpop.f32.mrb[19].mxu0 }
 0x275   : > { %v1575_v36 = vadd.f32 %v1573_v35, %v1569_v33 }
 0x277   : > { %vm1578_vm9 = vcmp.ge.f32.partialorder %v1575_v36, 0.0  ;;  %v1584_v38 = vmul.f32 %v1582_v37, %v1575_v36 }
 0x279   : > { %v1585_v39 = vsel %vm1578_vm9, %v1575_v36, %v1584_v38 }
 0x27a   : > { %1591 = vrot.lane.b32.xlu1 %v1585_v39, %s2302_s13 }
 0x2d4   : > { %v724_v40 = vpop.permute.xlu0 %723 }
 0x2d5   : > { %v726_v41 = vsel %vm293_vm2, 0.0, %v724_v40  ;;  %v727_v42 = vsel %vm293_vm2, %v724_v40, 0.0 }
 0x2d6   : > { %733 = vrot.lane.b32.xlu0 %v726_v41, %s2305_s14  ;;  %735 = vrot.lane.b32.xlu1 %v727_v42, %s2305_s14 }
 0x2da   : > { %729 = vrot.lane.b32.xlu0 %v720_v43, %s2300_s9  ;;  %888 = vrot.lane.b32.xlu1 %v726_v41, %s2300_s9 }
 0x2de   : > { %890 = vrot.lane.b32.xlu0 %v727_v42, %s2300_s9  ;;  %886 = vrot.lane.b32.xlu1 %v720_v43, %s2306_s15 }
 0x2e2   : > { %970 = vrot.lane.b32.xlu0 %v726_v41, %s2308_s17  ;;  %972 = vrot.lane.b32.xlu1 %v727_v42, %s2308_s17 }
 0x2e6   : > { %968 = vrot.lane.b32.xlu0 %v720_v43, %s2307_s16  ;;  %1052 = vrot.lane.b32.xlu1 %v726_v41, %s2306_s15 }
 0x2ea   : > { %1054 = vrot.lane.b32.xlu0 %v727_v42, %s2306_s15  ;;  %1050 = vrot.lane.b32.xlu1 %v720_v43, %s2309_s20 }
 0x2ec   : > { %v1592_v44 = vpop.permute.xlu1 %1591 }
 0x2ed   : > { %v2527_v45 = vsel %vm293_vm2, 0.0, %v1592_v44  ;;  %v1595_v46 = vsel %vm293_vm2, %v1592_v44, 0.0 }
 0x2ee   : > { %1603 = vrot.lane.b32.xlu1 %v1595_v46, %s2305_s14  ;;  %1601 = vrot.lane.b32.xlu0 %v2527_v45, %s2305_s14 }
 0x2f2   : > { %1756 = vrot.lane.b32.xlu1 %v2527_v45, %s2300_s9  ;;  %1597 = vrot.lane.b32.xlu0 %v2536_v47, %s2300_s9 }
 0x2f6   : > { %1754 = vrot.lane.b32.xlu1 %v2536_v47, %s2306_s15  ;;  %1758 = vrot.lane.b32.xlu0 %v1595_v46, %s2300_s9 }
 0x2fa   : > { %1840 = vrot.lane.b32.xlu1 %v1595_v46, %s2308_s17  ;;  %1838 = vrot.lane.b32.xlu0 %v2527_v45, %s2308_s17  ;;  %s268_s17 = scalar_lea.vmem %s2634_s7, %s2636_s25 }
 0x2fe   : > { %1920 = vrot.lane.b32.xlu1 %v2527_v45, %s2306_s15  ;;  %1836 = vrot.lane.b32.xlu0 %v2536_v47, %s2307_s16 }
 0x302   : > { %1918 = vrot.lane.b32.xlu1 %v2536_v47, %s2309_s20  ;;  %1922 = vrot.lane.b32.xlu0 %v1595_v46, %s2306_s15 }
 0x306   : > { %2002 = vperm.xlu1 %2290, %v2095_v48   ;;  %1134 = vperm.xlu0 %2289, %v721_v49  }
 0x348   : > { %v734_v50 = vpop.permute.xlu0 %733  ;;  %v736_v51 = vpop.permute.xlu1 %735 }
 0x349   : > { %v737_v52 = vsel %vm305_vm3, %v734_v50, %v736_v51 }
 0x34a   : > { %2174 = vmatpush3.msk.msra.mxu1 %vm309_vm4, %v737_v52 }
 0x34b   : > { %2178 = vmatprep.subr.mxu1 %v2303_v20 }
 0x34c   : > { %v730_v53 = vpop.permute.xlu0 %729  ;;  %v889_v54 = vpop.permute.xlu1 %888 }
 0x34d   : > { %2176 = vmatmul.mubr.msk.f32.vlgmr.msra.gmra.mrb[0].mxu1 %vm293_vm2, %v730_v53 }
 0x34e   : > { %2179 = vmatpush3.msk.msra.mxu1 %vm309_vm4, %v726_v41  ;;  %2180 = vmatprep.mubr.msk.f32.mxu1 %vm2304_vm1, %v2303_v20 }
 0x34f   : > { %2183 = vmatprep.subr.mxu1 %v2303_v20 }
 0x350   : > { %v891_v55 = vpop.permute.xlu0 %890  ;;  %v887_v56 = vpop.permute.xlu1 %886 }
 0x351   : > { %v892_v57 = vsel %vm462_vm5, %v889_v54, %v891_v55 }
 0x354   : > { %v971_v58 = vpop.permute.xlu0 %970  ;;  %v973_v59 = vpop.permute.xlu1 %972 }
 0x355   : > { %2181 = vmatmul.mubr.msk.f32.vlgmr.msra.gmra.mrb[0].mxu1 %vm293_vm2, %v720_v43  ;;  %v974_v61 = vsel %vm545_vm6, %v971_v58, %v973_v59 }
 0x356   : > { %2184 = vmatpush3.msk.msra.mxu1 %vm309_vm4, %v892_v57  ;;  %2185 = vmatprep.mubr.msk.f32.mxu1 %vm2304_vm1, %v2303_v20 }
 0x357   : > { %2188 = vmatprep.subr.mxu1 %v2303_v20 }
 0x358   : > { %v969_v60 = vpop.permute.xlu0 %968  ;;  %v1053_v62 = vpop.permute.xlu1 %1052 }
 0x35c   : > { %v1055_v63 = vpop.permute.xlu0 %1054  ;;  %v1051_v0 = vpop.permute.xlu1 %1050 }
 0x35d   : > { %2186 = vmatmul.mubr.msk.f32.vlgmr.msra.gmra.mrb[0].mxu1 %vm293_vm2, %v887_v56  ;;  %v1056_v1 = vsel %vm628_vm7, %v1053_v62, %v1055_v63 }
 0x35e   : > { %2189 = vmatpush3.msk.msra.mxu1 %vm309_vm4, %v974_v61  ;;  %2190 = vmatprep.mubr.msk.f32.mxu1 %vm2304_vm1, %v2303_v20 }
 0x35f   : > { %2193 = vmatprep.subr.mxu1 %v2303_v20 }
 0x360   : > { %v1602_v2 = vpop.permute.xlu0 %1601  ;;  %v1604_v3 = vpop.permute.xlu1 %1603 }
 0x361   : > { %v1605_v4 = vsel %vm305_vm3, %v1602_v2, %v1604_v3 }
 0x364   : > { %v1598_v5 = vpop.permute.xlu0 %1597  ;;  %v1757_v6 = vpop.permute.xlu1 %1756 }
 0x365   : > { %2191 = vmatmul.mubr.msk.f32.vlgmr.msra.gmra.mrb[0].mxu1 %vm293_vm2, %v969_v60 }
 0x366   : > { %2194 = vmatpush3.msk.msra.mxu1 %vm309_vm4, %v1056_v1  ;;  %2195 = vmatprep.mubr.msk.f32.mxu1 %vm2304_vm1, %v2303_v20 }
 0x367   : > { %2223 = vmatprep.subr.mxu1 %v2303_v20 }
 0x368   : > { %v1759_v7 = vpop.permute.xlu0 %1758  ;;  %v1755_v9 = vpop.permute.xlu1 %1754 }
 0x369   : > { %v1760_v10 = vsel %vm462_vm5, %v1757_v6, %v1759_v7 }
 0x36c   : > { %v1839_v11 = vpop.permute.xlu0 %1838  ;;  %v1841_v12 = vpop.permute.xlu1 %1840 }
 0x36d   : > { %2196 = vmatmul.mubr.msk.f32.vlgmr.msra.gmra.mrb[0].mxu1 %vm293_vm2, %v1051_v0  ;;  %v1842_v14 = vsel %vm545_vm6, %v1839_v11, %v1841_v12 }
 0x36e   : > { %2224 = vmatpush3.msk.msra.mxu1 %vm309_vm4, %v1605_v4  ;;  %2225 = vmatprep.mubr.msk.f32.mxu1 %vm2304_vm1, %v2303_v20 }
 0x36f   : > { %2228 = vmatprep.subr.mxu1 %v2303_v20 }
 0x370   : > { %v1837_v13 = vpop.permute.xlu0 %1836  ;;  %v1921_v16 = vpop.permute.xlu1 %1920 }
 0x374   : > { %v1923_v15 = vpop.permute.xlu0 %1922  ;;  %v1919_v18 = vpop.permute.xlu1 %1918 }
 0x375   : > { %2226 = vmatmul.mubr.msk.f32.vlgmr.msra.gmra.mrb[0].mxu1 %vm293_vm2, %v1598_v5  ;;  %v1924_v17 = vsel %vm628_vm7, %v1921_v16, %v1923_v15 }
 0x376   : > { %2229 = vmatpush3.msk.msra.mxu1 %vm309_vm4, %v2527_v45  ;;  %2230 = vmatprep.mubr.msk.f32.mxu1 %vm2304_vm1, %v2303_v20 }
 0x377   : > { %2233 = vmatprep.subr.mxu1 %v2303_v20 }
 0x37d   : > { %2231 = vmatmul.mubr.msk.f32.vlgmr.msra.gmra.mrb[0].mxu1 %vm293_vm2, %v2536_v47 }
 0x37e   : > { %2234 = vmatpush3.msk.msra.mxu1 %vm309_vm4, %v1760_v10  ;;  %2235 = vmatprep.mubr.msk.f32.mxu1 %vm2304_vm1, %v2303_v20 }
 0x37f   : > { %2238 = vmatprep.subr.mxu1 %v2303_v20 }
 0x385   : > { %2236 = vmatmul.mubr.msk.f32.vlgmr.msra.gmra.mrb[0].mxu1 %vm293_vm2, %v1755_v9  ;;  %v1135_v21 = vpop.permute.xlu0 %1134  ;;  %v2003_v26 = vpop.permute.xlu1 %2002 }
 0x386   : > { %2239 = vmatpush3.msk.msra.mxu1 %vm309_vm4, %v1842_v14  ;;  %2240 = vmatprep.mubr.msk.f32.mxu1 %vm2304_vm1, %v2303_v20  ;;  %v2249_v22 = vadd.f32 %v2248_v19, %v1135_v21 }
 0x387   : > { %2243 = vmatprep.subr.mxu1 %v2303_v20 }
 0x38d   : > { %2241 = vmatmul.mubr.msk.f32.vlgmr.msra.gmra.mrb[0].mxu1 %vm293_vm2, %v1837_v13 }
 0x38e   : > { %2244 = vmatpush3.msk.msra.mxu1 %vm309_vm4, %v1924_v17  ;;  %2245 = vmatprep.mubr.msk.f32.mxu1 %vm2304_vm1, %v2303_v20 }
 0x395   : > { %2246 = vmatmul.mubr.msk.f32.vlgmr.msra.gmra.mrb[0].mxu1 %vm293_vm2, %v1919_v18 }
 0x468   : > { %v1995_v23 = vpop.f32.mrb[0].mxu1 }
 0x469   : > { %v2250_v24 = vadd.f32 %v2249_v22, %v1995_v23  ;;  %v2247_v25 = vpop.f32.mrb[1].mxu1 }
 0x46b   : > { %v2251_v27 = vadd.f32 %v2250_v24, %v2003_v26 }
 0x46d   : > { %v2008_v28 = vmul.f32 0.5, %v2251_v27 }
 0x46f   : > { %v2009_v29 = vpack.c.bf16 %v2008_v28, %v2008_v28 }
 0x471   : > { %2010 = vst [vmem:[%s268_s17] sm:$0x1] %v2009_v29 }
 0x472 PF: > { %s17_s24 = sadd.s32 1, %s2297_s24  }
 0x473   : > { %p14_p4 = scmp.ge.s32.totalorder %s17_s24, 4  }
 0x475   :  { %16 = sbr.rel (!%p14_p4) target bundleno = 1 (0x1), region = 84 }

</bundles_post_ra>
